<compile_context>
chip_gen: v7x
topology: tpu7x:2x2x1
jax: 0.10.0
libtpu: 0.0.40
codegen_flags: <defaults>
</compile_context>

<pallas_src>
import functools
import math

import jax
import jax.numpy as jnp
from jax.experimental import pallas as pl
from jax.experimental.pallas import tpu as pltpu

HIDDEN_DIMS = [2048, 1024, 512, 256, 128, 64]
_CHUNK_K = 512  # K-chunk size (rows) for streaming large hidden-layer weights


def _chunk_sizes(k):
    """Static (trace-time) split of a weight's K dimension into DMA chunks."""
    if k > _CHUNK_K and k % _CHUNK_K == 0:
        return (_CHUNK_K,) * (k // _CHUNK_K)
    return (k,)


def _fused_mlp_kernel(*refs, n_layers, chunk_plan):
    """Fused (Linear->ReLU->[Dropout=id])* -> Linear -> sigmoid forward.

    Positional refs (layout fixed at trace time):
      [0]                x_ref      (B, D_in)    f32  VMEM
      [1 .. n]           w_hbm[i]                HBM (pl.ANY)
                           hidden i: (K_i, N_i)  bf16
                           last:     (1, K_last) f32  (lane-dense row vector)
      [1+n .. 2n]        b_ref[i]   (1, N_i)     f32  VMEM
      [1+2n]             o_ref      (B, 1)       f32  VMEM (output)
      [2+2n .. 1+3n]     w_buf[i]                VMEM scratch (same shape/dtype)
      [2+3n]             sem        DMA semaphores, one per weight chunk
    """
    x_ref = refs[0]
    w_hbm = refs[1:1 + n_layers]
    b_ref = refs[1 + n_layers:1 + 2 * n_layers]
    o_ref = refs[1 + 2 * n_layers]
    w_buf = refs[2 + 2 * n_layers:2 + 3 * n_layers]
    sem = refs[2 + 3 * n_layers]

    # Issue every weight-chunk DMA up front, in consumption order: the DMA
    # engine streams them back-to-back while the per-layer matmuls (tiny vs
    # the weight traffic) execute as their chunks land.
    copies = []
    sem_idx = 0
    for i in range(n_layers):
        sizes = chunk_plan[i]
        layer_copies = []
        off = 0
        for sz in sizes:
            if len(sizes) == 1:
                src, dst = w_hbm[i], w_buf[i]
            else:
                src = w_hbm[i].at[pl.ds(off, sz), :]
                dst = w_buf[i].at[pl.ds(off, sz), :]
            cp = pltpu.make_async_copy(src, dst, sem.at[sem_idx])
            cp.start()
            layer_copies.append(cp)
            off += sz
            sem_idx += 1
        copies.append(layer_copies)

    # Activations stay resident in vregs/VMEM across all layers.
    h = x_ref[...]  # (B, D_in) f32

    # Hidden layers: Linear -> ReLU (Dropout is identity at inference).
    for i in range(n_layers - 1):
        sizes = chunk_plan[i]
        h16 = h.astype(jnp.bfloat16)
        acc = None
        off = 0
        for c, sz in enumerate(sizes):
            copies[i][c].wait()
            if len(sizes) == 1:
                lhs, rhs = h16, w_buf[i][...]
            else:
                lhs = h16[:, off:off + sz]
                rhs = w_buf[i][pl.ds(off, sz), :]
            part = jnp.dot(lhs, rhs, preferred_element_type=jnp.float32)
            acc = part if acc is None else acc + part
            off += sz
        h = jnp.maximum(acc + b_ref[i][...], 0.0)

    # Final Linear(K, 1) + sigmoid: lane-dense (1, K) f32 weight -> broadcast
    # multiply + cross-lane reduction (free slack in this DMA-bound kernel).
    li = n_layers - 1
    copies[li][0].wait()
    w_last = w_buf[li][...]  # (1, K_last) f32
    logit = jnp.sum(h * w_last, axis=-1, keepdims=True) + b_ref[li][...]
    o_ref[...] = jax.nn.sigmoid(logit).astype(o_ref.dtype)


def _padded_vmem_bytes(shape, dtype):
    """Conservative VMEM footprint of a buffer, padded to hardware tiles."""
    dtype = jnp.dtype(dtype)
    if len(shape) == 1:
        r, c = 1, shape[0]
        lead_dims = ()
    else:
        r, c = shape[-2], shape[-1]
        lead_dims = shape[:-2]
    sub = 8 * max(1, 4 // dtype.itemsize)  # 8 sublanes for f32 tiles, 16 for bf16
    r_pad = -(-r // sub) * sub
    c_pad = -(-c // 128) * 128
    lead = 1
    for d in lead_dims:
        lead *= d
    return lead * r_pad * c_pad * dtype.itemsize


def fused_mlp_forward(x, weights, biases):
    """Run the fused MLP kernel (weights/biases from prepare_kernel_params)."""
    n_layers = len(weights)
    B = x.shape[0]

    chunk_plan = tuple(
        _chunk_sizes(w.shape[0]) if i < n_layers - 1 else (w.shape[0],)
        for i, w in enumerate(weights)
    )
    total_dma = sum(len(c) for c in chunk_plan)

    kernel = functools.partial(
        _fused_mlp_kernel, n_layers=n_layers, chunk_plan=chunk_plan)

    in_specs = (
        [pl.BlockSpec(memory_space=pltpu.MemorySpace.VMEM)]                # x
        + [pl.BlockSpec(memory_space=pl.ANY)] * n_layers                   # weights stay in HBM
        + [pl.BlockSpec(memory_space=pltpu.MemorySpace.VMEM)] * n_layers   # biases (tiny)
    )
    scratch_shapes = (
        [pltpu.VMEM(w.shape, w.dtype) for w in weights]   # one buffer per layer weight
        + [pltpu.SemaphoreType.DMA((total_dma,))]
    )

    # Honest VMEM budget: weight scratch + x/bias/output buffers + headroom
    # for Mosaic internal scratch (~9 MiB for the 3-layer config vs the old
    # blanket 40 MiB) -- matters on v7x's 64 MiB physical VMEM.
    vmem_limit = _padded_vmem_bytes(x.shape, x.dtype)
    vmem_limit += sum(_padded_vmem_bytes(w.shape, w.dtype) for w in weights)
    vmem_limit += sum(_padded_vmem_bytes(b.shape, b.dtype) for b in biases)
    vmem_limit += _padded_vmem_bytes((B, 1), jnp.float32)
    vmem_limit = int(vmem_limit + (4 << 20))

    return pl.pallas_call(
        kernel,
        out_shape=jax.ShapeDtypeStruct((B, 1), jnp.float32),
        in_specs=in_specs,
        out_specs=pl.BlockSpec(memory_space=pltpu.MemorySpace.VMEM),
        scratch_shapes=scratch_shapes,
        compiler_params=pltpu.CompilerParams(vmem_limit_bytes=vmem_limit),
    )(x, *weights, *biases)


def binary_classification_forward(x, weights, biases):
    """Forward pass of BinaryClassificationModel (inference mode)."""
    return fused_mlp_forward(x, weights, biases)


def init_params(key, input_dim, num_fc_layers):
    """Deterministic init matching nn.Linear default U(-1/sqrt(fan_in), +...)."""
    num_layers = min(num_fc_layers, len(HIDDEN_DIMS) + 1)
    dims = [input_dim]
    for i in range(num_layers - 1):
        dims.append(HIDDEN_DIMS[i])
    dims.append(1)  # final Linear(current_dim, 1)

    params = []
    for i in range(len(dims) - 1):
        fan_in, fan_out = dims[i], dims[i + 1]
        key, kw, kb = jax.random.split(key, 3)
        bound = 1.0 / math.sqrt(fan_in)
        w = jax.random.uniform(
            kw, (fan_in, fan_out), jnp.float32, minval=-bound, maxval=bound)
        b = jax.random.uniform(
            kb, (fan_out,), jnp.float32, minval=-bound, maxval=bound)
        params.append((w, b))
    return params


def prepare_kernel_params(params):
    """One-time, kernel-ready prep (hoisted out of the forward):
      * hidden-layer weights -> bf16 (halves streamed HBM bytes),
      * biases -> (1, N) f32 rows,
      * final Linear(K, 1) -> lane-dense (1, K) f32 row vector (no zero pad)."""
    weights, biases = [], []
    last = len(params) - 1
    for i, (w, b) in enumerate(params):
        if i == last:
            weights.append(w.T.astype(jnp.float32))              # (1, K)
            biases.append(b.reshape(1, -1).astype(jnp.float32))  # (1, 1)
        else:
            weights.append(w.astype(jnp.bfloat16))
            biases.append(b.reshape(1, -1).astype(jnp.float32))
    return weights, biases


def reference_forward_bf16(weights, biases, x):
    """Plain-JAX reference using the SAME bf16 weights / compute dtype as the
    kernel (re-baselined tolerance target for the bf16 streaming change)."""
    n_layers = len(weights)
    h = x
    for i in range(n_layers - 1):
        y = jnp.dot(h.astype(jnp.bfloat16), weights[i],
                    preferred_element_type=jnp.float32) + biases[i]
        h = jnp.maximum(y, 0.0)
    logit = jnp.sum(h * weights[-1], axis=-1, keepdims=True) + biases[-1]
    return jax.nn.sigmoid(logit)


def reference_forward_f32(params, x):
    """Full-precision f32 reference matching the original PyTorch module."""
    h = x
    for w, b in params[:-1]:
        h = jnp.maximum(
            jnp.dot(h, w, precision=jax.lax.Precision.HIGHEST) + b, 0.0)
    w, b = params[-1]
    return jax.nn.sigmoid(
        jnp.dot(h, w, precision=jax.lax.Precision.HIGHEST) + b)


if __name__ == "__main__":
    key = jax.random.PRNGKey(0)
    k_param, k_x = jax.random.split(key)

    # Small synthetic "tile embeddings": batch=8, embedding dim=64.
    batch, input_dim = 8, 64
    # Linear(64,2048)+ReLU+Drop, Linear(2048,1024)+ReLU+Drop, Linear(1024,1), sigmoid
    num_fc_layers = 3

    params = init_params(k_param, input_dim, num_fc_layers)
    weights, biases = prepare_kernel_params(params)  # hoisted out of the forward

    x = jax.random.normal(k_x, (batch, input_dim), jnp.float32)

    fwd = jax.jit(binary_classification_forward)
    y = jax.block_until_ready(fwd(x, weights, biases))
    assert y.shape == (batch, 1), y.shape

    # (1) Tight check vs a reference using the same bf16 weights / compute.
    y_ref16 = reference_forward_bf16(weights, biases, x)
    err16 = float(jnp.max(jnp.abs(y - y_ref16)))
    assert err16 < 1e-4, err16

    # (2) Loose check vs the original full-f32 module semantics (bf16 weight
    #     quantization only perturbs the sigmoid output by O(1e-3)).
    y_ref32 = reference_forward_f32(params, x)
    err32 = float(jnp.max(jnp.abs(y - y_ref32)))
    assert err32 < 2e-2, err32

    print("KERNEL_OK")
</pallas_src>

<mosaic_0001>
module attributes {stable_mosaic.version = 11 : i64} {
  func.func @_fused_mlp_kernel(%arg0: memref<8x64xf32, #tpu.memory_space<vmem>>, %arg1: memref<64x2048xbf16, #tpu.memory_space<any>>, %arg2: memref<2048x1024xbf16, #tpu.memory_space<any>>, %arg3: memref<1x1024xf32, #tpu.memory_space<any>>, %arg4: memref<1x2048xf32, #tpu.memory_space<vmem>>, %arg5: memref<1x1024xf32, #tpu.memory_space<vmem>>, %arg6: memref<1x1xf32, #tpu.memory_space<vmem>>, %arg7: memref<8x1xf32, #tpu.memory_space<vmem>>, %arg8: memref<64x2048xbf16, #tpu.memory_space<vmem>>, %arg9: memref<2048x1024xbf16, #tpu.memory_space<vmem>>, %arg10: memref<1x1024xf32, #tpu.memory_space<vmem>>, %arg11: memref<6x!tpu.dma_semaphore, #tpu.memory_space<semaphore_mem>>) attributes {dimension_semantics = [], scalar_prefetch = 0 : i64, scratch_operands = 4 : i64, tpu.core_type = #tpu.core_type<tc>} {
    %c0_i32 = arith.constant 0 : i32
    %0 = tpu.memref_slice %arg11[%c0_i32] : memref<6x!tpu.dma_semaphore, #tpu.memory_space<semaphore_mem>> -> memref<1x!tpu.dma_semaphore, #tpu.memory_space<semaphore_mem>>
    %1 = tpu.memref_squeeze %0 : memref<1x!tpu.dma_semaphore, #tpu.memory_space<semaphore_mem>> -> memref<!tpu.dma_semaphore, #tpu.memory_space<semaphore_mem>>
    tpu.enqueue_dma source(%arg1 : memref<64x2048xbf16, #tpu.memory_space<any>>) target(%arg8 : memref<64x2048xbf16, #tpu.memory_space<vmem>>) target_semaphore(%1 : memref<!tpu.dma_semaphore, #tpu.memory_space<semaphore_mem>>)
    %c1_i32 = arith.constant 1 : i32
    %c0_i32_0 = arith.constant 0 : i32
    %c0_i32_1 = arith.constant 0 : i32
    %2 = tpu.memref_slice %arg2[%c0_i32_0, %c0_i32_1] : memref<2048x1024xbf16, #tpu.memory_space<any>> -> memref<512x1024xbf16, #tpu.memory_space<any>>
    %c0_i32_2 = arith.constant 0 : i32
    %c0_i32_3 = arith.constant 0 : i32
    %3 = tpu.memref_slice %arg9[%c0_i32_2, %c0_i32_3] : memref<2048x1024xbf16, #tpu.memory_space<vmem>> -> memref<512x1024xbf16, #tpu.memory_space<vmem>>
    %4 = tpu.memref_slice %arg11[%c1_i32] : memref<6x!tpu.dma_semaphore, #tpu.memory_space<semaphore_mem>> -> memref<1x!tpu.dma_semaphore, #tpu.memory_space<semaphore_mem>>
    %5 = tpu.memref_squeeze %4 : memref<1x!tpu.dma_semaphore, #tpu.memory_space<semaphore_mem>> -> memref<!tpu.dma_semaphore, #tpu.memory_space<semaphore_mem>>
    tpu.enqueue_dma source(%2 : memref<512x1024xbf16, #tpu.memory_space<any>>) target(%3 : memref<512x1024xbf16, #tpu.memory_space<vmem>>) target_semaphore(%5 : memref<!tpu.dma_semaphore, #tpu.memory_space<semaphore_mem>>)
    %c2_i32 = arith.constant 2 : i32
    %c512_i32 = arith.constant 512 : i32
    %c0_i32_4 = arith.constant 0 : i32
    %6 = tpu.memref_slice %arg2[%c512_i32, %c0_i32_4] : memref<2048x1024xbf16, #tpu.memory_space<any>> -> memref<512x1024xbf16, #tpu.memory_space<any>>
    %c512_i32_5 = arith.constant 512 : i32
    %c0_i32_6 = arith.constant 0 : i32
    %7 = tpu.memref_slice %arg9[%c512_i32_5, %c0_i32_6] : memref<2048x1024xbf16, #tpu.memory_space<vmem>> -> memref<512x1024xbf16, #tpu.memory_space<vmem>>
    %8 = tpu.memref_slice %arg11[%c2_i32] : memref<6x!tpu.dma_semaphore, #tpu.memory_space<semaphore_mem>> -> memref<1x!tpu.dma_semaphore, #tpu.memory_space<semaphore_mem>>
    %9 = tpu.memref_squeeze %8 : memref<1x!tpu.dma_semaphore, #tpu.memory_space<semaphore_mem>> -> memref<!tpu.dma_semaphore, #tpu.memory_space<semaphore_mem>>
    tpu.enqueue_dma source(%6 : memref<512x1024xbf16, #tpu.memory_space<any>>) target(%7 : memref<512x1024xbf16, #tpu.memory_space<vmem>>) target_semaphore(%9 : memref<!tpu.dma_semaphore, #tpu.memory_space<semaphore_mem>>)
    %c3_i32 = arith.constant 3 : i32
    %c1024_i32 = arith.constant 1024 : i32
    %c0_i32_7 = arith.constant 0 : i32
    %10 = tpu.memref_slice %arg2[%c1024_i32, %c0_i32_7] : memref<2048x1024xbf16, #tpu.memory_space<any>> -> memref<512x1024xbf16, #tpu.memory_space<any>>
    %c1024_i32_8 = arith.constant 1024 : i32
    %c0_i32_9 = arith.constant 0 : i32
    %11 = tpu.memref_slice %arg9[%c1024_i32_8, %c0_i32_9] : memref<2048x1024xbf16, #tpu.memory_space<vmem>> -> memref<512x1024xbf16, #tpu.memory_space<vmem>>
    %12 = tpu.memref_slice %arg11[%c3_i32] : memref<6x!tpu.dma_semaphore, #tpu.memory_space<semaphore_mem>> -> memref<1x!tpu.dma_semaphore, #tpu.memory_space<semaphore_mem>>
    %13 = tpu.memref_squeeze %12 : memref<1x!tpu.dma_semaphore, #tpu.memory_space<semaphore_mem>> -> memref<!tpu.dma_semaphore, #tpu.memory_space<semaphore_mem>>
    tpu.enqueue_dma source(%10 : memref<512x1024xbf16, #tpu.memory_space<any>>) target(%11 : memref<512x1024xbf16, #tpu.memory_space<vmem>>) target_semaphore(%13 : memref<!tpu.dma_semaphore, #tpu.memory_space<semaphore_mem>>)
    %c4_i32 = arith.constant 4 : i32
    %c1536_i32 = arith.constant 1536 : i32
    %c0_i32_10 = arith.constant 0 : i32
    %14 = tpu.memref_slice %arg2[%c1536_i32, %c0_i32_10] : memref<2048x1024xbf16, #tpu.memory_space<any>> -> memref<512x1024xbf16, #tpu.memory_space<any>>
    %c1536_i32_11 = arith.constant 1536 : i32
    %c0_i32_12 = arith.constant 0 : i32
    %15 = tpu.memref_slice %arg9[%c1536_i32_11, %c0_i32_12] : memref<2048x1024xbf16, #tpu.memory_space<vmem>> -> memref<512x1024xbf16, #tpu.memory_space<vmem>>
    %16 = tpu.memref_slice %arg11[%c4_i32] : memref<6x!tpu.dma_semaphore, #tpu.memory_space<semaphore_mem>> -> memref<1x!tpu.dma_semaphore, #tpu.memory_space<semaphore_mem>>
    %17 = tpu.memref_squeeze %16 : memref<1x!tpu.dma_semaphore, #tpu.memory_space<semaphore_mem>> -> memref<!tpu.dma_semaphore, #tpu.memory_space<semaphore_mem>>
    tpu.enqueue_dma source(%14 : memref<512x1024xbf16, #tpu.memory_space<any>>) target(%15 : memref<512x1024xbf16, #tpu.memory_space<vmem>>) target_semaphore(%17 : memref<!tpu.dma_semaphore, #tpu.memory_space<semaphore_mem>>)
    %c5_i32 = arith.constant 5 : i32
    %18 = tpu.memref_slice %arg11[%c5_i32] : memref<6x!tpu.dma_semaphore, #tpu.memory_space<semaphore_mem>> -> memref<1x!tpu.dma_semaphore, #tpu.memory_space<semaphore_mem>>
    %19 = tpu.memref_squeeze %18 : memref<1x!tpu.dma_semaphore, #tpu.memory_space<semaphore_mem>> -> memref<!tpu.dma_semaphore, #tpu.memory_space<semaphore_mem>>
    tpu.enqueue_dma source(%arg3 : memref<1x1024xf32, #tpu.memory_space<any>>) target(%arg10 : memref<1x1024xf32, #tpu.memory_space<vmem>>) target_semaphore(%19 : memref<!tpu.dma_semaphore, #tpu.memory_space<semaphore_mem>>)
    %c0 = arith.constant 0 : index
    %c0_13 = arith.constant 0 : index
    %20 = vector.load %arg0[%c0, %c0_13] : memref<8x64xf32, #tpu.memory_space<vmem>>, vector<8x64xf32>
    %21 = arith.truncf %20 : vector<8x64xf32> to vector<8x64xbf16>
    %c0_i32_14 = arith.constant 0 : i32
    %22 = tpu.memref_slice %arg11[%c0_i32_14] : memref<6x!tpu.dma_semaphore, #tpu.memory_space<semaphore_mem>> -> memref<1x!tpu.dma_semaphore, #tpu.memory_space<semaphore_mem>>
    %23 = tpu.memref_squeeze %22 : memref<1x!tpu.dma_semaphore, #tpu.memory_space<semaphore_mem>> -> memref<!tpu.dma_semaphore, #tpu.memory_space<semaphore_mem>>
    tpu.wait_dma2 semaphore(%23 : memref<!tpu.dma_semaphore, #tpu.memory_space<semaphore_mem>>) src(%arg1 : memref<64x2048xbf16, #tpu.memory_space<any>>) dst(%arg8 : memref<64x2048xbf16, #tpu.memory_space<vmem>>)
    %c0_15 = arith.constant 0 : index
    %c0_16 = arith.constant 0 : index
    %24 = vector.load %arg8[%c0_15, %c0_16] : memref<64x2048xbf16, #tpu.memory_space<vmem>>, vector<64x2048xbf16>
    %cst = arith.constant dense<0.000000e+00> : vector<8x2048xf32>
    %25 = tpu.matmul %21, %24, %cst {dimension_numbers = #tpu.dot_dimension_numbers<[1], [0], [0], [1], [0, 0, 1, 1], [], []>} : vector<8x64xbf16>, vector<64x2048xbf16>, vector<8x2048xf32> -> vector<8x2048xf32>
    %c0_17 = arith.constant 0 : index
    %c0_18 = arith.constant 0 : index
    %26 = vector.load %arg4[%c0_17, %c0_18] : memref<1x2048xf32, #tpu.memory_space<vmem>>, vector<1x2048xf32>
    %27 = vector.broadcast %26 : vector<1x2048xf32> to vector<8x2048xf32>
    %28 = arith.addf %25, %27 : vector<8x2048xf32>
    %cst_19 = arith.constant 0.000000e+00 : f32
    %29 = vector.broadcast %cst_19 : f32 to vector<8x2048xf32>
    %30 = arith.maximumf %28, %29 : vector<8x2048xf32>
    %31 = arith.truncf %30 : vector<8x2048xf32> to vector<8x2048xbf16>
    %c1_i32_20 = arith.constant 1 : i32
    %c0_i32_21 = arith.constant 0 : i32
    %c0_i32_22 = arith.constant 0 : i32
    %32 = tpu.memref_slice %arg2[%c0_i32_21, %c0_i32_22] : memref<2048x1024xbf16, #tpu.memory_space<any>> -> memref<512x1024xbf16, #tpu.memory_space<any>>
    %c0_i32_23 = arith.constant 0 : i32
    %c0_i32_24 = arith.constant 0 : i32
    %33 = tpu.memref_slice %arg9[%c0_i32_23, %c0_i32_24] : memref<2048x1024xbf16, #tpu.memory_space<vmem>> -> memref<512x1024xbf16, #tpu.memory_space<vmem>>
    %34 = tpu.memref_slice %arg11[%c1_i32_20] : memref<6x!tpu.dma_semaphore, #tpu.memory_space<semaphore_mem>> -> memref<1x!tpu.dma_semaphore, #tpu.memory_space<semaphore_mem>>
    %35 = tpu.memref_squeeze %34 : memref<1x!tpu.dma_semaphore, #tpu.memory_space<semaphore_mem>> -> memref<!tpu.dma_semaphore, #tpu.memory_space<semaphore_mem>>
    tpu.wait_dma2 semaphore(%35 : memref<!tpu.dma_semaphore, #tpu.memory_space<semaphore_mem>>) src(%32 : memref<512x1024xbf16, #tpu.memory_space<any>>) dst(%33 : memref<512x1024xbf16, #tpu.memory_space<vmem>>)
    %36 = vector.extract_strided_slice %31 {offsets = [0, 0], sizes = [8, 512], strides = [1, 1]} : vector<8x2048xbf16> to vector<8x512xbf16>
    %c0_25 = arith.constant 0 : index
    %c0_26 = arith.constant 0 : index
    %37 = vector.load %arg9[%c0_25, %c0_26] : memref<2048x1024xbf16, #tpu.memory_space<vmem>>, vector<512x1024xbf16>
    %cst_27 = arith.constant dense<0.000000e+00> : vector<8x1024xf32>
    %38 = tpu.matmul %36, %37, %cst_27 {dimension_numbers = #tpu.dot_dimension_numbers<[1], [0], [0], [1], [0, 0, 1, 1], [], []>} : vector<8x512xbf16>, vector<512x1024xbf16>, vector<8x1024xf32> -> vector<8x1024xf32>
    %c2_i32_28 = arith.constant 2 : i32
    %c512_i32_29 = arith.constant 512 : i32
    %c0_i32_30 = arith.constant 0 : i32
    %39 = tpu.memref_slice %arg2[%c512_i32_29, %c0_i32_30] : memref<2048x1024xbf16, #tpu.memory_space<any>> -> memref<512x1024xbf16, #tpu.memory_space<any>>
    %c512_i32_31 = arith.constant 512 : i32
    %c0_i32_32 = arith.constant 0 : i32
    %40 = tpu.memref_slice %arg9[%c512_i32_31, %c0_i32_32] : memref<2048x1024xbf16, #tpu.memory_space<vmem>> -> memref<512x1024xbf16, #tpu.memory_space<vmem>>
    %41 = tpu.memref_slice %arg11[%c2_i32_28] : memref<6x!tpu.dma_semaphore, #tpu.memory_space<semaphore_mem>> -> memref<1x!tpu.dma_semaphore, #tpu.memory_space<semaphore_mem>>
    %42 = tpu.memref_squeeze %41 : memref<1x!tpu.dma_semaphore, #tpu.memory_space<semaphore_mem>> -> memref<!tpu.dma_semaphore, #tpu.memory_space<semaphore_mem>>
    tpu.wait_dma2 semaphore(%42 : memref<!tpu.dma_semaphore, #tpu.memory_space<semaphore_mem>>) src(%39 : memref<512x1024xbf16, #tpu.memory_space<any>>) dst(%40 : memref<512x1024xbf16, #tpu.memory_space<vmem>>)
    %43 = vector.extract_strided_slice %31 {offsets = [0, 512], sizes = [8, 512], strides = [1, 1]} : vector<8x2048xbf16> to vector<8x512xbf16>
    %c512 = arith.constant 512 : index
    %c0_33 = arith.constant 0 : index
    %44 = vector.load %arg9[%c512, %c0_33] : memref<2048x1024xbf16, #tpu.memory_space<vmem>>, vector<512x1024xbf16>
    %cst_34 = arith.constant dense<0.000000e+00> : vector<8x1024xf32>
    %45 = tpu.matmul %43, %44, %cst_34 {dimension_numbers = #tpu.dot_dimension_numbers<[1], [0], [0], [1], [0, 0, 1, 1], [], []>} : vector<8x512xbf16>, vector<512x1024xbf16>, vector<8x1024xf32> -> vector<8x1024xf32>
    %46 = arith.addf %38, %45 : vector<8x1024xf32>
    %c3_i32_35 = arith.constant 3 : i32
    %c1024_i32_36 = arith.constant 1024 : i32
    %c0_i32_37 = arith.constant 0 : i32
    %47 = tpu.memref_slice %arg2[%c1024_i32_36, %c0_i32_37] : memref<2048x1024xbf16, #tpu.memory_space<any>> -> memref<512x1024xbf16, #tpu.memory_space<any>>
    %c1024_i32_38 = arith.constant 1024 : i32
    %c0_i32_39 = arith.constant 0 : i32
    %48 = tpu.memref_slice %arg9[%c1024_i32_38, %c0_i32_39] : memref<2048x1024xbf16, #tpu.memory_space<vmem>> -> memref<512x1024xbf16, #tpu.memory_space<vmem>>
    %49 = tpu.memref_slice %arg11[%c3_i32_35] : memref<6x!tpu.dma_semaphore, #tpu.memory_space<semaphore_mem>> -> memref<1x!tpu.dma_semaphore, #tpu.memory_space<semaphore_mem>>
    %50 = tpu.memref_squeeze %49 : memref<1x!tpu.dma_semaphore, #tpu.memory_space<semaphore_mem>> -> memref<!tpu.dma_semaphore, #tpu.memory_space<semaphore_mem>>
    tpu.wait_dma2 semaphore(%50 : memref<!tpu.dma_semaphore, #tpu.memory_space<semaphore_mem>>) src(%47 : memref<512x1024xbf16, #tpu.memory_space<any>>) dst(%48 : memref<512x1024xbf16, #tpu.memory_space<vmem>>)
    %51 = vector.extract_strided_slice %31 {offsets = [0, 1024], sizes = [8, 512], strides = [1, 1]} : vector<8x2048xbf16> to vector<8x512xbf16>
    %c1024 = arith.constant 1024 : index
    %c0_40 = arith.constant 0 : index
    %52 = vector.load %arg9[%c1024, %c0_40] : memref<2048x1024xbf16, #tpu.memory_space<vmem>>, vector<512x1024xbf16>
    %cst_41 = arith.constant dense<0.000000e+00> : vector<8x1024xf32>
    %53 = tpu.matmul %51, %52, %cst_41 {dimension_numbers = #tpu.dot_dimension_numbers<[1], [0], [0], [1], [0, 0, 1, 1], [], []>} : vector<8x512xbf16>, vector<512x1024xbf16>, vector<8x1024xf32> -> vector<8x1024xf32>
    %54 = arith.addf %46, %53 : vector<8x1024xf32>
    %c4_i32_42 = arith.constant 4 : i32
    %c1536_i32_43 = arith.constant 1536 : i32
    %c0_i32_44 = arith.constant 0 : i32
    %55 = tpu.memref_slice %arg2[%c1536_i32_43, %c0_i32_44] : memref<2048x1024xbf16, #tpu.memory_space<any>> -> memref<512x1024xbf16, #tpu.memory_space<any>>
    %c1536_i32_45 = arith.constant 1536 : i32
    %c0_i32_46 = arith.constant 0 : i32
    %56 = tpu.memref_slice %arg9[%c1536_i32_45, %c0_i32_46] : memref<2048x1024xbf16, #tpu.memory_space<vmem>> -> memref<512x1024xbf16, #tpu.memory_space<vmem>>
    %57 = tpu.memref_slice %arg11[%c4_i32_42] : memref<6x!tpu.dma_semaphore, #tpu.memory_space<semaphore_mem>> -> memref<1x!tpu.dma_semaphore, #tpu.memory_space<semaphore_mem>>
    %58 = tpu.memref_squeeze %57 : memref<1x!tpu.dma_semaphore, #tpu.memory_space<semaphore_mem>> -> memref<!tpu.dma_semaphore, #tpu.memory_space<semaphore_mem>>
    tpu.wait_dma2 semaphore(%58 : memref<!tpu.dma_semaphore, #tpu.memory_space<semaphore_mem>>) src(%55 : memref<512x1024xbf16, #tpu.memory_space<any>>) dst(%56 : memref<512x1024xbf16, #tpu.memory_space<vmem>>)
    %59 = vector.extract_strided_slice %31 {offsets = [0, 1536], sizes = [8, 512], strides = [1, 1]} : vector<8x2048xbf16> to vector<8x512xbf16>
    %c1536 = arith.constant 1536 : index
    %c0_47 = arith.constant 0 : index
    %60 = vector.load %arg9[%c1536, %c0_47] : memref<2048x1024xbf16, #tpu.memory_space<vmem>>, vector<512x1024xbf16>
    %cst_48 = arith.constant dense<0.000000e+00> : vector<8x1024xf32>
    %61 = tpu.matmul %59, %60, %cst_48 {dimension_numbers = #tpu.dot_dimension_numbers<[1], [0], [0], [1], [0, 0, 1, 1], [], []>} : vector<8x512xbf16>, vector<512x1024xbf16>, vector<8x1024xf32> -> vector<8x1024xf32>
    %62 = arith.addf %54, %61 : vector<8x1024xf32>
    %c0_49 = arith.constant 0 : index
    %c0_50 = arith.constant 0 : index
    %63 = vector.load %arg5[%c0_49, %c0_50] : memref<1x1024xf32, #tpu.memory_space<vmem>>, vector<1x1024xf32>
    %64 = vector.broadcast %63 : vector<1x1024xf32> to vector<8x1024xf32>
    %65 = arith.addf %62, %64 : vector<8x1024xf32>
    %cst_51 = arith.constant 0.000000e+00 : f32
    %66 = vector.broadcast %cst_51 : f32 to vector<8x1024xf32>
    %67 = arith.maximumf %65, %66 : vector<8x1024xf32>
    %c5_i32_52 = arith.constant 5 : i32
    %68 = tpu.memref_slice %arg11[%c5_i32_52] : memref<6x!tpu.dma_semaphore, #tpu.memory_space<semaphore_mem>> -> memref<1x!tpu.dma_semaphore, #tpu.memory_space<semaphore_mem>>
    %69 = tpu.memref_squeeze %68 : memref<1x!tpu.dma_semaphore, #tpu.memory_space<semaphore_mem>> -> memref<!tpu.dma_semaphore, #tpu.memory_space<semaphore_mem>>
    tpu.wait_dma2 semaphore(%69 : memref<!tpu.dma_semaphore, #tpu.memory_space<semaphore_mem>>) src(%arg3 : memref<1x1024xf32, #tpu.memory_space<any>>) dst(%arg10 : memref<1x1024xf32, #tpu.memory_space<vmem>>)
    %c0_53 = arith.constant 0 : index
    %c0_54 = arith.constant 0 : index
    %70 = vector.load %arg10[%c0_53, %c0_54] : memref<1x1024xf32, #tpu.memory_space<vmem>>, vector<1x1024xf32>
    %71 = vector.broadcast %70 : vector<1x1024xf32> to vector<8x1024xf32>
    %72 = arith.mulf %67, %71 : vector<8x1024xf32>
    %cst_55 = arith.constant dense<0.000000e+00> : vector<8xf32>
    %73 = vector.multi_reduction <add>, %72, %cst_55 [1] : vector<8x1024xf32> to vector<8xf32>
    %74 = vector.shape_cast %73 : vector<8xf32> to vector<8x1xf32>
    %c0_56 = arith.constant 0 : index
    %c0_57 = arith.constant 0 : index
    %75 = vector.load %arg6[%c0_56, %c0_57] : memref<1x1xf32, #tpu.memory_space<vmem>>, vector<1x1xf32>
    %76 = vector.broadcast %75 : vector<1x1xf32> to vector<8x1xf32>
    %77 = arith.addf %74, %76 : vector<8x1xf32>
    %78 = arith.negf %77 : vector<8x1xf32>
    %79 = math.exp %78 : vector<8x1xf32>
    %cst_58 = arith.constant 1.000000e+00 : f32
    %80 = vector.broadcast %cst_58 : f32 to vector<8x1xf32>
    %81 = arith.addf %80, %79 : vector<8x1xf32>
    %82 = arith.divf %80, %81 : vector<8x1xf32>
    %c0_59 = arith.constant 0 : index
    %c0_60 = arith.constant 0 : index
    %83 = vector.load %arg7[%c0_59, %c0_60] : memref<8x1xf32, #tpu.memory_space<vmem>>, vector<8x1xf32>
    tpu.vector_store %arg7[%c0_59, %c0_60], %82 {strides = array<i32>} : memref<8x1xf32, #tpu.memory_space<vmem>>, vector<8x1xf32>,
    return
  }
}

</mosaic_0001>

<bundles_post_ra>
// kernel: binary_classification_forward.1
= control target key start
LH: loop header
LB: loop body
LE: loop exit
PB: predicated region body
PF: predicated region fallthrough
CT: control target
= control target key end

     0   :  { %s4694_s0 = inlined_call_operand.hbm [shape: f32[8,64], index: 0, kind: input, shape index: {}]   ;;  %s4695_s1 = inlined_call_operand.hbm [shape: bf16[64,2048], index: 1, kind: input, shape index: {}]   ;;  %s4696_s2 = inlined_call_operand.hbm [shape: bf16[2048,1024], index: 2, kind: input, shape index: {}]   ;;  %s4697_s3 = inlined_call_operand.hbm [shape: f32[1,1024], index: 3, kind: input, shape index: {}]   ;;  %s4698_s4 = inlined_call_operand.hbm [shape: f32[1,2048], index: 4, kind: input, shape index: {}]   ;;  %s4699_s5 = inlined_call_operand.hbm [shape: f32[1,1024], index: 5, kind: input, shape index: {}]   ;;  %s4700_s6 = inlined_call_operand.<no memory space> [shape: f32[1,1], index: 6, kind: input, shape index: {}]   ;;  %s4701_s7 = inlined_call_operand.vmem [shape: f32[8,1], index: 7, kind: output, shape index: {}]  }
   0x1   :  { %v12_v0 = vstv %s4700_s6 }
   0x2   :  { %13 = vst [vmem:[#allocation6] sm:$0x1] %v12_v0 }
   0x3   :  { %14 = vsyncpa [#allocation8], 0 }
   0x4   :  { %15 = vsyncpa [#allocation10], 0  ;;  %s3477_s26 = smov [#allocation9]   ;;  %s3478_s28 = smov [#allocation7]  }
   0x5   :  { %s32_s27 = sshll.u32 %s3477_s26, 4  ;;  %s22_s29 = sshll.u32 %s3478_s28, 4  ;;  %s33_s27 = int_to_ptr.vmem [resolvable:$true] %s32_s27  ;;  %s23_s29 = int_to_ptr.vmem [resolvable:$true] %s22_s29 }
   0x6   :  { %s3373_s9 = scalar_lea.hbm %s4698_s4, 256 }
   0x7   :  { %p3374_p0 = scmp.ne.s32.totalorder %s4698_s4, %s3373_s9  ;;  %p3377_p1 = scmp.lt.u32.totalorder %s3373_s9, %s4698_s4 }
   0x9   :  { %p3379_p2 = pnand %p3377_p1, %p3374_p0 }
   0xb   :  { %3382 = shalt.err (!%p3379_p2)
}
   0xc   :  { %s3383_s6 = scalar_lea.vmem %s33_s27, 256  ;;  %p3388_p4 = scmp.lt.s32.totalorder %s33_s27, %s33_s27 }
   0xd   :  { %p3384_p3 = scmp.ne.s32.totalorder %s33_s27, %s3383_s6  ;;  %p3389_p5 = scmp.lt.s32.totalorder %s3383_s6, %s3383_s6 }
   0xf   :  { %p3390_p6 = por %p3389_p5, %p3388_p4 }
  0x11   :  { %p3391_p7 = pnand %p3390_p6, %p3384_p3 }
  0x13   :  { %3394 = shalt.err (!%p3391_p7)
}
  0x14   :  { %35 = dma.hbm_to_vmem [thread:$0]  %s4698_s4, 256, %s33_s27, [#allocation10]  }
  0x15   :  { %s3395_s18 = scalar_lea.hbm %s4694_s0, 128 }
  0x16   :  { %p3396_p8 = scmp.ne.s32.totalorder %s4694_s0, %s3395_s18  ;;  %p3399_p9 = scmp.lt.u32.totalorder %s3395_s18, %s4694_s0 }
  0x18   :  { %p3401_p10 = pnand %p3399_p9, %p3396_p8 }
  0x1a   :  { %3404 = shalt.err (!%p3401_p10)
}
  0x1b   :  { %s3405_s23 = scalar_lea.vmem %s23_s29, 128  ;;  %p3410_p12 = scmp.lt.s32.totalorder %s23_s29, %s23_s29 }
  0x1c   :  { %p3406_p11 = scmp.ne.s32.totalorder %s23_s29, %s3405_s23  ;;  %p3411_p13 = scmp.lt.s32.totalorder %s3405_s23, %s3405_s23 }
  0x1e   :  { %p3412_p0 = por %p3411_p13, %p3410_p12 }
  0x20   :  { %p3413_p1 = pnand %p3412_p0, %p3406_p11 }
  0x22   :  { %3416 = shalt.err (!%p3413_p1)
}
  0x23   :  { %25 = dma.hbm_to_vmem [thread:$0]  %s4694_s0, 128, %s23_s29, [#allocation8]  }
  0x24   :  { %s3479_s25 = smov [#allocation11]   ;;  %s3417_s30 = scalar_lea.hbm %s4699_s5, 128 }
  0x25   :  { %s42_s26 = sshll.u32 %s3479_s25, 4  ;;  %p3418_p2 = scmp.ne.s32.totalorder %s4699_s5, %s3417_s30  ;;  %s43_s26 = int_to_ptr.vmem [resolvable:$true] %s42_s26 }
  0x26   :  { %p3421_p3 = scmp.lt.u32.totalorder %s3417_s30, %s4699_s5 }
  0x28   :  { %p3423_p4 = pnand %p3421_p3, %p3418_p2 }
  0x2a   :  { %3426 = shalt.err (!%p3423_p4)
}
  0x2b   :  { %s3427_s12 = scalar_lea.vmem %s43_s26, 128  ;;  %p3432_p6 = scmp.lt.s32.totalorder %s43_s26, %s43_s26 }
  0x2c   :  { %p3428_p5 = scmp.ne.s32.totalorder %s43_s26, %s3427_s12  ;;  %p3433_p7 = scmp.lt.s32.totalorder %s3427_s12, %s3427_s12 }
  0x2e   :  { %p3434_p8 = por %p3433_p7, %p3432_p6 }
  0x30   :  { %p3435_p9 = pnand %p3434_p8, %p3428_p5 }
  0x32   :  { %3438 = shalt.err (!%p3435_p9)
}
  0x33   :  { %45 = dma.hbm_to_vmem [thread:$0]  %s4699_s5, 128, %s43_s26, [#allocation10]  }
  0x34   :  { %3461 = dma.done.wait [#allocation8], 128  }
  0x35   :  { %3462 = vsyncadd [#allocation8], 4294967168 }
  0x36   :  { %3463 = dma.done.wait [#allocation10], 384  }
  0x37   :  { %3464 = vsyncadd [#allocation10], 4294966912  ;;  %s62_s13 = sld [smem:[#allocation0]]   ;;  %s3480_s6 = smov 2048  }
  0x38   :  { %74 = sst [smem:[#allocation13]] %s3480_s6  ;;  %s3481_s14 = smov 16  }
  0x39   :  { %76 = sst [smem:[#allocation13 + $0x1]] %s3480_s6  ;;  %s3482_s15 = smov 64  }
  0x3a   :  { %78 = sst [smem:[#allocation13 + $0x2]] %s3481_s14  ;;  %s3483_s16 = smov 128  }
  0x3b   :  { %80 = sst [smem:[#allocation13 + $0x3]] %s3482_s15  ;;  %s3484_s17 = smov 2  }
  0x3c   :  { %82 = sst [smem:[#allocation13 + $0x4]] %s3483_s16  ;;  %s3485_s18 = smov 1024  }
  0x3d   :  { %84 = sst [smem:[#allocation13 + $0x5]] %s3484_s17  ;;  %s3314_s5 = sshll.u32 %s62_s13, 26 }
  0x3e   :  { %86 = sst [smem:[#allocation13 + $0x6]] %s3485_s18  ;;  %s3589_s19 = sadd.s32 134217728, %s3314_s5 }
  0x3f   :  { %88 = sst [smem:[#allocation13 + $0x7]] %s3482_s15  ;;  %s3486_s20 = smov 4  }
  0x40   :  { %90 = sst [smem:[#allocation13 + $0x8]] %s3486_s20  ;;  %s3487_s21 = smov [#allocation2]  }
  0x41   :  { %s70_s22 = sshll.u32 %s3487_s21, 4  ;;  %s3488_s23 = smov [#allocation5]   ;;  %s71_s22 = int_to_ptr.vmem [resolvable:$true] %s70_s22 }
  0x42   :  { %s3489_s4 = smov [#allocation12]   ;;  %s3490_s26 = smov 8  }
  0x43   :  { %92 = dma.general %s4695_s1, 8192, %s71_s22, %s3488_s23, %s3489_s4, [#allocation13], %s3589_s19, 0  }
  0x44   :  { %109 = sst [smem:[#allocation15]] %s3485_s18  ;;  %s3491_s27 = smov [#allocation3]  }
  0x45   :  { %111 = sst [smem:[#allocation15 + $0x1]] %s3485_s18  ;;  %s105_s28 = sshll.u32 %s3491_s27, 4  ;;  %s106_s28 = int_to_ptr.vmem [resolvable:$true] %s105_s28 }
  0x46   :  { %113 = sst [smem:[#allocation15 + $0x2]] %s3490_s26  ;;  %s3492_s30 = smov 512  }
  0x47   :  { %115 = sst [smem:[#allocation15 + $0x3]] %s3482_s15  ;;  %s3493_s1 = smov [#allocation5 + $0x1]  }
  0x48   :  { %117 = sst [smem:[#allocation15 + $0x4]] %s3483_s16  ;;  %s3494_s8 = smov [#allocation14]  }
  0x49   :  { %119 = sst [smem:[#allocation15 + $0x5]] %s3484_s17  ;;  %s3495_s11 = smov [#allocation3 + $0x800]  }
  0x4a   :  { %121 = sst [smem:[#allocation15 + $0x6]] %s3492_s30  ;;  %s142_s12 = sshll.u32 %s3495_s11, 4  ;;  %s143_s12 = int_to_ptr.vmem [resolvable:$true] %s142_s12 }
  0x4b   :  { %123 = sst [smem:[#allocation15 + $0x7]] %s3482_s15  ;;  %s128_s13 = scalar_lea.hbm %s4696_s2, 32768 }
  0x4c   :  { %125 = sst [smem:[#allocation15 + $0x8]] %s3486_s20  ;;  %s3496_s6 = smov [#allocation5 + $0x2]  }
  0x4d   :  { %127 = dma.general %s4696_s2, 32768, %s106_s28, %s3493_s1, %s3494_s8, [#allocation15], %s3589_s19, 0  }
  0x4e   :  { %146 = sst [smem:[#allocation17]] %s3485_s18  ;;  %s3497_s14 = smov [#allocation16]  }
  0x4f   :  { %148 = sst [smem:[#allocation17 + $0x1]] %s3485_s18  ;;  %s3498_s5 = smov [#allocation3 + $0x1000]  }
  0x50   :  { %150 = sst [smem:[#allocation17 + $0x2]] %s3490_s26  ;;  %s179_s21 = sshll.u32 %s3498_s5, 4  ;;  %s180_s21 = int_to_ptr.vmem [resolvable:$true] %s179_s21 }
  0x51   :  { %152 = sst [smem:[#allocation17 + $0x3]] %s3482_s15  ;;  %s165_s4 = scalar_lea.hbm %s4696_s2, 65536 }
  0x52   :  { %154 = sst [smem:[#allocation17 + $0x4]] %s3483_s16  ;;  %s3499_s24 = smov [#allocation5 + $0x3]  }
  0x53   :  { %156 = sst [smem:[#allocation17 + $0x5]] %s3484_s17  ;;  %s3500_s25 = smov [#allocation18]  }
  0x54   :  { %158 = sst [smem:[#allocation17 + $0x6]] %s3492_s30  ;;  %s3501_s27 = smov [#allocation3 + $0x1800]  }
  0x55   :  { %160 = sst [smem:[#allocation17 + $0x7]] %s3482_s15  ;;  %s216_s28 = sshll.u32 %s3501_s27, 4  ;;  %s217_s28 = int_to_ptr.vmem [resolvable:$true] %s216_s28 }
  0x56   :  { %162 = sst [smem:[#allocation17 + $0x8]] %s3486_s20  ;;  %s202_s9 = scalar_lea.hbm %s4696_s2, 98304 }
  0x57   :  { %164 = dma.general %s128_s13, 32768, %s143_s12, %s3496_s6, %s3497_s14, [#allocation17], %s3589_s19, 0  }
  0x58   :  { %183 = sst [smem:[#allocation19]] %s3485_s18  ;;  %s3502_s10 = smov [#allocation4]  }
  0x59   :  { %185 = sst [smem:[#allocation19 + $0x1]] %s3485_s18  ;;  %s247_s11 = sshll.u32 %s3502_s10, 4  ;;  %s248_s11 = int_to_ptr.vmem [resolvable:$true] %s247_s11 }
  0x5a   :  { %187 = sst [smem:[#allocation19 + $0x2]] %s3490_s26  ;;  %s3439_s0 = scalar_lea.hbm %s4697_s3, 128 }
  0x5b   :  { %189 = sst [smem:[#allocation19 + $0x3]] %s3482_s15  ;;  %p3440_p10 = scmp.ne.s32.totalorder %s4697_s3, %s3439_s0 }
  0x5c   :  { %191 = sst [smem:[#allocation19 + $0x4]] %s3483_s16  ;;  %p3443_p11 = scmp.lt.u32.totalorder %s3439_s0, %s4697_s3 }
  0x5d   :  { %193 = sst [smem:[#allocation19 + $0x5]] %s3484_s17 }
  0x5e   :  { %195 = sst [smem:[#allocation19 + $0x6]] %s3492_s30  ;;  %p3445_p12 = pnand %p3443_p11, %p3440_p10 }
  0x5f   :  { %197 = sst [smem:[#allocation19 + $0x7]] %s3482_s15 }
  0x60   :  { %199 = sst [smem:[#allocation19 + $0x8]] %s3486_s20 }
  0x61   :  { %201 = dma.general %s165_s4, 32768, %s180_s21, %s3499_s24, %s3500_s25, [#allocation19], %s3589_s19, 0  }
  0x62   :  { %220 = sst [smem:[#allocation21]] %s3485_s18 }
  0x63   :  { %222 = sst [smem:[#allocation21 + $0x1]] %s3485_s18  ;;  %s3503_s18 = smov [#allocation5 + $0x4]  }
  0x64   :  { %224 = sst [smem:[#allocation21 + $0x2]] %s3490_s26  ;;  %s3504_s26 = smov [#allocation20]  }
  0x65   :  { %226 = sst [smem:[#allocation21 + $0x3]] %s3482_s15 }
  0x66   :  { %228 = sst [smem:[#allocation21 + $0x4]] %s3483_s16 }
  0x67   :  { %230 = sst [smem:[#allocation21 + $0x5]] %s3484_s17 }
  0x68   :  { %232 = sst [smem:[#allocation21 + $0x6]] %s3492_s30 }
  0x69   :  { %234 = sst [smem:[#allocation21 + $0x7]] %s3482_s15 }
  0x6a   :  { %236 = sst [smem:[#allocation21 + $0x8]] %s3486_s20 }
  0x6b   :  { %238 = dma.general %s202_s9, 32768, %s217_s28, %s3503_s18, %s3504_s26, [#allocation21], %s3589_s19, 0  }
  0x6c   :  { %3448 = shalt.err (!%p3445_p12)  }
  0x6d   :  { %s3449_s15 = scalar_lea.vmem %s248_s11, 128  ;;  %p3454_p0 = scmp.lt.s32.totalorder %s248_s11, %s248_s11 }
  0x6e   :  { %p3450_p13 = scmp.ne.s32.totalorder %s248_s11, %s3449_s15  ;;  %p3455_p1 = scmp.lt.s32.totalorder %s3449_s15, %s3449_s15 }
  0x70   :  { %p3456_p2 = por %p3455_p1, %p3454_p0 }
  0x72   :  { %p3457_p3 = pnand %p3456_p2, %p3450_p13 }
  0x74   :  { %3460 = shalt.err (!%p3457_p3)  }
  0x75   :  { %250 = dma.hbm_to_vmem [thread:$0]  %s4697_s3, 128, %s248_s11, [#allocation5 + $0x5]  ;;  %v251_v1 = vld [vmem:[#allocation7] sm:$0xff] }
  0x76   :  { %v3661_v2 = vpack.c.bf16 %v251_v1, %v251_v1 }
  0x77   :  { %3465 = dma.done.wait [#allocation5], 8192 }
  0x78   :  { %3466 = vsyncadd [#allocation5], 4294959104  ;;  %v3505_v3 = vmov 0   ;;  %v258_v4 = vld [vmem:[#allocation2 + $0x8] sm:$0xff]  ;;  %v260_v5 = vld [vmem:[#allocation2 + $0x18] sm:$0xff]  ;;  %vm405_vm0 = vcmask 523264  }
  0x79   :  { %441 = vmatprep.mubr.bf16.mxu0 %v3505_v3  ;;  %482 = vmatprep.mubr.bf16.mxu1 %v3505_v3  ;;  %v257_v6 = vld [vmem:[#allocation2] sm:$0xff]  ;;  %v259_v7 = vld [vmem:[#allocation2 + $0x10] sm:$0xff]  ;;  %v274_v8 = vld [vmem:[#allocation2 + $0x88] sm:$0xff] }
  0x7a   :  { %409 = vmatprep.subr.bf16.mxu0 %v258_v4  ;;  %450 = vmatprep.subr.bf16.mxu1 %v260_v5  ;;  %v276_v9 = vld [vmem:[#allocation2 + $0x98] sm:$0xff]  ;;  %v273_v10 = vld [vmem:[#allocation2 + $0x80] sm:$0xff]  ;;  %v275_v11 = vld [vmem:[#allocation2 + $0x90] sm:$0xff] }
  0x7b   :  { %410 = vmatpush1.bf16.msra.mxu0 %v257_v6  ;;  %451 = vmatpush1.bf16.msra.mxu1 %v259_v7  ;;  %v290_v12 = vld [vmem:[#allocation2 + $0x108] sm:$0xff]  ;;  %v292_v13 = vld [vmem:[#allocation2 + $0x118] sm:$0xff]  ;;  %v289_v14 = vld [vmem:[#allocation2 + $0x100] sm:$0xff] }
  0x7c   :  { %411 = vmatprep.subr.bf16.mxu0 %v274_v8  ;;  %452 = vmatprep.subr.bf16.mxu1 %v276_v9  ;;  %v291_v15 = vld [vmem:[#allocation2 + $0x110] sm:$0xff]  ;;  %v306_v16 = vld [vmem:[#allocation2 + $0x188] sm:$0xff]  ;;  %v308_v17 = vld [vmem:[#allocation2 + $0x198] sm:$0xff] }
  0x7d   :  { %v305_v18 = vld [vmem:[#allocation2 + $0x180] sm:$0xff]  ;;  %v307_v19 = vld [vmem:[#allocation2 + $0x190] sm:$0xff]  ;;  %v262_v20 = vld [vmem:[#allocation2 + $0x28] sm:$0xff] }
  0x7e   :  { %v264_v21 = vld [vmem:[#allocation2 + $0x38] sm:$0xff]  ;;  %v261_v22 = vld [vmem:[#allocation2 + $0x20] sm:$0xff]  ;;  %v263_v23 = vld [vmem:[#allocation2 + $0x30] sm:$0xff] }
  0x7f   :  { %412 = vmatpush1.bf16.msra.mxu0 %v273_v10  ;;  %453 = vmatpush1.bf16.msra.mxu1 %v275_v11  ;;  %v278_v24 = vld [vmem:[#allocation2 + $0xa8] sm:$0xff]  ;;  %v280_v25 = vld [vmem:[#allocation2 + $0xb8] sm:$0xff]  ;;  %v277_v26 = vld [vmem:[#allocation2 + $0xa0] sm:$0xff] }
  0x80   :  { %413 = vmatprep.subr.bf16.mxu0 %v290_v12  ;;  %454 = vmatprep.subr.bf16.mxu1 %v292_v13  ;;  %v279_v27 = vld [vmem:[#allocation2 + $0xb0] sm:$0xff]  ;;  %v294_v28 = vld [vmem:[#allocation2 + $0x128] sm:$0xff]  ;;  %v296_v29 = vld [vmem:[#allocation2 + $0x138] sm:$0xff] }
  0x81   :  { %v293_v30 = vld [vmem:[#allocation2 + $0x120] sm:$0xff]  ;;  %v295_v31 = vld [vmem:[#allocation2 + $0x130] sm:$0xff]  ;;  %v310_v32 = vld [vmem:[#allocation2 + $0x1a8] sm:$0xff] }
  0x82   :  { %v312_v33 = vld [vmem:[#allocation2 + $0x1b8] sm:$0xff]  ;;  %v309_v34 = vld [vmem:[#allocation2 + $0x1a0] sm:$0xff]  ;;  %v311_v35 = vld [vmem:[#allocation2 + $0x1b0] sm:$0xff] }
  0x83   :  { %414 = vmatpush1.bf16.msra.mxu0 %v289_v14  ;;  %455 = vmatpush1.bf16.msra.mxu1 %v291_v15  ;;  %v266_v36 = vld [vmem:[#allocation2 + $0x48] sm:$0xff]  ;;  %v268_v37 = vld [vmem:[#allocation2 + $0x58] sm:$0xff]  ;;  %v265_v38 = vld [vmem:[#allocation2 + $0x40] sm:$0xff] }
  0x84   :  { %415 = vmatprep.subr.bf16.mxu0 %v306_v16  ;;  %456 = vmatprep.subr.bf16.mxu1 %v308_v17  ;;  %v267_v39 = vld [vmem:[#allocation2 + $0x50] sm:$0xff]  ;;  %v282_v40 = vld [vmem:[#allocation2 + $0xc8] sm:$0xff]  ;;  %v284_v41 = vld [vmem:[#allocation2 + $0xd8] sm:$0xff] }
  0x85   :  { %v281_v42 = vld [vmem:[#allocation2 + $0xc0] sm:$0xff]  ;;  %v283_v43 = vld [vmem:[#allocation2 + $0xd0] sm:$0xff]  ;;  %v298_v44 = vld [vmem:[#allocation2 + $0x148] sm:$0xff] }
  0x86   :  { %v300_v45 = vld [vmem:[#allocation2 + $0x158] sm:$0xff]  ;;  %v297_v46 = vld [vmem:[#allocation2 + $0x140] sm:$0xff]  ;;  %v299_v47 = vld [vmem:[#allocation2 + $0x150] sm:$0xff] }
  0x87   :  { %416 = vmatpush1.bf16.msra.mxu0 %v305_v18  ;;  %457 = vmatpush1.bf16.msra.mxu1 %v307_v19  ;;  %v314_v48 = vld [vmem:[#allocation2 + $0x1c8] sm:$0xff]  ;;  %v316_v49 = vld [vmem:[#allocation2 + $0x1d8] sm:$0xff]  ;;  %v313_v50 = vld [vmem:[#allocation2 + $0x1c0] sm:$0xff] }
  0x88   :  { %491 = vmatprep.subr.bf16.mxu0 %v262_v20  ;;  %532 = vmatprep.subr.bf16.mxu1 %v264_v21  ;;  %v315_v51 = vld [vmem:[#allocation2 + $0x1d0] sm:$0xff]  ;;  %v270_v52 = vld [vmem:[#allocation2 + $0x68] sm:$0xff]  ;;  %v272_v53 = vld [vmem:[#allocation2 + $0x78] sm:$0xff] }
  0x89   :  { %v269_v54 = vld [vmem:[#allocation2 + $0x60] sm:$0xff]  ;;  %v271_v55 = vld [vmem:[#allocation2 + $0x70] sm:$0xff]  ;;  %v286_v56 = vld [vmem:[#allocation2 + $0xe8] sm:$0xff] }
  0x8a   :  { %3324 = vmatmul.mubr.msk.bf16.vlgmr.msra.gmra.mrb[0].mxu0 %vm405_vm0, %v3661_v2  ;;  %3325 = vmatmul.mubr.msk.bf16.vlgmr.msra.gmra.mrb[0].mxu1 %vm405_vm0, %v3661_v2  ;;  %v288_v57 = vld [vmem:[#allocation2 + $0xf8] sm:$0xff]  ;;  %v285_v58 = vld [vmem:[#allocation2 + $0xe0] sm:$0xff]  ;;  %v287_v59 = vld [vmem:[#allocation2 + $0xf0] sm:$0xff] }
  0x8b   :  { %492 = vmatpush1.bf16.msra.mxu0 %v261_v22  ;;  %533 = vmatpush1.bf16.msra.mxu1 %v263_v23  ;;  %v302_v60 = vld [vmem:[#allocation2 + $0x168] sm:$0xff]  ;;  %v304_v61 = vld [vmem:[#allocation2 + $0x178] sm:$0xff]  ;;  %v301_v62 = vld [vmem:[#allocation2 + $0x160] sm:$0xff] }
  0x8c   :  { %493 = vmatprep.subr.bf16.mxu0 %v278_v24  ;;  %534 = vmatprep.subr.bf16.mxu1 %v280_v25  ;;  %v303_v63 = vld [vmem:[#allocation2 + $0x170] sm:$0xff]  ;;  %v318_v0 = vld [vmem:[#allocation2 + $0x1e8] sm:$0xff]  ;;  %v320_v1 = vld [vmem:[#allocation2 + $0x1f8] sm:$0xff] }
  0x8d   :  { %523 = vmatprep.mubr.bf16.mxu0 %v3505_v3  ;;  %564 = vmatprep.mubr.bf16.mxu1 %v3505_v3  ;;  %v317_v4 = vld [vmem:[#allocation2 + $0x1e0] sm:$0xff]  ;;  %v319_v5 = vld [vmem:[#allocation2 + $0x1f0] sm:$0xff] }
  0x8e   :  { %v321_v9 = vld [vmem:[#allocation9] sm:$0xff] }
  0x8f   :  { %494 = vmatpush1.bf16.msra.mxu0 %v277_v26  ;;  %535 = vmatpush1.bf16.msra.mxu1 %v279_v27 }
  0x90   :  { %495 = vmatprep.subr.bf16.mxu0 %v294_v28  ;;  %536 = vmatprep.subr.bf16.mxu1 %v296_v29 }
  0x93   :  { %496 = vmatpush1.bf16.msra.mxu0 %v293_v30  ;;  %537 = vmatpush1.bf16.msra.mxu1 %v295_v31 }
  0x94   :  { %497 = vmatprep.subr.bf16.mxu0 %v310_v32  ;;  %538 = vmatprep.subr.bf16.mxu1 %v312_v33 }
  0x97   :  { %498 = vmatpush1.bf16.msra.mxu0 %v309_v34  ;;  %539 = vmatpush1.bf16.msra.mxu1 %v311_v35 }
  0x98   :  { %573 = vmatprep.subr.bf16.mxu0 %v266_v36  ;;  %614 = vmatprep.subr.bf16.mxu1 %v268_v37 }
  0x9a   :  { %3326 = vmatmul.mubr.msk.bf16.vlgmr.msra.gmra.mrb[4].mxu0 %vm405_vm0, %v3661_v2  ;;  %3327 = vmatmul.mubr.msk.bf16.vlgmr.msra.gmra.mrb[4].mxu1 %vm405_vm0, %v3661_v2 }
  0x9b   :  { %574 = vmatpush1.bf16.msra.mxu0 %v265_v38  ;;  %615 = vmatpush1.bf16.msra.mxu1 %v267_v39 }
  0x9c   :  { %575 = vmatprep.subr.bf16.mxu0 %v282_v40  ;;  %616 = vmatprep.subr.bf16.mxu1 %v284_v41 }
  0x9d   :  { %605 = vmatprep.mubr.bf16.mxu0 %v3505_v3  ;;  %646 = vmatprep.mubr.bf16.mxu1 %v3505_v3 }
  0x9f   :  { %576 = vmatpush1.bf16.msra.mxu0 %v281_v42  ;;  %617 = vmatpush1.bf16.msra.mxu1 %v283_v43 }
  0xa0   :  { %577 = vmatprep.subr.bf16.mxu0 %v298_v44  ;;  %618 = vmatprep.subr.bf16.mxu1 %v300_v45 }
  0xa3   :  { %578 = vmatpush1.bf16.msra.mxu0 %v297_v46  ;;  %619 = vmatpush1.bf16.msra.mxu1 %v299_v47 }
  0xa4   :  { %579 = vmatprep.subr.bf16.mxu0 %v314_v48  ;;  %620 = vmatprep.subr.bf16.mxu1 %v316_v49 }
  0xa7   :  { %580 = vmatpush1.bf16.msra.mxu0 %v313_v50  ;;  %621 = vmatpush1.bf16.msra.mxu1 %v315_v51 }
  0xa8   :  { %655 = vmatprep.subr.bf16.mxu0 %v270_v52  ;;  %696 = vmatprep.subr.bf16.mxu1 %v272_v53 }
  0xaa   :  { %3328 = vmatmul.mubr.msk.bf16.vlgmr.msra.gmra.mrb[8].mxu0 %vm405_vm0, %v3661_v2  ;;  %3329 = vmatmul.mubr.msk.bf16.vlgmr.msra.gmra.mrb[8].mxu1 %vm405_vm0, %v3661_v2 }
  0xab   :  { %656 = vmatpush1.bf16.msra.mxu0 %v269_v54  ;;  %697 = vmatpush1.bf16.msra.mxu1 %v271_v55 }
  0xac   :  { %657 = vmatprep.subr.bf16.mxu0 %v286_v56  ;;  %698 = vmatprep.subr.bf16.mxu1 %v288_v57 }
  0xad   :  { %687 = vmatprep.mubr.bf16.mxu0 %v3505_v3  ;;  %728 = vmatprep.mubr.bf16.mxu1 %v3505_v3  ;;  %v325_v3 = vlaneseq }
  0xaf   :  { %658 = vmatpush1.bf16.msra.mxu0 %v285_v58  ;;  %699 = vmatpush1.bf16.msra.mxu1 %v287_v59  ;;  %v326_v6 = vshrl.u32 %v325_v3, 7 }
  0xb0   :  { %659 = vmatprep.subr.bf16.mxu0 %v302_v60  ;;  %700 = vmatprep.subr.bf16.mxu1 %v304_v61 }
  0xb1   :  { %v3687_v7 = vsub.s32 0, %v326_v6  ;;  %v3689_v8 = vsub.s32 2, %v326_v6  ;;  %v3691_v10 = vsub.s32 1, %v326_v6  ;;  %v3693_v11 = vsub.s32 3, %v326_v6 }
  0xb2   :  { %v3707_v35 = vsub.s32 4, %v326_v6  ;;  %v3709_v36 = vsub.s32 6, %v326_v6  ;;  %v3711_v37 = vsub.s32 5, %v326_v6  ;;  %v3713_v38 = vsub.s32 7, %v326_v6 }
  0xb3   :  { %660 = vmatpush1.bf16.msra.mxu0 %v301_v62  ;;  %701 = vmatpush1.bf16.msra.mxu1 %v303_v63  ;;  %4728 = vst [vmem:[#allocation34_spill] sm:$0xff] %v3687_v7  ;;  %4729 = vst [vmem:[#allocation35_spill] sm:$0xff] %v3689_v8  ;;  %v328_v12 = vrot.slane %v321_v9, %v3687_v7  ;;  %v336_v13 = vrot.slane %v321_v9, %v3689_v8  ;;  %v322_v63 = vld [vmem:[#allocation9 + $0x8] sm:$0xff] }
  0xb4   :  { %661 = vmatprep.subr.bf16.mxu0 %v318_v0  ;;  %702 = vmatprep.subr.bf16.mxu1 %v320_v1  ;;  %4730 = vst [vmem:[#allocation36_spill] sm:$0xff] %v3691_v10  ;;  %4731 = vst [vmem:[#allocation37_spill] sm:$0xff] %v3693_v11  ;;  %v332_v14 = vrot.slane %v321_v9, %v3691_v10  ;;  %v340_v15 = vrot.slane %v321_v9, %v3693_v11 }
  0xb5   :  { %4734 = vst [vmem:[#allocation40_spill] sm:$0xff] %v3707_v35  ;;  %4735 = vst [vmem:[#allocation41_spill] sm:$0xff] %v3709_v36  ;;  %v344_v39 = vrot.slane %v321_v9, %v3707_v35  ;;  %v352_v40 = vrot.slane %v321_v9, %v3709_v36  ;;  %v348_v41 = vrot.slane %v321_v9, %v3711_v37 }
  0xb6   :  { %4736 = vst [vmem:[#allocation42_spill] sm:$0xff] %v3711_v37  ;;  %4737 = vst [vmem:[#allocation43_spill] sm:$0xff] %v3713_v38  ;;  %v356_v42 = vrot.slane %v321_v9, %v3713_v38  ;;  %v360_v0 = vrot.slane %v322_v63, %v3687_v7  ;;  %v368_v1 = vrot.slane %v322_v63, %v3689_v8 }
  0xb7   :  { %662 = vmatpush1.bf16.msra.mxu0 %v317_v4  ;;  %703 = vmatpush1.bf16.msra.mxu1 %v319_v5  ;;  %v364_v4 = vrot.slane %v322_v63, %v3691_v10  ;;  %v372_v5 = vrot.slane %v322_v63, %v3693_v11 }
  0xba   :  { %3330 = vmatmul.mubr.msk.bf16.vlgmr.msra.gmra.mrb[12].mxu0 %vm405_vm0, %v3661_v2  ;;  %3331 = vmatmul.mubr.msk.bf16.vlgmr.msra.gmra.mrb[12].mxu1 %vm405_vm0, %v3661_v2 }
 0x15d   :  { %v443_v2 = vpop.f32.mrb[0].mxu0  ;;  %v484_v16 = vpop.f32.mrb[0].mxu1 }
 0x15e   :  { %v444_v17 = vadd.f32 %v443_v2, %v328_v12  ;;  %v485_v18 = vadd.f32 %v484_v16, %v336_v13  ;;  %v445_v19 = vpop.f32.mrb[1].mxu0  ;;  %v486_v20 = vpop.f32.mrb[1].mxu1 }
 0x15f   :  { %v446_v21 = vadd.f32 %v445_v19, %v332_v14  ;;  %v487_v22 = vadd.f32 %v486_v20, %v340_v15  ;;  %v447_v23 = vpop.f32.mrb[2].mxu0  ;;  %v488_v24 = vpop.f32.mrb[2].mxu1 }
 0x160   :  { %v737_v25 = vmax.f32 %v444_v17, 0.0  ;;  %v739_v26 = vmax.f32 %v485_v18, 0.0  ;;  %v448_v27 = vpop.f32.mrb[3].mxu0  ;;  %v489_v28 = vpop.f32.mrb[3].mxu1 }
 0x161   :  { %v738_v29 = vmax.f32 %v446_v21, 0.0  ;;  %v740_v30 = vmax.f32 %v487_v22, 0.0  ;;  %v376_v28 = vrot.slane %v322_v63, %v3707_v35 }
 0x162   :  { %v3699_v31 = vpack.c.bf16 %v737_v25, %v737_v25  ;;  %v3701_v32 = vpack.c.bf16 %v739_v26, %v739_v26 }
 0x163   :  { %v3703_v33 = vpack.c.bf16 %v738_v29, %v738_v29  ;;  %v3705_v34 = vpack.c.bf16 %v740_v30, %v740_v30  ;;  %v384_v29 = vrot.slane %v322_v63, %v3709_v36  ;;  %v380_v30 = vrot.slane %v322_v63, %v3711_v37 }
 0x164   :  { %4732 = vst [vmem:[#allocation38_spill] sm:$0xff] %v3699_v31  ;;  %4733 = vst [vmem:[#allocation39_spill] sm:$0xff] %v3701_v32 }
 0x16d   :  { %v525_v43 = vpop.f32.mrb[4].mxu0  ;;  %v566_v44 = vpop.f32.mrb[4].mxu1 }
 0x16e   :  { %v526_v45 = vadd.f32 %v525_v43, %v344_v39  ;;  %v567_v46 = vadd.f32 %v566_v44, %v352_v40  ;;  %v527_v47 = vpop.f32.mrb[5].mxu0  ;;  %v568_v48 = vpop.f32.mrb[5].mxu1  ;;  %v388_v39 = vrot.slane %v322_v63, %v3713_v38 }
 0x16f   :  { %v528_v49 = vadd.f32 %v527_v47, %v348_v41  ;;  %v569_v50 = vadd.f32 %v568_v48, %v356_v42  ;;  %v529_v51 = vpop.f32.mrb[6].mxu0  ;;  %v570_v52 = vpop.f32.mrb[6].mxu1 }
 0x170   :  { %v741_v53 = vmax.f32 %v526_v45, 0.0  ;;  %v743_v54 = vmax.f32 %v567_v46, 0.0  ;;  %v530_v55 = vpop.f32.mrb[7].mxu0  ;;  %v571_v56 = vpop.f32.mrb[7].mxu1 }
 0x171   :  { %v742_v57 = vmax.f32 %v528_v49, 0.0  ;;  %v744_v58 = vmax.f32 %v569_v50, 0.0 }
 0x172   :  { %v3719_v59 = vpack.c.bf16 %v741_v53, %v741_v53  ;;  %v3721_v60 = vpack.c.bf16 %v743_v54, %v743_v54 }
 0x173   :  { %v3723_v61 = vpack.c.bf16 %v742_v57, %v742_v57  ;;  %v3725_v62 = vpack.c.bf16 %v744_v58, %v744_v58 }
 0x17d   :  { %v607_v3 = vpop.f32.mrb[8].mxu0  ;;  %v648_v6 = vpop.f32.mrb[8].mxu1 }
 0x17e   :  { %v608_v9 = vadd.f32 %v607_v3, %v360_v0  ;;  %v649_v12 = vadd.f32 %v648_v6, %v368_v1  ;;  %v609_v13 = vpop.f32.mrb[9].mxu0  ;;  %v650_v14 = vpop.f32.mrb[9].mxu1 }
 0x17f   :  { %v610_v15 = vadd.f32 %v609_v13, %v364_v4  ;;  %v651_v2 = vadd.f32 %v650_v14, %v372_v5  ;;  %v611_v16 = vpop.f32.mrb[10].mxu0  ;;  %v652_v17 = vpop.f32.mrb[10].mxu1 }
 0x180   :  { %v745_v18 = vmax.f32 %v608_v9, 0.0  ;;  %v747_v19 = vmax.f32 %v649_v12, 0.0  ;;  %v612_v20 = vpop.f32.mrb[11].mxu0  ;;  %v653_v21 = vpop.f32.mrb[11].mxu1 }
 0x181   :  { %v746_v22 = vmax.f32 %v610_v15, 0.0  ;;  %v748_v23 = vmax.f32 %v651_v2, 0.0 }
 0x182   :  { %v3731_v24 = vpack.c.bf16 %v745_v18, %v745_v18  ;;  %v3733_v25 = vpack.c.bf16 %v747_v19, %v747_v19 }
 0x183   :  { %v3735_v26 = vpack.c.bf16 %v746_v22, %v746_v22  ;;  %v3737_v27 = vpack.c.bf16 %v748_v23, %v748_v23 }
 0x184   :  { %4738 = vst [vmem:[#allocation44_spill] sm:$0xff] %v3731_v24  ;;  %4739 = vst [vmem:[#allocation45_spill] sm:$0xff] %v3733_v25 }
 0x185   :  { %4740 = vst [vmem:[#allocation46_spill] sm:$0xff] %v3735_v26  ;;  %4741 = vst [vmem:[#allocation47_spill] sm:$0xff] %v3737_v27 }
 0x18d   :  { %v689_v40 = vpop.f32.mrb[12].mxu0  ;;  %v730_v41 = vpop.f32.mrb[12].mxu1 }
 0x18e   :  { %v690_v42 = vadd.f32 %v689_v40, %v376_v28  ;;  %v731_v43 = vadd.f32 %v730_v41, %v384_v29  ;;  %v691_v44 = vpop.f32.mrb[13].mxu0  ;;  %v732_v45 = vpop.f32.mrb[13].mxu1 }
 0x18f   :  { %v692_v46 = vadd.f32 %v691_v44, %v380_v30  ;;  %v733_v47 = vadd.f32 %v732_v45, %v388_v39  ;;  %v693_v48 = vpop.f32.mrb[14].mxu0  ;;  %v734_v49 = vpop.f32.mrb[14].mxu1 }
 0x190   :  { %v749_v50 = vmax.f32 %v690_v42, 0.0  ;;  %v751_v51 = vmax.f32 %v731_v43, 0.0  ;;  %v694_v52 = vpop.f32.mrb[15].mxu0  ;;  %v735_v53 = vpop.f32.mrb[15].mxu1 }
 0x191   :  { %v750_v54 = vmax.f32 %v692_v46, 0.0  ;;  %v752_v55 = vmax.f32 %v733_v47, 0.0 }
 0x192   :  { %v3743_v56 = vpack.c.bf16 %v749_v50, %v749_v50  ;;  %v3745_v57 = vpack.c.bf16 %v751_v51, %v751_v51 }
 0x193   :  { %v3747_v58 = vpack.c.bf16 %v750_v54, %v750_v54  ;;  %v3749_v63 = vpack.c.bf16 %v752_v55, %v752_v55 }
 0x194   :  { %4742 = vst [vmem:[#allocation48_spill] sm:$0xff] %v3743_v56  ;;  %4743 = vst [vmem:[#allocation49_spill] sm:$0xff] %v3745_v57 }
 0x195   :  { %4744 = vst [vmem:[#allocation50_spill] sm:$0xff] %v3747_v58  ;;  %4745 = vst [vmem:[#allocation51_spill] sm:$0xff] %v3749_v63 }
 0x196   :  { %3467 = dma.done.wait [#allocation5 + $0x1], 32768 }
 0x197   :  { %3468 = vsyncadd [#allocation5 + $0x1], 4294934528  ;;  %v3751_v0 = vld [vmem:[#allocation3] sm:$0xff]  ;;  %v3753_v1 = vld [vmem:[#allocation3 + $0x8] sm:$0xff] }
 0x198   :  { %v3755_v4 = vld [vmem:[#allocation3 + $0x10] sm:$0xff]  ;;  %v3757_v5 = vld [vmem:[#allocation3 + $0x18] sm:$0xff]  ;;  %v3759_v3 = vld [vmem:[#allocation3 + $0x20] sm:$0xff] }
 0x199   :  { %4746 = vst [vmem:[#allocation52_spill] sm:$0xff] %v3755_v4  ;;  %4747 = vst [vmem:[#allocation53_spill] sm:$0xff] %v3757_v5  ;;  %v3761_v6 = vld [vmem:[#allocation3 + $0x28] sm:$0xff]  ;;  %v3763_v9 = vld [vmem:[#allocation3 + $0x30] sm:$0xff] }
 0x19a   :  { %4748 = vst [vmem:[#allocation54_spill] sm:$0xff] %v3759_v3  ;;  %4749 = vst [vmem:[#allocation55_spill] sm:$0xff] %v3761_v6  ;;  %v3765_v12 = vld [vmem:[#allocation3 + $0x38] sm:$0xff]  ;;  %v3767_v13 = vld [vmem:[#allocation3 + $0x40] sm:$0xff] }
 0x19b   :  { %4750 = vst [vmem:[#allocation56_spill] sm:$0xff] %v3763_v9  ;;  %4751 = vst [vmem:[#allocation57_spill] sm:$0xff] %v3765_v12  ;;  %v3769_v14 = vld [vmem:[#allocation3 + $0x48] sm:$0xff]  ;;  %v3771_v15 = vld [vmem:[#allocation3 + $0x50] sm:$0xff] }
 0x19c   :  { %4752 = vst [vmem:[#allocation58_spill] sm:$0xff] %v3771_v15  ;;  %v3773_v2 = vld [vmem:[#allocation3 + $0x58] sm:$0xff]  ;;  %v3775_v16 = vld [vmem:[#allocation3 + $0x60] sm:$0xff]  ;;  %v3777_v17 = vld [vmem:[#allocation3 + $0x68] sm:$0xff] }
 0x19d   :  { %4753 = vst [vmem:[#allocation59_spill] sm:$0xff] %v3773_v2  ;;  %4754 = vst [vmem:[#allocation60_spill] sm:$0xff] %v3775_v16  ;;  %v3779_v18 = vld [vmem:[#allocation3 + $0x70] sm:$0xff]  ;;  %v3781_v19 = vld [vmem:[#allocation3 + $0x78] sm:$0xff] }
 0x19e   :  { %4755 = vst [vmem:[#allocation61_spill] sm:$0xff] %v3777_v17  ;;  %4756 = vst [vmem:[#allocation62_spill] sm:$0xff] %v3779_v18  ;;  %v3783_v20 = vld [vmem:[#allocation3 + $0x80] sm:$0xff]  ;;  %v3785_v21 = vld [vmem:[#allocation3 + $0x88] sm:$0xff] }
 0x19f   :  { %4757 = vst [vmem:[#allocation63_spill] sm:$0xff] %v3781_v19  ;;  %v3787_v22 = vld [vmem:[#allocation3 + $0x90] sm:$0xff]  ;;  %v3789_v23 = vld [vmem:[#allocation3 + $0x98] sm:$0xff]  ;;  %v3791_v28 = vld [vmem:[#allocation3 + $0xa0] sm:$0xff] }
 0x1a0   :  { %4758 = vst [vmem:[#allocation64_spill] sm:$0xff] %v3787_v22  ;;  %4759 = vst [vmem:[#allocation65_spill] sm:$0xff] %v3789_v23  ;;  %v3793_v29 = vld [vmem:[#allocation3 + $0xa8] sm:$0xff]  ;;  %v3795_v30 = vld [vmem:[#allocation3 + $0xb0] sm:$0xff] }
 0x1a1   :  { %4760 = vst [vmem:[#allocation66_spill] sm:$0xff] %v3791_v28  ;;  %4761 = vst [vmem:[#allocation67_spill] sm:$0xff] %v3793_v29  ;;  %v3797_v39 = vld [vmem:[#allocation3 + $0xb8] sm:$0xff]  ;;  %v3799_v40 = vld [vmem:[#allocation3 + $0xc0] sm:$0xff] }
 0x1a2   :  { %4762 = vst [vmem:[#allocation68_spill] sm:$0xff] %v3795_v30  ;;  %4763 = vst [vmem:[#allocation69_spill] sm:$0xff] %v3797_v39  ;;  %v3801_v41 = vld [vmem:[#allocation3 + $0xc8] sm:$0xff]  ;;  %v3803_v42 = vld [vmem:[#allocation3 + $0xd0] sm:$0xff] }
 0x1a3   :  { %4764 = vst [vmem:[#allocation70_spill] sm:$0xff] %v3803_v42  ;;  %v3805_v43 = vld [vmem:[#allocation3 + $0xd8] sm:$0xff]  ;;  %v3807_v44 = vld [vmem:[#allocation3 + $0xe0] sm:$0xff]  ;;  %v3809_v45 = vld [vmem:[#allocation3 + $0xe8] sm:$0xff] }
 0x1a4   :  { %4765 = vst [vmem:[#allocation71_spill] sm:$0xff] %v3805_v43  ;;  %4766 = vst [vmem:[#allocation72_spill] sm:$0xff] %v3807_v44  ;;  %v3811_v46 = vld [vmem:[#allocation3 + $0xf0] sm:$0xff]  ;;  %v3813_v47 = vld [vmem:[#allocation3 + $0xf8] sm:$0xff] }
 0x1a5   :  { %4767 = vst [vmem:[#allocation73_spill] sm:$0xff] %v3809_v45  ;;  %4768 = vst [vmem:[#allocation74_spill] sm:$0xff] %v3811_v46  ;;  %v3815_v48 = vld [vmem:[#allocation3 + $0x100] sm:$0xff]  ;;  %v3817_v49 = vld [vmem:[#allocation3 + $0x108] sm:$0xff] }
 0x1a6   :  { %4769 = vst [vmem:[#allocation75_spill] sm:$0xff] %v3813_v47  ;;  %v3819_v50 = vld [vmem:[#allocation3 + $0x110] sm:$0xff]  ;;  %v3821_v51 = vld [vmem:[#allocation3 + $0x118] sm:$0xff]  ;;  %v3823_v52 = vld [vmem:[#allocation3 + $0x120] sm:$0xff] }
 0x1a7   :  { %4770 = vst [vmem:[#allocation76_spill] sm:$0xff] %v3819_v50  ;;  %4771 = vst [vmem:[#allocation77_spill] sm:$0xff] %v3821_v51  ;;  %v3825_v53 = vld [vmem:[#allocation3 + $0x128] sm:$0xff]  ;;  %v3827_v54 = vld [vmem:[#allocation3 + $0x130] sm:$0xff] }
 0x1a8   :  { %4772 = vst [vmem:[#allocation78_spill] sm:$0xff] %v3823_v52  ;;  %4773 = vst [vmem:[#allocation79_spill] sm:$0xff] %v3825_v53  ;;  %v3829_v55 = vld [vmem:[#allocation3 + $0x138] sm:$0xff]  ;;  %v3831_v38 = vld [vmem:[#allocation3 + $0x140] sm:$0xff] }
 0x1a9   :  { %4774 = vst [vmem:[#allocation80_spill] sm:$0xff] %v3827_v54  ;;  %4775 = vst [vmem:[#allocation81_spill] sm:$0xff] %v3829_v55  ;;  %v3833_v36 = vld [vmem:[#allocation3 + $0x148] sm:$0xff]  ;;  %v3835_v37 = vld [vmem:[#allocation3 + $0x150] sm:$0xff] }
 0x1aa   :  { %4776 = vst [vmem:[#allocation82_spill] sm:$0xff] %v3835_v37  ;;  %v3837_v35 = vld [vmem:[#allocation3 + $0x158] sm:$0xff]  ;;  %v3839_v11 = vld [vmem:[#allocation3 + $0x160] sm:$0xff]  ;;  %v3841_v8 = vld [vmem:[#allocation3 + $0x168] sm:$0xff] }
 0x1ab   :  { %4777 = vst [vmem:[#allocation83_spill] sm:$0xff] %v3837_v35  ;;  %4778 = vst [vmem:[#allocation84_spill] sm:$0xff] %v3839_v11  ;;  %v3843_v10 = vld [vmem:[#allocation3 + $0x170] sm:$0xff]  ;;  %v3845_v7 = vld [vmem:[#allocation3 + $0x178] sm:$0xff] }
 0x1ac   :  { %4779 = vst [vmem:[#allocation85_spill] sm:$0xff] %v3841_v8  ;;  %4780 = vst [vmem:[#allocation86_spill] sm:$0xff] %v3843_v10  ;;  %v3847_v57 = vld [vmem:[#allocation3 + $0x180] sm:$0xff]  ;;  %v3849_v56 = vld [vmem:[#allocation3 + $0x188] sm:$0xff] }
 0x1ad   :  { %4781 = vst [vmem:[#allocation87_spill] sm:$0xff] %v3845_v7  ;;  %v3851_v63 = vld [vmem:[#allocation3 + $0x190] sm:$0xff]  ;;  %v3853_v58 = vld [vmem:[#allocation3 + $0x198] sm:$0xff]  ;;  %v3855_v25 = vld [vmem:[#allocation3 + $0x1a0] sm:$0xff] }
 0x1ae   :  { %4782 = vst [vmem:[#allocation88_spill] sm:$0xff] %v3851_v63  ;;  %4783 = vst [vmem:[#allocation89_spill] sm:$0xff] %v3853_v58  ;;  %v3857_v24 = vld [vmem:[#allocation3 + $0x1a8] sm:$0xff]  ;;  %v3859_v27 = vld [vmem:[#allocation3 + $0x1b0] sm:$0xff] }
 0x1af   :  { %4784 = vst [vmem:[#allocation90_spill] sm:$0xff] %v3855_v25  ;;  %4785 = vst [vmem:[#allocation91_spill] sm:$0xff] %v3857_v24  ;;  %v3861_v26 = vld [vmem:[#allocation3 + $0x1b8] sm:$0xff]  ;;  %v3863_v54 = vld [vmem:[#allocation3 + $0x1c0] sm:$0xff] }
 0x1b0   :  { %4786 = vst [vmem:[#allocation92_spill] sm:$0xff] %v3859_v27  ;;  %4787 = vst [vmem:[#allocation93_spill] sm:$0xff] %v3861_v26  ;;  %v3865_v10 = vld [vmem:[#allocation3 + $0x1c8] sm:$0xff]  ;;  %v3867_v7 = vld [vmem:[#allocation3 + $0x1d0] sm:$0xff] }
 0x1b1   :  { %4788 = vst [vmem:[#allocation94_spill] sm:$0xff] %v3867_v7  ;;  %v3869_v55 = vld [vmem:[#allocation3 + $0x1d8] sm:$0xff]  ;;  %v3871_v46 = vld [vmem:[#allocation3 + $0x1e0] sm:$0xff]  ;;  %v3873_v47 = vld [vmem:[#allocation3 + $0x1e8] sm:$0xff] }
 0x1b2   :  { %4789 = vst [vmem:[#allocation95_spill] sm:$0xff] %v3869_v55  ;;  %4790 = vst [vmem:[#allocation96_spill] sm:$0xff] %v3871_v46  ;;  %v3875_v30 = vld [vmem:[#allocation3 + $0x1f0] sm:$0xff]  ;;  %v3877_v39 = vld [vmem:[#allocation3 + $0x1f8] sm:$0xff] }
 0x1b3   :  { %4791 = vst [vmem:[#allocation97_spill] sm:$0xff] %v3873_v47  ;;  %4792 = vst [vmem:[#allocation98_spill] sm:$0xff] %v3875_v30  ;;  %v3879_v18 = vld [vmem:[#allocation3 + $0x200] sm:$0xff]  ;;  %v3881_v27 = vld [vmem:[#allocation3 + $0x208] sm:$0xff] }
 0x1b4   :  { %4793 = vst [vmem:[#allocation99_spill] sm:$0xff] %v3877_v39  ;;  %v3883_v26 = vld [vmem:[#allocation3 + $0x210] sm:$0xff]  ;;  %v3885_v19 = vld [vmem:[#allocation3 + $0x218] sm:$0xff]  ;;  %v3887_v9 = vld [vmem:[#allocation3 + $0x220] sm:$0xff] }
 0x1b5   :  { %4794 = vst [vmem:[#allocation100_spill] sm:$0xff] %v3883_v26  ;;  %4795 = vst [vmem:[#allocation101_spill] sm:$0xff] %v3885_v19  ;;  %v3889_v12 = vld [vmem:[#allocation3 + $0x228] sm:$0xff]  ;;  %v3891_v25 = vld [vmem:[#allocation3 + $0x230] sm:$0xff] }
 0x1b6   :  { %4796 = vst [vmem:[#allocation102_spill] sm:$0xff] %v3887_v9  ;;  %4797 = vst [vmem:[#allocation103_spill] sm:$0xff] %v3889_v12  ;;  %v3893_v46 = vld [vmem:[#allocation3 + $0x238] sm:$0xff]  ;;  %v3895_v47 = vld [vmem:[#allocation3 + $0x240] sm:$0xff] }
 0x1b7   :  { %4798 = vst [vmem:[#allocation104_spill] sm:$0xff] %v3891_v25  ;;  %4799 = vst [vmem:[#allocation105_spill] sm:$0xff] %v3893_v46  ;;  %v3897_v30 = vld [vmem:[#allocation3 + $0x248] sm:$0xff]  ;;  %v3899_v39 = vld [vmem:[#allocation3 + $0x250] sm:$0xff] }
 0x1b8   :  { %4800 = vst [vmem:[#allocation106_spill] sm:$0xff] %v3899_v39  ;;  %v3901_v24 = vld [vmem:[#allocation3 + $0x258] sm:$0xff]  ;;  %v3903_v11 = vld [vmem:[#allocation3 + $0x260] sm:$0xff]  ;;  %v3905_v8 = vld [vmem:[#allocation3 + $0x268] sm:$0xff] }
 0x1b9   :  { %4801 = vst [vmem:[#allocation107_spill] sm:$0xff] %v3901_v24  ;;  %4802 = vst [vmem:[#allocation108_spill] sm:$0xff] %v3903_v11  ;;  %v3907_v52 = vld [vmem:[#allocation3 + $0x270] sm:$0xff]  ;;  %v3909_v9 = vld [vmem:[#allocation3 + $0x278] sm:$0xff] }
 0x1ba   :  { %4803 = vst [vmem:[#allocation109_spill] sm:$0xff] %v3905_v8  ;;  %4804 = vst [vmem:[#allocation110_spill] sm:$0xff] %v3907_v52  ;;  %v3911_v12 = vld [vmem:[#allocation3 + $0x280] sm:$0xff]  ;;  %v3913_v25 = vld [vmem:[#allocation3 + $0x288] sm:$0xff] }
 0x1bb   :  { %4805 = vst [vmem:[#allocation111_spill] sm:$0xff] %v3909_v9  ;;  %v3915_v46 = vld [vmem:[#allocation3 + $0x290] sm:$0xff]  ;;  %v3917_v53 = vld [vmem:[#allocation3 + $0x298] sm:$0xff]  ;;  %v3919_v44 = vld [vmem:[#allocation3 + $0x2a0] sm:$0xff] }
 0x1bc   :  { %4806 = vst [vmem:[#allocation112_spill] sm:$0xff] %v3915_v46  ;;  %4807 = vst [vmem:[#allocation113_spill] sm:$0xff] %v3917_v53  ;;  %v3921_v45 = vld [vmem:[#allocation3 + $0x2a8] sm:$0xff]  ;;  %v3923_v28 = vld [vmem:[#allocation3 + $0x2b0] sm:$0xff] }
 0x1bd   :  { %4808 = vst [vmem:[#allocation114_spill] sm:$0xff] %v3919_v44  ;;  %4809 = vst [vmem:[#allocation115_spill] sm:$0xff] %v3921_v45  ;;  %v3925_v11 = vld [vmem:[#allocation3 + $0x2b8] sm:$0xff]  ;;  %v3927_v8 = vld [vmem:[#allocation3 + $0x2c0] sm:$0xff] }
 0x1be   :  { %4810 = vst [vmem:[#allocation116_spill] sm:$0xff] %v3923_v28  ;;  %4811 = vst [vmem:[#allocation117_spill] sm:$0xff] %v3925_v11  ;;  %v3929_v52 = vld [vmem:[#allocation3 + $0x2c8] sm:$0xff]  ;;  %v3931_v9 = vld [vmem:[#allocation3 + $0x2d0] sm:$0xff] }
 0x1bf   :  { %4812 = vst [vmem:[#allocation118_spill] sm:$0xff] %v3927_v8  ;;  %4813 = vst [vmem:[#allocation119_spill] sm:$0xff] %v3931_v9  ;;  %v3933_v29 = vld [vmem:[#allocation3 + $0x2d8] sm:$0xff]  ;;  %v3935_v16 = vld [vmem:[#allocation3 + $0x2e0] sm:$0xff] }
 0x1c0   :  { %4814 = vst [vmem:[#allocation120_spill] sm:$0xff] %v3933_v29  ;;  %4815 = vst [vmem:[#allocation121_spill] sm:$0xff] %v3935_v16  ;;  %v3937_v17 = vld [vmem:[#allocation3 + $0x2e8] sm:$0xff]  ;;  %v3939_v3 = vld [vmem:[#allocation3 + $0x2f0] sm:$0xff] }
 0x1c1   :  { %4816 = vst [vmem:[#allocation122_spill] sm:$0xff] %v3937_v17  ;;  %4817 = vst [vmem:[#allocation123_spill] sm:$0xff] %v3939_v3  ;;  %v3941_v44 = vld [vmem:[#allocation3 + $0x2f8] sm:$0xff]  ;;  %v3943_v45 = vld [vmem:[#allocation3 + $0x300] sm:$0xff] }
 0x1c2   :  { %4818 = vst [vmem:[#allocation124_spill] sm:$0xff] %v3941_v44  ;;  %4819 = vst [vmem:[#allocation125_spill] sm:$0xff] %v3943_v45  ;;  %v3945_v28 = vld [vmem:[#allocation3 + $0x308] sm:$0xff]  ;;  %v3947_v11 = vld [vmem:[#allocation3 + $0x310] sm:$0xff] }
 0x1c3   :  { %4820 = vst [vmem:[#allocation126_spill] sm:$0xff] %v3945_v28  ;;  %4821 = vst [vmem:[#allocation127_spill] sm:$0xff] %v3947_v11  ;;  %v3949_v6 = vld [vmem:[#allocation3 + $0x318] sm:$0xff]  ;;  %v3951_v46 = vld [vmem:[#allocation3 + $0x320] sm:$0xff] }
 0x1c4   :  { %4822 = vst [vmem:[#allocation128_spill] sm:$0xff] %v3949_v6  ;;  %4823 = vst [vmem:[#allocation129_spill] sm:$0xff] %v3951_v46  ;;  %v3953_v9 = vld [vmem:[#allocation3 + $0x328] sm:$0xff]  ;;  %v3955_v29 = vld [vmem:[#allocation3 + $0x330] sm:$0xff] }
 0x1c5   :  { %4824 = vst [vmem:[#allocation130_spill] sm:$0xff] %v3953_v9  ;;  %4825 = vst [vmem:[#allocation131_spill] sm:$0xff] %v3955_v29  ;;  %v3957_v16 = vld [vmem:[#allocation3 + $0x338] sm:$0xff]  ;;  %v3959_v17 = vld [vmem:[#allocation3 + $0x340] sm:$0xff] }
 0x1c6   :  { %4826 = vst [vmem:[#allocation132_spill] sm:$0xff] %v3957_v16  ;;  %4827 = vst [vmem:[#allocation133_spill] sm:$0xff] %v3959_v17  ;;  %v3961_v3 = vld [vmem:[#allocation3 + $0x348] sm:$0xff]  ;;  %v3963_v44 = vld [vmem:[#allocation3 + $0x350] sm:$0xff] }
 0x1c7   :  { %4828 = vst [vmem:[#allocation134_spill] sm:$0xff] %v3961_v3  ;;  %4829 = vst [vmem:[#allocation135_spill] sm:$0xff] %v3963_v44  ;;  %v3965_v53 = vld [vmem:[#allocation3 + $0x358] sm:$0xff]  ;;  %v3967_v39 = vld [vmem:[#allocation3 + $0x360] sm:$0xff] }
 0x1c8   :  { %4830 = vst [vmem:[#allocation136_spill] sm:$0xff] %v3965_v53  ;;  %4831 = vst [vmem:[#allocation137_spill] sm:$0xff] %v3967_v39  ;;  %v3969_v11 = vld [vmem:[#allocation3 + $0x368] sm:$0xff]  ;;  %v3971_v6 = vld [vmem:[#allocation3 + $0x370] sm:$0xff] }
 0x1c9   :  { %4832 = vst [vmem:[#allocation138_spill] sm:$0xff] %v3969_v11  ;;  %4833 = vst [vmem:[#allocation139_spill] sm:$0xff] %v3971_v6  ;;  %v3973_v46 = vld [vmem:[#allocation3 + $0x378] sm:$0xff]  ;;  %v3975_v9 = vld [vmem:[#allocation3 + $0x380] sm:$0xff] }
 0x1ca   :  { %4834 = vst [vmem:[#allocation140_spill] sm:$0xff] %v3973_v46  ;;  %4835 = vst [vmem:[#allocation141_spill] sm:$0xff] %v3975_v9  ;;  %v3977_v29 = vld [vmem:[#allocation3 + $0x388] sm:$0xff]  ;;  %v3979_v16 = vld [vmem:[#allocation3 + $0x390] sm:$0xff] }
 0x1cb   :  { %4836 = vst [vmem:[#allocation142_spill] sm:$0xff] %v3977_v29  ;;  %4837 = vst [vmem:[#allocation143_spill] sm:$0xff] %v3979_v16  ;;  %v3981_v24 = vld [vmem:[#allocation3 + $0x398] sm:$0xff]  ;;  %v3983_v26 = vld [vmem:[#allocation3 + $0x3a0] sm:$0xff] }
 0x1cc   :  { %4838 = vst [vmem:[#allocation144_spill] sm:$0xff] %v3981_v24  ;;  %4839 = vst [vmem:[#allocation145_spill] sm:$0xff] %v3983_v26  ;;  %v3985_v44 = vld [vmem:[#allocation3 + $0x3a8] sm:$0xff]  ;;  %v3987_v53 = vld [vmem:[#allocation3 + $0x3b0] sm:$0xff] }
 0x1cd   :  { %4840 = vst [vmem:[#allocation146_spill] sm:$0xff] %v3985_v44  ;;  %4841 = vst [vmem:[#allocation147_spill] sm:$0xff] %v3987_v53  ;;  %v3989_v39 = vld [vmem:[#allocation3 + $0x3b8] sm:$0xff]  ;;  %v3991_v11 = vld [vmem:[#allocation3 + $0x3c0] sm:$0xff] }
 0x1ce   :  { %4842 = vst [vmem:[#allocation148_spill] sm:$0xff] %v3989_v39  ;;  %4843 = vst [vmem:[#allocation149_spill] sm:$0xff] %v3991_v11  ;;  %v3993_v6 = vld [vmem:[#allocation3 + $0x3c8] sm:$0xff]  ;;  %v3995_v46 = vld [vmem:[#allocation3 + $0x3d0] sm:$0xff] }
 0x1cf   :  { %4844 = vst [vmem:[#allocation150_spill] sm:$0xff] %v3993_v6  ;;  %4845 = vst [vmem:[#allocation151_spill] sm:$0xff] %v3995_v46  ;;  %v3997_v19 = vld [vmem:[#allocation3 + $0x3d8] sm:$0xff]  ;;  %v3999_v7 = vld [vmem:[#allocation3 + $0x3e0] sm:$0xff] }
 0x1d0   :  { %4846 = vst [vmem:[#allocation152_spill] sm:$0xff] %v3997_v19  ;;  %4847 = vst [vmem:[#allocation153_spill] sm:$0xff] %v3999_v7  ;;  %v4001_v16 = vld [vmem:[#allocation3 + $0x3e8] sm:$0xff]  ;;  %v4003_v24 = vld [vmem:[#allocation3 + $0x3f0] sm:$0xff] }
 0x1d1   :  { %4848 = vst [vmem:[#allocation154_spill] sm:$0xff] %v4001_v16  ;;  %4849 = vst [vmem:[#allocation155_spill] sm:$0xff] %v4003_v24  ;;  %v4005_v26 = vld [vmem:[#allocation3 + $0x3f8] sm:$0xff]  ;;  %v4007_v44 = vld [vmem:[#allocation3 + $0x400] sm:$0xff] }
 0x1d2   :  { %4850 = vst [vmem:[#allocation156_spill] sm:$0xff] %v4005_v26  ;;  %v4009_v53 = vld [vmem:[#allocation3 + $0x408] sm:$0xff]  ;;  %v4011_v39 = vld [vmem:[#allocation3 + $0x410] sm:$0xff]  ;;  %v4013_v55 = vld [vmem:[#allocation3 + $0x418] sm:$0xff] }
 0x1d3   :  { %4851 = vst [vmem:[#allocation157_spill] sm:$0xff] %v4011_v39  ;;  %4852 = vst [vmem:[#allocation158_spill] sm:$0xff] %v4013_v55  ;;  %v4015_v63 = vld [vmem:[#allocation3 + $0x420] sm:$0xff]  ;;  %v4017_v46 = vld [vmem:[#allocation3 + $0x428] sm:$0xff] }
 0x1d4   :  { %4853 = vst [vmem:[#allocation159_spill] sm:$0xff] %v4015_v63  ;;  %4854 = vst [vmem:[#allocation160_spill] sm:$0xff] %v4017_v46  ;;  %v4019_v19 = vld [vmem:[#allocation3 + $0x430] sm:$0xff]  ;;  %v4021_v7 = vld [vmem:[#allocation3 + $0x438] sm:$0xff] }
 0x1d5   :  { %4855 = vst [vmem:[#allocation161_spill] sm:$0xff] %v4019_v19  ;;  %4856 = vst [vmem:[#allocation162_spill] sm:$0xff] %v4021_v7  ;;  %v4023_v16 = vld [vmem:[#allocation3 + $0x440] sm:$0xff]  ;;  %v4025_v24 = vld [vmem:[#allocation3 + $0x448] sm:$0xff] }
 0x1d6   :  { %v4027_v26 = vld [vmem:[#allocation3 + $0x450] sm:$0xff]  ;;  %v4029_v58 = vld [vmem:[#allocation3 + $0x458] sm:$0xff]  ;;  %v4031_v37 = vld [vmem:[#allocation3 + $0x460] sm:$0xff] }
 0x1d7   :  { %4857 = vst [vmem:[#allocation163_spill] sm:$0xff] %v4027_v26  ;;  %4858 = vst [vmem:[#allocation164_spill] sm:$0xff] %v4029_v58  ;;  %v4033_v35 = vld [vmem:[#allocation3 + $0x468] sm:$0xff]  ;;  %v4035_v50 = vld [vmem:[#allocation3 + $0x470] sm:$0xff] }
 0x1d8   :  { %4859 = vst [vmem:[#allocation165_spill] sm:$0xff] %v4031_v37  ;;  %4860 = vst [vmem:[#allocation166_spill] sm:$0xff] %v4033_v35  ;;  %v4037_v63 = vld [vmem:[#allocation3 + $0x478] sm:$0xff]  ;;  %v4039_v46 = vld [vmem:[#allocation3 + $0x480] sm:$0xff] }
 0x1d9   :  { %4861 = vst [vmem:[#allocation167_spill] sm:$0xff] %v4035_v50  ;;  %4862 = vst [vmem:[#allocation168_spill] sm:$0xff] %v4037_v63  ;;  %v4041_v19 = vld [vmem:[#allocation3 + $0x488] sm:$0xff]  ;;  %v4043_v7 = vld [vmem:[#allocation3 + $0x490] sm:$0xff] }
 0x1da   :  { %4863 = vst [vmem:[#allocation169_spill] sm:$0xff] %v4043_v7  ;;  %v4045_v51 = vld [vmem:[#allocation3 + $0x498] sm:$0xff]  ;;  %v4047_v42 = vld [vmem:[#allocation3 + $0x4a0] sm:$0xff]  ;;  %v4049_v43 = vld [vmem:[#allocation3 + $0x4a8] sm:$0xff] }
 0x1db   :  { %4864 = vst [vmem:[#allocation170_spill] sm:$0xff] %v4045_v51  ;;  %4865 = vst [vmem:[#allocation171_spill] sm:$0xff] %v4047_v42  ;;  %v4051_v22 = vld [vmem:[#allocation3 + $0x4b0] sm:$0xff]  ;;  %v4053_v37 = vld [vmem:[#allocation3 + $0x4b8] sm:$0xff] }
 0x1dc   :  { %4866 = vst [vmem:[#allocation172_spill] sm:$0xff] %v4049_v43  ;;  %4867 = vst [vmem:[#allocation173_spill] sm:$0xff] %v4051_v22  ;;  %v4055_v35 = vld [vmem:[#allocation3 + $0x4c0] sm:$0xff]  ;;  %v4057_v50 = vld [vmem:[#allocation3 + $0x4c8] sm:$0xff] }
 0x1dd   :  { %4868 = vst [vmem:[#allocation174_spill] sm:$0xff] %v4053_v37  ;;  %v4059_v63 = vld [vmem:[#allocation3 + $0x4d0] sm:$0xff]  ;;  %v4061_v23 = vld [vmem:[#allocation3 + $0x4d8] sm:$0xff]  ;;  %v4063_v26 = vld [vmem:[#allocation3 + $0x4e0] sm:$0xff] }
 0x1de   :  { %4869 = vst [vmem:[#allocation175_spill] sm:$0xff] %v4059_v63  ;;  %4870 = vst [vmem:[#allocation176_spill] sm:$0xff] %v4061_v23  ;;  %v4065_v7 = vld [vmem:[#allocation3 + $0x4e8] sm:$0xff]  ;;  %v4067_v51 = vld [vmem:[#allocation3 + $0x4f0] sm:$0xff] }
 0x1df   :  { %4871 = vst [vmem:[#allocation177_spill] sm:$0xff] %v4063_v26  ;;  %4872 = vst [vmem:[#allocation178_spill] sm:$0xff] %v4065_v7  ;;  %v4069_v42 = vld [vmem:[#allocation3 + $0x4f8] sm:$0xff]  ;;  %v4071_v43 = vld [vmem:[#allocation3 + $0x500] sm:$0xff] }
 0x1e0   :  { %4873 = vst [vmem:[#allocation179_spill] sm:$0xff] %v4067_v51  ;;  %4874 = vst [vmem:[#allocation180_spill] sm:$0xff] %v4069_v42  ;;  %v4073_v22 = vld [vmem:[#allocation3 + $0x508] sm:$0xff]  ;;  %v4075_v37 = vld [vmem:[#allocation3 + $0x510] sm:$0xff] }
 0x1e1   :  { %4875 = vst [vmem:[#allocation181_spill] sm:$0xff] %v4075_v37  ;;  %v4077_v15 = vld [vmem:[#allocation3 + $0x518] sm:$0xff]  ;;  %v4079_v58 = vld [vmem:[#allocation3 + $0x520] sm:$0xff]  ;;  %v4081_v63 = vld [vmem:[#allocation3 + $0x528] sm:$0xff] }
 0x1e2   :  { %4876 = vst [vmem:[#allocation182_spill] sm:$0xff] %v4077_v15  ;;  %4877 = vst [vmem:[#allocation183_spill] sm:$0xff] %v4079_v58  ;;  %v4083_v23 = vld [vmem:[#allocation3 + $0x530] sm:$0xff]  ;;  %v4085_v26 = vld [vmem:[#allocation3 + $0x538] sm:$0xff] }
 0x1e3   :  { %4878 = vst [vmem:[#allocation184_spill] sm:$0xff] %v4081_v63  ;;  %4879 = vst [vmem:[#allocation185_spill] sm:$0xff] %v4083_v23  ;;  %v4087_v7 = vld [vmem:[#allocation3 + $0x540] sm:$0xff]  ;;  %v4089_v51 = vld [vmem:[#allocation3 + $0x548] sm:$0xff] }
 0x1e4   :  { %4880 = vst [vmem:[#allocation186_spill] sm:$0xff] %v4085_v26  ;;  %v4091_v42 = vld [vmem:[#allocation3 + $0x550] sm:$0xff]  ;;  %v4093_v2 = vld [vmem:[#allocation3 + $0x558] sm:$0xff]  ;;  %v4095_v39 = vld [vmem:[#allocation3 + $0x560] sm:$0xff] }
 0x1e5   :  { %4881 = vst [vmem:[#allocation187_spill] sm:$0xff] %v4091_v42  ;;  %4882 = vst [vmem:[#allocation188_spill] sm:$0xff] %v4093_v2  ;;  %v4097_v37 = vld [vmem:[#allocation3 + $0x568] sm:$0xff]  ;;  %v4099_v15 = vld [vmem:[#allocation3 + $0x570] sm:$0xff] }
 0x1e6   :  { %4883 = vst [vmem:[#allocation189_spill] sm:$0xff] %v4095_v39  ;;  %4884 = vst [vmem:[#allocation190_spill] sm:$0xff] %v4097_v37  ;;  %v4101_v58 = vld [vmem:[#allocation3 + $0x578] sm:$0xff]  ;;  %v4103_v63 = vld [vmem:[#allocation3 + $0x580] sm:$0xff] }
 0x1e7   :  { %4885 = vst [vmem:[#allocation191_spill] sm:$0xff] %v4099_v15  ;;  %4886 = vst [vmem:[#allocation192_spill] sm:$0xff] %v4101_v58  ;;  %v4105_v23 = vld [vmem:[#allocation3 + $0x588] sm:$0xff]  ;;  %v4107_v26 = vld [vmem:[#allocation3 + $0x590] sm:$0xff] }
 0x1e8   :  { %4887 = vst [vmem:[#allocation193_spill] sm:$0xff] %v4107_v26  ;;  %v4109_v4 = vld [vmem:[#allocation3 + $0x598] sm:$0xff]  ;;  %v4111_v32 = vld [vmem:[#allocation3 + $0x5a0] sm:$0xff]  ;;  %v4113_v42 = vld [vmem:[#allocation3 + $0x5a8] sm:$0xff] }
 0x1e9   :  { %4888 = vst [vmem:[#allocation194_spill] sm:$0xff] %v4109_v4  ;;  %4889 = vst [vmem:[#allocation195_spill] sm:$0xff] %v4111_v32  ;;  %v4115_v2 = vld [vmem:[#allocation3 + $0x5b0] sm:$0xff]  ;;  %v4117_v39 = vld [vmem:[#allocation3 + $0x5b8] sm:$0xff] }
 0x1ea   :  { %4890 = vst [vmem:[#allocation196_spill] sm:$0xff] %v4113_v42  ;;  %4891 = vst [vmem:[#allocation197_spill] sm:$0xff] %v4115_v2  ;;  %v4119_v37 = vld [vmem:[#allocation3 + $0x5c0] sm:$0xff]  ;;  %v4121_v15 = vld [vmem:[#allocation3 + $0x5c8] sm:$0xff] }
 0x1eb   :  { %4892 = vst [vmem:[#allocation198_spill] sm:$0xff] %v4117_v39  ;;  %v4123_v58 = vld [vmem:[#allocation3 + $0x5d0] sm:$0xff]  ;;  %v4125_v31 = vld [vmem:[#allocation3 + $0x5d8] sm:$0xff]  ;;  %v4127_v55 = vld [vmem:[#allocation3 + $0x5e0] sm:$0xff] }
 0x1ec   :  { %4893 = vst [vmem:[#allocation199_spill] sm:$0xff] %v4123_v58  ;;  %4894 = vst [vmem:[#allocation200_spill] sm:$0xff] %v4125_v31  ;;  %v4129_v26 = vld [vmem:[#allocation3 + $0x5e8] sm:$0xff]  ;;  %v4131_v4 = vld [vmem:[#allocation3 + $0x5f0] sm:$0xff] }
 0x1ed   :  { %4895 = vst [vmem:[#allocation201_spill] sm:$0xff] %v4127_v55  ;;  %4896 = vst [vmem:[#allocation202_spill] sm:$0xff] %v4129_v26  ;;  %v4133_v32 = vld [vmem:[#allocation3 + $0x5f8] sm:$0xff]  ;;  %v4135_v42 = vld [vmem:[#allocation3 + $0x600] sm:$0xff] }
 0x1ee   :  { %4897 = vst [vmem:[#allocation203_spill] sm:$0xff] %v4131_v4  ;;  %4898 = vst [vmem:[#allocation204_spill] sm:$0xff] %v4133_v32  ;;  %v4137_v2 = vld [vmem:[#allocation3 + $0x608] sm:$0xff]  ;;  %v4139_v39 = vld [vmem:[#allocation3 + $0x610] sm:$0xff] }
 0x1ef   :  { %4899 = vst [vmem:[#allocation205_spill] sm:$0xff] %v4139_v39  ;;  %v4141_v5 = vld [vmem:[#allocation3 + $0x618] sm:$0xff]  ;;  %v4143_v11 = vld [vmem:[#allocation3 + $0x620] sm:$0xff]  ;;  %v4145_v58 = vld [vmem:[#allocation3 + $0x628] sm:$0xff] }
 0x1f0   :  { %4900 = vst [vmem:[#allocation206_spill] sm:$0xff] %v4141_v5  ;;  %4901 = vst [vmem:[#allocation207_spill] sm:$0xff] %v4143_v11  ;;  %v4147_v31 = vld [vmem:[#allocation3 + $0x630] sm:$0xff]  ;;  %v4149_v55 = vld [vmem:[#allocation3 + $0x638] sm:$0xff] }
 0x1f1   :  { %4902 = vst [vmem:[#allocation208_spill] sm:$0xff] %v4145_v58  ;;  %4903 = vst [vmem:[#allocation209_spill] sm:$0xff] %v4147_v31  ;;  %v4151_v26 = vld [vmem:[#allocation3 + $0x640] sm:$0xff]  ;;  %v4153_v4 = vld [vmem:[#allocation3 + $0x648] sm:$0xff] }
 0x1f2   :  { %4904 = vst [vmem:[#allocation210_spill] sm:$0xff] %v4149_v55  ;;  %v4155_v32 = vld [vmem:[#allocation3 + $0x650] sm:$0xff]  ;;  %v4157_v6 = vld [vmem:[#allocation3 + $0x658] sm:$0xff]  ;;  %v4159_v9 = vld [vmem:[#allocation3 + $0x660] sm:$0xff] }
 0x1f3   :  { %4905 = vst [vmem:[#allocation211_spill] sm:$0xff] %v4155_v32  ;;  %4906 = vst [vmem:[#allocation212_spill] sm:$0xff] %v4157_v6  ;;  %v4161_v39 = vld [vmem:[#allocation3 + $0x668] sm:$0xff]  ;;  %v4163_v5 = vld [vmem:[#allocation3 + $0x670] sm:$0xff] }
 0x1f4   :  { %4907 = vst [vmem:[#allocation213_spill] sm:$0xff] %v4159_v9  ;;  %4908 = vst [vmem:[#allocation214_spill] sm:$0xff] %v4161_v39  ;;  %v4165_v11 = vld [vmem:[#allocation3 + $0x678] sm:$0xff]  ;;  %v4167_v58 = vld [vmem:[#allocation3 + $0x680] sm:$0xff] }
 0x1f5   :  { %4909 = vst [vmem:[#allocation215_spill] sm:$0xff] %v4163_v5  ;;  %4910 = vst [vmem:[#allocation216_spill] sm:$0xff] %v4165_v11  ;;  %v4169_v31 = vld [vmem:[#allocation3 + $0x688] sm:$0xff]  ;;  %v4171_v55 = vld [vmem:[#allocation3 + $0x690] sm:$0xff] }
 0x1f6   :  { %4911 = vst [vmem:[#allocation217_spill] sm:$0xff] %v4171_v55  ;;  %v4173_v29 = vld [vmem:[#allocation3 + $0x698] sm:$0xff]  ;;  %v4175_v17 = vld [vmem:[#allocation3 + $0x6a0] sm:$0xff]  ;;  %v4177_v32 = vld [vmem:[#allocation3 + $0x6a8] sm:$0xff] }
 0x1f7   :  { %4912 = vst [vmem:[#allocation218_spill] sm:$0xff] %v4173_v29  ;;  %4913 = vst [vmem:[#allocation219_spill] sm:$0xff] %v4175_v17  ;;  %v4179_v6 = vld [vmem:[#allocation3 + $0x6b0] sm:$0xff]  ;;  %v4181_v9 = vld [vmem:[#allocation3 + $0x6b8] sm:$0xff] }
 0x1f8   :  { %4914 = vst [vmem:[#allocation220_spill] sm:$0xff] %v4177_v32  ;;  %4915 = vst [vmem:[#allocation221_spill] sm:$0xff] %v4179_v6  ;;  %v4183_v39 = vld [vmem:[#allocation3 + $0x6c0] sm:$0xff]  ;;  %v4185_v5 = vld [vmem:[#allocation3 + $0x6c8] sm:$0xff] }
 0x1f9   :  { %4916 = vst [vmem:[#allocation222_spill] sm:$0xff] %v4181_v9  ;;  %4917 = vst [vmem:[#allocation223_spill] sm:$0xff] %v4183_v39  ;;  %v4187_v11 = vld [vmem:[#allocation3 + $0x6d0] sm:$0xff]  ;;  %v4189_v3 = vld [vmem:[#allocation3 + $0x6d8] sm:$0xff] }
 0x1fa   :  { %4918 = vst [vmem:[#allocation224_spill] sm:$0xff] %v4185_v5  ;;  %4919 = vst [vmem:[#allocation225_spill] sm:$0xff] %v4187_v11  ;;  %v4191_v45 = vld [vmem:[#allocation3 + $0x6e0] sm:$0xff]  ;;  %v4193_v55 = vld [vmem:[#allocation3 + $0x6e8] sm:$0xff] }
 0x1fb   :  { %4920 = vst [vmem:[#allocation226_spill] sm:$0xff] %v4189_v3  ;;  %4921 = vst [vmem:[#allocation227_spill] sm:$0xff] %v4191_v45  ;;  %v4195_v29 = vld [vmem:[#allocation3 + $0x6f0] sm:$0xff]  ;;  %v4197_v17 = vld [vmem:[#allocation3 + $0x6f8] sm:$0xff] }
 0x1fc   :  { %4922 = vst [vmem:[#allocation228_spill] sm:$0xff] %v4193_v55  ;;  %4923 = vst [vmem:[#allocation229_spill] sm:$0xff] %v4195_v29  ;;  %v4199_v32 = vld [vmem:[#allocation3 + $0x700] sm:$0xff]  ;;  %v4201_v6 = vld [vmem:[#allocation3 + $0x708] sm:$0xff] }
 0x1fd   :  { %4924 = vst [vmem:[#allocation230_spill] sm:$0xff] %v4197_v17  ;;  %4925 = vst [vmem:[#allocation231_spill] sm:$0xff] %v4199_v32  ;;  %v4203_v9 = vld [vmem:[#allocation3 + $0x710] sm:$0xff]  ;;  %v4205_v28 = vld [vmem:[#allocation3 + $0x718] sm:$0xff] }
 0x1fe   :  { %4926 = vst [vmem:[#allocation232_spill] sm:$0xff] %v4201_v6  ;;  %4927 = vst [vmem:[#allocation233_spill] sm:$0xff] %v4203_v9  ;;  %v4207_v39 = vld [vmem:[#allocation3 + $0x720] sm:$0xff]  ;;  %v4209_v11 = vld [vmem:[#allocation3 + $0x728] sm:$0xff] }
 0x1ff   :  { %4928 = vst [vmem:[#allocation234_spill] sm:$0xff] %v4205_v28  ;;  %4929 = vst [vmem:[#allocation235_spill] sm:$0xff] %v4207_v39  ;;  %v4211_v3 = vld [vmem:[#allocation3 + $0x730] sm:$0xff]  ;;  %v4213_v45 = vld [vmem:[#allocation3 + $0x738] sm:$0xff] }
 0x200   :  { %4930 = vst [vmem:[#allocation236_spill] sm:$0xff] %v4209_v11  ;;  %4931 = vst [vmem:[#allocation237_spill] sm:$0xff] %v4211_v3  ;;  %v4215_v55 = vld [vmem:[#allocation3 + $0x740] sm:$0xff]  ;;  %v4217_v29 = vld [vmem:[#allocation3 + $0x748] sm:$0xff] }
 0x201   :  { %4932 = vst [vmem:[#allocation238_spill] sm:$0xff] %v4213_v45  ;;  %4933 = vst [vmem:[#allocation239_spill] sm:$0xff] %v4215_v55  ;;  %v4219_v17 = vld [vmem:[#allocation3 + $0x750] sm:$0xff]  ;;  %v4221_v32 = vld [vmem:[#allocation3 + $0x758] sm:$0xff] }
 0x202   :  { %4934 = vst [vmem:[#allocation240_spill] sm:$0xff] %v4217_v29  ;;  %4935 = vst [vmem:[#allocation241_spill] sm:$0xff] %v4219_v17  ;;  %v4223_v6 = vld [vmem:[#allocation3 + $0x760] sm:$0xff]  ;;  %v4225_v9 = vld [vmem:[#allocation3 + $0x768] sm:$0xff] }
 0x203   :  { %4936 = vst [vmem:[#allocation242_spill] sm:$0xff] %v4221_v32  ;;  %4937 = vst [vmem:[#allocation243_spill] sm:$0xff] %v4223_v6  ;;  %v4227_v28 = vld [vmem:[#allocation3 + $0x770] sm:$0xff]  ;;  %v4229_v39 = vld [vmem:[#allocation3 + $0x778] sm:$0xff] }
 0x204   :  { %4938 = vst [vmem:[#allocation244_spill] sm:$0xff] %v4225_v9  ;;  %4939 = vst [vmem:[#allocation245_spill] sm:$0xff] %v4227_v28  ;;  %v4231_v11 = vld [vmem:[#allocation3 + $0x780] sm:$0xff]  ;;  %v4233_v3 = vld [vmem:[#allocation3 + $0x788] sm:$0xff] }
 0x205   :  { %4940 = vst [vmem:[#allocation246_spill] sm:$0xff] %v4229_v39  ;;  %4941 = vst [vmem:[#allocation247_spill] sm:$0xff] %v4231_v11  ;;  %v4235_v45 = vld [vmem:[#allocation3 + $0x790] sm:$0xff]  ;;  %v4237_v55 = vld [vmem:[#allocation3 + $0x798] sm:$0xff] }
 0x206   :  { %4942 = vst [vmem:[#allocation248_spill] sm:$0xff] %v4233_v3  ;;  %4943 = vst [vmem:[#allocation249_spill] sm:$0xff] %v4235_v45  ;;  %v4239_v29 = vld [vmem:[#allocation3 + $0x7a0] sm:$0xff]  ;;  %v4241_v17 = vld [vmem:[#allocation3 + $0x7a8] sm:$0xff] }
 0x207   :  { %4944 = vst [vmem:[#allocation250_spill] sm:$0xff] %v4237_v55  ;;  %4945 = vst [vmem:[#allocation251_spill] sm:$0xff] %v4239_v29  ;;  %v4243_v32 = vld [vmem:[#allocation3 + $0x7b0] sm:$0xff]  ;;  %v4245_v6 = vld [vmem:[#allocation3 + $0x7b8] sm:$0xff] }
 0x208   :  { %4946 = vst [vmem:[#allocation252_spill] sm:$0xff] %v4241_v17  ;;  %4947 = vst [vmem:[#allocation253_spill] sm:$0xff] %v4243_v32  ;;  %v4247_v9 = vld [vmem:[#allocation3 + $0x7c0] sm:$0xff]  ;;  %v4249_v28 = vld [vmem:[#allocation3 + $0x7c8] sm:$0xff] }
 0x209   :  { %4948 = vst [vmem:[#allocation254_spill] sm:$0xff] %v4245_v6  ;;  %4949 = vst [vmem:[#allocation255_spill] sm:$0xff] %v4247_v9  ;;  %v4251_v39 = vld [vmem:[#allocation3 + $0x7d0] sm:$0xff]  ;;  %v4253_v11 = vld [vmem:[#allocation3 + $0x7d8] sm:$0xff] }
 0x20a   :  { %4950 = vst [vmem:[#allocation256_spill] sm:$0xff] %v4249_v28  ;;  %4951 = vst [vmem:[#allocation257_spill] sm:$0xff] %v4251_v39  ;;  %v4255_v3 = vld [vmem:[#allocation3 + $0x7e0] sm:$0xff]  ;;  %v4257_v45 = vld [vmem:[#allocation3 + $0x7e8] sm:$0xff] }
 0x20b   :  { %4952 = vst [vmem:[#allocation258_spill] sm:$0xff] %v4253_v11  ;;  %4953 = vst [vmem:[#allocation259_spill] sm:$0xff] %v4255_v3  ;;  %v4259_v55 = vld [vmem:[#allocation3 + $0x7f0] sm:$0xff]  ;;  %v4261_v29 = vld [vmem:[#allocation3 + $0x7f8] sm:$0xff] }
 0x20c   :  { %4954 = vst [vmem:[#allocation260_spill] sm:$0xff] %v4257_v45  ;;  %4955 = vst [vmem:[#allocation261_spill] sm:$0xff] %v4259_v55 }
 0x20d   :  { %4956 = vst [vmem:[#allocation262_spill] sm:$0xff] %v4261_v29 }
 0x20e   :  { %3469 = dma.done.wait [#allocation5 + $0x2], 32768 }
 0x20f   :  { %3470 = vsyncadd [#allocation5 + $0x2], 4294934528  ;;  %1319 = vmatprep.mubr.bf16.mxu0 %v3723_v61  ;;  %1360 = vmatprep.mubr.bf16.mxu1 %v3725_v62  ;;  %v1032_v32 = vld [vmem:[#allocation3 + $0x808] sm:$0xff]  ;;  %v1031_v17 = vld [vmem:[#allocation3 + $0x800] sm:$0xff] }
 0x210   :  { %v1160_v6 = vld [vmem:[#allocation3 + $0xc08] sm:$0xff]  ;;  %1287 = vmatprep.subr.bf16.mxu0 %v1032_v32  ;;  %v1159_v39 = vld [vmem:[#allocation3 + $0xc00] sm:$0xff] }
 0x211   :  { %1328 = vmatprep.subr.bf16.mxu1 %v1160_v6  ;;  %v1040_v11 = vld [vmem:[#allocation3 + $0x848] sm:$0xff]  ;;  %1288 = vmatpush1.bf16.msra.mxu0 %v1031_v17  ;;  %v1039_v55 = vld [vmem:[#allocation3 + $0x840] sm:$0xff] }
 0x212   :  { %v1168_v3 = vld [vmem:[#allocation3 + $0xc48] sm:$0xff]  ;;  %1329 = vmatpush1.bf16.msra.mxu1 %v1159_v39  ;;  %1289 = vmatprep.subr.bf16.mxu0 %v1040_v11  ;;  %v1167_v29 = vld [vmem:[#allocation3 + $0xc40] sm:$0xff] }
 0x213   :  { %1330 = vmatprep.subr.bf16.mxu1 %v1168_v3  ;;  %v1048_v45 = vld [vmem:[#allocation3 + $0x888] sm:$0xff]  ;;  %v1047_v28 = vld [vmem:[#allocation3 + $0x880] sm:$0xff] }
 0x214   :  { %v1176_v9 = vld [vmem:[#allocation3 + $0xc88] sm:$0xff]  ;;  %v1175_v8 = vld [vmem:[#allocation3 + $0xc80] sm:$0xff] }
 0x215   :  { %1290 = vmatpush1.bf16.msra.mxu0 %v1039_v55  ;;  %v1056_v5 = vld [vmem:[#allocation3 + $0x8c8] sm:$0xff]  ;;  %v1055_v6 = vld [vmem:[#allocation3 + $0x8c0] sm:$0xff] }
 0x216   :  { %1331 = vmatpush1.bf16.msra.mxu1 %v1167_v29  ;;  %1291 = vmatprep.subr.bf16.mxu0 %v1048_v45  ;;  %v1184_v32 = vld [vmem:[#allocation3 + $0xcc8] sm:$0xff]  ;;  %v1183_v17 = vld [vmem:[#allocation3 + $0xcc0] sm:$0xff] }
 0x217   :  { %1332 = vmatprep.subr.bf16.mxu1 %v1176_v9  ;;  %v1064_v11 = vld [vmem:[#allocation3 + $0x908] sm:$0xff]  ;;  %v1063_v39 = vld [vmem:[#allocation3 + $0x900] sm:$0xff] }
 0x218   :  { %v1192_v3 = vld [vmem:[#allocation3 + $0xd08] sm:$0xff]  ;;  %v1191_v29 = vld [vmem:[#allocation3 + $0xd00] sm:$0xff] }
 0x219   :  { %1292 = vmatpush1.bf16.msra.mxu0 %v1047_v28  ;;  %v1072_v45 = vld [vmem:[#allocation3 + $0x948] sm:$0xff]  ;;  %v1071_v28 = vld [vmem:[#allocation3 + $0x940] sm:$0xff] }
 0x21a   :  { %1333 = vmatpush1.bf16.msra.mxu1 %v1175_v8  ;;  %1293 = vmatprep.subr.bf16.mxu0 %v1056_v5  ;;  %v1200_v9 = vld [vmem:[#allocation3 + $0xd48] sm:$0xff]  ;;  %v1199_v8 = vld [vmem:[#allocation3 + $0xd40] sm:$0xff] }
 0x21b   :  { %1334 = vmatprep.subr.bf16.mxu1 %v1184_v32  ;;  %v1080_v5 = vld [vmem:[#allocation3 + $0x988] sm:$0xff]  ;;  %v1079_v32 = vld [vmem:[#allocation3 + $0x980] sm:$0xff] }
 0x21c   :  { %v1208_v55 = vld [vmem:[#allocation3 + $0xd88] sm:$0xff] }
 0x21d   :  { %1294 = vmatpush1.bf16.msra.mxu0 %v1055_v6  ;;  %v1207_v6 = vld [vmem:[#allocation3 + $0xd80] sm:$0xff] }
 0x21e   :  { %1335 = vmatpush1.bf16.msra.mxu1 %v1183_v17  ;;  %1295 = vmatprep.subr.bf16.mxu0 %v1064_v11  ;;  %v1088_v17 = vld [vmem:[#allocation3 + $0x9c8] sm:$0xff] }
 0x21f   :  { %1336 = vmatprep.subr.bf16.mxu1 %v1192_v3  ;;  %v1216_v11 = vld [vmem:[#allocation3 + $0xdc8] sm:$0xff]  ;;  %v1087_v3 = vld [vmem:[#allocation3 + $0x9c0] sm:$0xff] }
 0x221   :  { %1296 = vmatpush1.bf16.msra.mxu0 %v1063_v39  ;;  %v1215_v39 = vld [vmem:[#allocation3 + $0xdc0] sm:$0xff] }
 0x222   :  { %1337 = vmatpush1.bf16.msra.mxu1 %v1191_v29  ;;  %1297 = vmatprep.subr.bf16.mxu0 %v1072_v45  ;;  %v1096_v29 = vld [vmem:[#allocation3 + $0xa08] sm:$0xff] }
 0x223   :  { %1338 = vmatprep.subr.bf16.mxu1 %v1200_v9  ;;  %v1224_v45 = vld [vmem:[#allocation3 + $0xe08] sm:$0xff]  ;;  %v1095_v9 = vld [vmem:[#allocation3 + $0xa00] sm:$0xff] }
 0x225   :  { %1298 = vmatpush1.bf16.msra.mxu0 %v1071_v28  ;;  %v1223_v28 = vld [vmem:[#allocation3 + $0xe00] sm:$0xff] }
 0x226   :  { %1339 = vmatpush1.bf16.msra.mxu1 %v1199_v8  ;;  %1299 = vmatprep.subr.bf16.mxu0 %v1080_v5  ;;  %v1104_v8 = vld [vmem:[#allocation3 + $0xa48] sm:$0xff] }
 0x227   :  { %1340 = vmatprep.subr.bf16.mxu1 %v1208_v55  ;;  %v1232_v5 = vld [vmem:[#allocation3 + $0xe48] sm:$0xff]  ;;  %v1103_v55 = vld [vmem:[#allocation3 + $0xa40] sm:$0xff] }
 0x229   :  { %1300 = vmatpush1.bf16.msra.mxu0 %v1079_v32  ;;  %v1231_v32 = vld [vmem:[#allocation3 + $0xe40] sm:$0xff] }
 0x22a   :  { %1341 = vmatpush1.bf16.msra.mxu1 %v1207_v6  ;;  %1301 = vmatprep.subr.bf16.mxu0 %v1088_v17  ;;  %v1112_v6 = vld [vmem:[#allocation3 + $0xa88] sm:$0xff] }
 0x22b   :  { %1342 = vmatprep.subr.bf16.mxu1 %v1216_v11  ;;  %v1240_v17 = vld [vmem:[#allocation3 + $0xe88] sm:$0xff]  ;;  %v1111_v11 = vld [vmem:[#allocation3 + $0xa80] sm:$0xff] }
 0x22d   :  { %1302 = vmatpush1.bf16.msra.mxu0 %v1087_v3  ;;  %v1239_v3 = vld [vmem:[#allocation3 + $0xe80] sm:$0xff] }
 0x22e   :  { %1343 = vmatpush1.bf16.msra.mxu1 %v1215_v39  ;;  %1303 = vmatprep.subr.bf16.mxu0 %v1096_v29  ;;  %v1120_v39 = vld [vmem:[#allocation3 + $0xac8] sm:$0xff] }
 0x22f   :  { %1344 = vmatprep.subr.bf16.mxu1 %v1224_v45  ;;  %v1248_v29 = vld [vmem:[#allocation3 + $0xec8] sm:$0xff]  ;;  %v1119_v45 = vld [vmem:[#allocation3 + $0xac0] sm:$0xff] }
 0x231   :  { %1304 = vmatpush1.bf16.msra.mxu0 %v1095_v9  ;;  %v1247_v9 = vld [vmem:[#allocation3 + $0xec0] sm:$0xff] }
 0x232   :  { %1345 = vmatpush1.bf16.msra.mxu1 %v1223_v28  ;;  %1305 = vmatprep.subr.bf16.mxu0 %v1104_v8  ;;  %v1128_v28 = vld [vmem:[#allocation3 + $0xb08] sm:$0xff] }
 0x233   :  { %1346 = vmatprep.subr.bf16.mxu1 %v1232_v5  ;;  %v1256_v8 = vld [vmem:[#allocation3 + $0xf08] sm:$0xff]  ;;  %v1127_v5 = vld [vmem:[#allocation3 + $0xb00] sm:$0xff] }
 0x235   :  { %1306 = vmatpush1.bf16.msra.mxu0 %v1103_v55  ;;  %v1255_v55 = vld [vmem:[#allocation3 + $0xf00] sm:$0xff] }
 0x236   :  { %1347 = vmatpush1.bf16.msra.mxu1 %v1231_v32  ;;  %1307 = vmatprep.subr.bf16.mxu0 %v1112_v6  ;;  %v1136_v32 = vld [vmem:[#allocation3 + $0xb48] sm:$0xff] }
 0x237   :  { %1348 = vmatprep.subr.bf16.mxu1 %v1240_v17  ;;  %v1264_v6 = vld [vmem:[#allocation3 + $0xf48] sm:$0xff]  ;;  %v1135_v17 = vld [vmem:[#allocation3 + $0xb40] sm:$0xff] }
 0x239   :  { %1308 = vmatpush1.bf16.msra.mxu0 %v1111_v11  ;;  %v1263_v11 = vld [vmem:[#allocation3 + $0xf40] sm:$0xff] }
 0x23a   :  { %1349 = vmatpush1.bf16.msra.mxu1 %v1239_v3  ;;  %1309 = vmatprep.subr.bf16.mxu0 %v1120_v39  ;;  %v1144_v3 = vld [vmem:[#allocation3 + $0xb88] sm:$0xff] }
 0x23b   :  { %1350 = vmatprep.subr.bf16.mxu1 %v1248_v29  ;;  %v1272_v39 = vld [vmem:[#allocation3 + $0xf88] sm:$0xff]  ;;  %v1143_v29 = vld [vmem:[#allocation3 + $0xb80] sm:$0xff] }
 0x23d   :  { %1310 = vmatpush1.bf16.msra.mxu0 %v1119_v45  ;;  %v1271_v45 = vld [vmem:[#allocation3 + $0xf80] sm:$0xff] }
 0x23e   :  { %1351 = vmatpush1.bf16.msra.mxu1 %v1247_v9  ;;  %1311 = vmatprep.subr.bf16.mxu0 %v1128_v28  ;;  %v1152_v9 = vld [vmem:[#allocation3 + $0xbc8] sm:$0xff] }
 0x23f   :  { %1352 = vmatprep.subr.bf16.mxu1 %v1256_v8  ;;  %v1280_v28 = vld [vmem:[#allocation3 + $0xfc8] sm:$0xff]  ;;  %v1151_v8 = vld [vmem:[#allocation3 + $0xbc0] sm:$0xff] }
 0x241   :  { %1312 = vmatpush1.bf16.msra.mxu0 %v1127_v5  ;;  %v1279_v5 = vld [vmem:[#allocation3 + $0xfc0] sm:$0xff] }
 0x242   :  { %1353 = vmatpush1.bf16.msra.mxu1 %v1255_v55  ;;  %1313 = vmatprep.subr.bf16.mxu0 %v1136_v32  ;;  %v1034_v55 = vld [vmem:[#allocation3 + $0x818] sm:$0xff] }
 0x243   :  { %1354 = vmatprep.subr.bf16.mxu1 %v1264_v6  ;;  %v1162_v32 = vld [vmem:[#allocation3 + $0xc18] sm:$0xff]  ;;  %v1033_v6 = vld [vmem:[#allocation3 + $0x810] sm:$0xff] }
 0x245   :  { %1314 = vmatpush1.bf16.msra.mxu0 %v1135_v17  ;;  %v1161_v17 = vld [vmem:[#allocation3 + $0xc10] sm:$0xff] }
 0x246   :  { %1355 = vmatpush1.bf16.msra.mxu1 %v1263_v11  ;;  %1315 = vmatprep.subr.bf16.mxu0 %v1144_v3  ;;  %v1042_v11 = vld [vmem:[#allocation3 + $0x858] sm:$0xff] }
 0x247   :  { %1356 = vmatprep.subr.bf16.mxu1 %v1272_v39  ;;  %v1170_v3 = vld [vmem:[#allocation3 + $0xc58] sm:$0xff]  ;;  %v1041_v39 = vld [vmem:[#allocation3 + $0x850] sm:$0xff] }
 0x249   :  { %1316 = vmatpush1.bf16.msra.mxu0 %v1143_v29  ;;  %v1169_v29 = vld [vmem:[#allocation3 + $0xc50] sm:$0xff] }
 0x24a   :  { %1357 = vmatpush1.bf16.msra.mxu1 %v1271_v45  ;;  %1317 = vmatprep.subr.bf16.mxu0 %v1152_v9  ;;  %v1050_v45 = vld [vmem:[#allocation3 + $0x898] sm:$0xff] }
 0x24b   :  { %1358 = vmatprep.subr.bf16.mxu1 %v1280_v28  ;;  %v1178_v9 = vld [vmem:[#allocation3 + $0xc98] sm:$0xff]  ;;  %v1049_v28 = vld [vmem:[#allocation3 + $0x890] sm:$0xff] }
 0x24d   :  { %1318 = vmatpush1.bf16.msra.mxu0 %v1151_v8  ;;  %v1177_v8 = vld [vmem:[#allocation3 + $0xc90] sm:$0xff] }
 0x24e   :  { %1359 = vmatpush1.bf16.msra.mxu1 %v1279_v5  ;;  %1369 = vmatprep.subr.bf16.mxu0 %v1034_v55  ;;  %v1058_v5 = vld [vmem:[#allocation3 + $0x8d8] sm:$0xff] }
 0x24f   :  { %1410 = vmatprep.subr.bf16.mxu1 %v1162_v32  ;;  %v1186_v55 = vld [vmem:[#allocation3 + $0xcd8] sm:$0xff]  ;;  %v1057_v32 = vld [vmem:[#allocation3 + $0x8d0] sm:$0xff] }
 0x250   :  { %1320 = vmatmul.mubr.bf16.vlgmr.msra.gmra.mrb[16].mxu0 %v3719_v59 }
 0x251   :  { %1361 = vmatmul.mubr.bf16.vlgmr.msra.gmra.mrb[16].mxu1 %v3721_v60  ;;  %1370 = vmatpush1.bf16.msra.mxu0 %v1033_v6  ;;  %v1185_v6 = vld [vmem:[#allocation3 + $0xcd0] sm:$0xff] }
 0x252   :  { %1411 = vmatpush1.bf16.msra.mxu1 %v1161_v17  ;;  %1371 = vmatprep.subr.bf16.mxu0 %v1042_v11  ;;  %v1066_v17 = vld [vmem:[#allocation3 + $0x918] sm:$0xff] }
 0x253   :  { %1412 = vmatprep.subr.bf16.mxu1 %v1170_v3  ;;  %1401 = vmatprep.mubr.bf16.mxu0 %v3723_v61  ;;  %v1194_v11 = vld [vmem:[#allocation3 + $0xd18] sm:$0xff]  ;;  %v1065_v3 = vld [vmem:[#allocation3 + $0x910] sm:$0xff] }
 0x254   :  { %1442 = vmatprep.mubr.bf16.mxu1 %v3725_v62 }
 0x255   :  { %1372 = vmatpush1.bf16.msra.mxu0 %v1041_v39  ;;  %v1193_v39 = vld [vmem:[#allocation3 + $0xd10] sm:$0xff] }
 0x256   :  { %1413 = vmatpush1.bf16.msra.mxu1 %v1169_v29  ;;  %1373 = vmatprep.subr.bf16.mxu0 %v1050_v45  ;;  %v1074_v29 = vld [vmem:[#allocation3 + $0x958] sm:$0xff] }
 0x257   :  { %1414 = vmatprep.subr.bf16.mxu1 %v1178_v9  ;;  %v1202_v45 = vld [vmem:[#allocation3 + $0xd58] sm:$0xff]  ;;  %v1073_v9 = vld [vmem:[#allocation3 + $0x950] sm:$0xff] }
 0x259   :  { %1374 = vmatpush1.bf16.msra.mxu0 %v1049_v28  ;;  %v1201_v28 = vld [vmem:[#allocation3 + $0xd50] sm:$0xff] }
 0x25a   :  { %1415 = vmatpush1.bf16.msra.mxu1 %v1177_v8  ;;  %1375 = vmatprep.subr.bf16.mxu0 %v1058_v5  ;;  %v1082_v8 = vld [vmem:[#allocation3 + $0x998] sm:$0xff] }
 0x25b   :  { %1416 = vmatprep.subr.bf16.mxu1 %v1186_v55  ;;  %v1210_v5 = vld [vmem:[#allocation3 + $0xd98] sm:$0xff]  ;;  %v1081_v55 = vld [vmem:[#allocation3 + $0x990] sm:$0xff] }
 0x25d   :  { %1376 = vmatpush1.bf16.msra.mxu0 %v1057_v32  ;;  %v1209_v32 = vld [vmem:[#allocation3 + $0xd90] sm:$0xff] }
 0x25e   :  { %1417 = vmatpush1.bf16.msra.mxu1 %v1185_v6  ;;  %1377 = vmatprep.subr.bf16.mxu0 %v1066_v17  ;;  %v1090_v6 = vld [vmem:[#allocation3 + $0x9d8] sm:$0xff] }
 0x25f   :  { %1418 = vmatprep.subr.bf16.mxu1 %v1194_v11  ;;  %v1218_v17 = vld [vmem:[#allocation3 + $0xdd8] sm:$0xff]  ;;  %v1089_v11 = vld [vmem:[#allocation3 + $0x9d0] sm:$0xff] }
 0x261   :  { %1378 = vmatpush1.bf16.msra.mxu0 %v1065_v3  ;;  %v1217_v3 = vld [vmem:[#allocation3 + $0xdd0] sm:$0xff] }
 0x262   :  { %1419 = vmatpush1.bf16.msra.mxu1 %v1193_v39  ;;  %1379 = vmatprep.subr.bf16.mxu0 %v1074_v29  ;;  %v1098_v39 = vld [vmem:[#allocation3 + $0xa18] sm:$0xff] }
 0x263   :  { %1420 = vmatprep.subr.bf16.mxu1 %v1202_v45  ;;  %v1226_v29 = vld [vmem:[#allocation3 + $0xe18] sm:$0xff]  ;;  %v1097_v45 = vld [vmem:[#allocation3 + $0xa10] sm:$0xff] }
 0x265   :  { %1380 = vmatpush1.bf16.msra.mxu0 %v1073_v9  ;;  %v1225_v9 = vld [vmem:[#allocation3 + $0xe10] sm:$0xff] }
 0x266   :  { %1421 = vmatpush1.bf16.msra.mxu1 %v1201_v28  ;;  %1381 = vmatprep.subr.bf16.mxu0 %v1082_v8  ;;  %v1106_v28 = vld [vmem:[#allocation3 + $0xa58] sm:$0xff] }
 0x267   :  { %1422 = vmatprep.subr.bf16.mxu1 %v1210_v5  ;;  %v1234_v8 = vld [vmem:[#allocation3 + $0xe58] sm:$0xff]  ;;  %v1105_v5 = vld [vmem:[#allocation3 + $0xa50] sm:$0xff] }
 0x269   :  { %1382 = vmatpush1.bf16.msra.mxu0 %v1081_v55  ;;  %v1233_v55 = vld [vmem:[#allocation3 + $0xe50] sm:$0xff] }
 0x26a   :  { %1423 = vmatpush1.bf16.msra.mxu1 %v1209_v32  ;;  %1383 = vmatprep.subr.bf16.mxu0 %v1090_v6  ;;  %v1114_v32 = vld [vmem:[#allocation3 + $0xa98] sm:$0xff] }
 0x26b   :  { %1424 = vmatprep.subr.bf16.mxu1 %v1218_v17  ;;  %v1242_v6 = vld [vmem:[#allocation3 + $0xe98] sm:$0xff]  ;;  %v1113_v17 = vld [vmem:[#allocation3 + $0xa90] sm:$0xff] }
 0x26d   :  { %1384 = vmatpush1.bf16.msra.mxu0 %v1089_v11  ;;  %v1241_v11 = vld [vmem:[#allocation3 + $0xe90] sm:$0xff] }
 0x26e   :  { %1425 = vmatpush1.bf16.msra.mxu1 %v1217_v3  ;;  %1385 = vmatprep.subr.bf16.mxu0 %v1098_v39  ;;  %v1122_v3 = vld [vmem:[#allocation3 + $0xad8] sm:$0xff] }
 0x26f   :  { %1426 = vmatprep.subr.bf16.mxu1 %v1226_v29  ;;  %v1250_v39 = vld [vmem:[#allocation3 + $0xed8] sm:$0xff]  ;;  %v1121_v29 = vld [vmem:[#allocation3 + $0xad0] sm:$0xff] }
 0x271   :  { %1386 = vmatpush1.bf16.msra.mxu0 %v1097_v45  ;;  %v1249_v45 = vld [vmem:[#allocation3 + $0xed0] sm:$0xff] }
 0x272   :  { %1427 = vmatpush1.bf16.msra.mxu1 %v1225_v9  ;;  %1387 = vmatprep.subr.bf16.mxu0 %v1106_v28  ;;  %v1130_v9 = vld [vmem:[#allocation3 + $0xb18] sm:$0xff] }
 0x273   :  { %1428 = vmatprep.subr.bf16.mxu1 %v1234_v8  ;;  %v1258_v28 = vld [vmem:[#allocation3 + $0xf18] sm:$0xff]  ;;  %v1129_v8 = vld [vmem:[#allocation3 + $0xb10] sm:$0xff] }
 0x275   :  { %1388 = vmatpush1.bf16.msra.mxu0 %v1105_v5  ;;  %v1257_v5 = vld [vmem:[#allocation3 + $0xf10] sm:$0xff] }
 0x276   :  { %1429 = vmatpush1.bf16.msra.mxu1 %v1233_v55  ;;  %1389 = vmatprep.subr.bf16.mxu0 %v1114_v32  ;;  %v1138_v55 = vld [vmem:[#allocation3 + $0xb58] sm:$0xff] }
 0x277   :  { %1430 = vmatprep.subr.bf16.mxu1 %v1242_v6  ;;  %v1266_v32 = vld [vmem:[#allocation3 + $0xf58] sm:$0xff]  ;;  %v1137_v6 = vld [vmem:[#allocation3 + $0xb50] sm:$0xff] }
 0x279   :  { %1390 = vmatpush1.bf16.msra.mxu0 %v1113_v17  ;;  %v1265_v17 = vld [vmem:[#allocation3 + $0xf50] sm:$0xff] }
 0x27a   :  { %1431 = vmatpush1.bf16.msra.mxu1 %v1241_v11  ;;  %1391 = vmatprep.subr.bf16.mxu0 %v1122_v3  ;;  %v1146_v11 = vld [vmem:[#allocation3 + $0xb98] sm:$0xff] }
 0x27b   :  { %1432 = vmatprep.subr.bf16.mxu1 %v1250_v39  ;;  %v1274_v3 = vld [vmem:[#allocation3 + $0xf98] sm:$0xff]  ;;  %v1145_v39 = vld [vmem:[#allocation3 + $0xb90] sm:$0xff] }
 0x27d   :  { %1392 = vmatpush1.bf16.msra.mxu0 %v1121_v29  ;;  %v1273_v29 = vld [vmem:[#allocation3 + $0xf90] sm:$0xff] }
 0x27e   :  { %1433 = vmatpush1.bf16.msra.mxu1 %v1249_v45  ;;  %1393 = vmatprep.subr.bf16.mxu0 %v1130_v9  ;;  %v1154_v45 = vld [vmem:[#allocation3 + $0xbd8] sm:$0xff] }
 0x27f   :  { %1434 = vmatprep.subr.bf16.mxu1 %v1258_v28  ;;  %v1282_v9 = vld [vmem:[#allocation3 + $0xfd8] sm:$0xff]  ;;  %v1153_v28 = vld [vmem:[#allocation3 + $0xbd0] sm:$0xff] }
 0x281   :  { %1394 = vmatpush1.bf16.msra.mxu0 %v1129_v8  ;;  %v1281_v8 = vld [vmem:[#allocation3 + $0xfd0] sm:$0xff] }
 0x282   :  { %1435 = vmatpush1.bf16.msra.mxu1 %v1257_v5  ;;  %1395 = vmatprep.subr.bf16.mxu0 %v1138_v55  ;;  %v1036_v5 = vld [vmem:[#allocation3 + $0x828] sm:$0xff] }
 0x283   :  { %1436 = vmatprep.subr.bf16.mxu1 %v1266_v32  ;;  %v1164_v55 = vld [vmem:[#allocation3 + $0xc28] sm:$0xff]  ;;  %v1035_v32 = vld [vmem:[#allocation3 + $0x820] sm:$0xff] }
 0x285   :  { %1396 = vmatpush1.bf16.msra.mxu0 %v1137_v6  ;;  %v1163_v6 = vld [vmem:[#allocation3 + $0xc20] sm:$0xff] }
 0x286   :  { %1437 = vmatpush1.bf16.msra.mxu1 %v1265_v17  ;;  %1397 = vmatprep.subr.bf16.mxu0 %v1146_v11  ;;  %v1044_v17 = vld [vmem:[#allocation3 + $0x868] sm:$0xff] }
 0x287   :  { %1438 = vmatprep.subr.bf16.mxu1 %v1274_v3  ;;  %v1172_v11 = vld [vmem:[#allocation3 + $0xc68] sm:$0xff]  ;;  %v1043_v3 = vld [vmem:[#allocation3 + $0x860] sm:$0xff] }
 0x289   :  { %1398 = vmatpush1.bf16.msra.mxu0 %v1145_v39  ;;  %v1171_v39 = vld [vmem:[#allocation3 + $0xc60] sm:$0xff] }
 0x28a   :  { %1439 = vmatpush1.bf16.msra.mxu1 %v1273_v29  ;;  %1399 = vmatprep.subr.bf16.mxu0 %v1154_v45  ;;  %v1052_v29 = vld [vmem:[#allocation3 + $0x8a8] sm:$0xff] }
 0x28b   :  { %1440 = vmatprep.subr.bf16.mxu1 %v1282_v9  ;;  %v1180_v45 = vld [vmem:[#allocation3 + $0xca8] sm:$0xff]  ;;  %v1051_v9 = vld [vmem:[#allocation3 + $0x8a0] sm:$0xff] }
 0x28d   :  { %1400 = vmatpush1.bf16.msra.mxu0 %v1153_v28  ;;  %v1179_v28 = vld [vmem:[#allocation3 + $0xca0] sm:$0xff] }
 0x28e   :  { %1441 = vmatpush1.bf16.msra.mxu1 %v1281_v8  ;;  %1451 = vmatprep.subr.bf16.mxu0 %v1036_v5  ;;  %v1060_v8 = vld [vmem:[#allocation3 + $0x8e8] sm:$0xff] }
 0x28f   :  { %1492 = vmatprep.subr.bf16.mxu1 %v1164_v55  ;;  %v1188_v5 = vld [vmem:[#allocation3 + $0xce8] sm:$0xff]  ;;  %v1059_v55 = vld [vmem:[#allocation3 + $0x8e0] sm:$0xff] }
 0x290   :  { %1402 = vmatmul.mubr.bf16.vlgmr.msra.gmra.mrb[20].mxu0 %v3719_v59 }
 0x291   :  { %1443 = vmatmul.mubr.bf16.vlgmr.msra.gmra.mrb[20].mxu1 %v3721_v60  ;;  %1452 = vmatpush1.bf16.msra.mxu0 %v1035_v32  ;;  %v1187_v32 = vld [vmem:[#allocation3 + $0xce0] sm:$0xff] }
 0x292   :  { %1493 = vmatpush1.bf16.msra.mxu1 %v1163_v6  ;;  %1453 = vmatprep.subr.bf16.mxu0 %v1044_v17  ;;  %v1068_v6 = vld [vmem:[#allocation3 + $0x928] sm:$0xff] }
 0x293   :  { %1494 = vmatprep.subr.bf16.mxu1 %v1172_v11  ;;  %1483 = vmatprep.mubr.bf16.mxu0 %v3723_v61  ;;  %v1196_v17 = vld [vmem:[#allocation3 + $0xd28] sm:$0xff]  ;;  %v1067_v11 = vld [vmem:[#allocation3 + $0x920] sm:$0xff] }
 0x294   :  { %1524 = vmatprep.mubr.bf16.mxu1 %v3725_v62 }
 0x295   :  { %1454 = vmatpush1.bf16.msra.mxu0 %v1043_v3  ;;  %v1195_v3 = vld [vmem:[#allocation3 + $0xd20] sm:$0xff] }
 0x296   :  { %1495 = vmatpush1.bf16.msra.mxu1 %v1171_v39  ;;  %1455 = vmatprep.subr.bf16.mxu0 %v1052_v29  ;;  %v1076_v39 = vld [vmem:[#allocation3 + $0x968] sm:$0xff] }
 0x297   :  { %1496 = vmatprep.subr.bf16.mxu1 %v1180_v45  ;;  %v1204_v29 = vld [vmem:[#allocation3 + $0xd68] sm:$0xff]  ;;  %v1075_v45 = vld [vmem:[#allocation3 + $0x960] sm:$0xff] }
 0x299   :  { %1456 = vmatpush1.bf16.msra.mxu0 %v1051_v9  ;;  %v1203_v9 = vld [vmem:[#allocation3 + $0xd60] sm:$0xff] }
 0x29a   :  { %1497 = vmatpush1.bf16.msra.mxu1 %v1179_v28  ;;  %1457 = vmatprep.subr.bf16.mxu0 %v1060_v8  ;;  %v1084_v28 = vld [vmem:[#allocation3 + $0x9a8] sm:$0xff] }
 0x29b   :  { %1498 = vmatprep.subr.bf16.mxu1 %v1188_v5  ;;  %v1212_v8 = vld [vmem:[#allocation3 + $0xda8] sm:$0xff]  ;;  %v1083_v5 = vld [vmem:[#allocation3 + $0x9a0] sm:$0xff] }
 0x29d   :  { %1458 = vmatpush1.bf16.msra.mxu0 %v1059_v55  ;;  %v1211_v55 = vld [vmem:[#allocation3 + $0xda0] sm:$0xff] }
 0x29e   :  { %1499 = vmatpush1.bf16.msra.mxu1 %v1187_v32  ;;  %1459 = vmatprep.subr.bf16.mxu0 %v1068_v6  ;;  %v1092_v32 = vld [vmem:[#allocation3 + $0x9e8] sm:$0xff] }
 0x29f   :  { %1500 = vmatprep.subr.bf16.mxu1 %v1196_v17  ;;  %v1220_v6 = vld [vmem:[#allocation3 + $0xde8] sm:$0xff]  ;;  %v1091_v17 = vld [vmem:[#allocation3 + $0x9e0] sm:$0xff] }
 0x2a1   :  { %1460 = vmatpush1.bf16.msra.mxu0 %v1067_v11  ;;  %v1219_v11 = vld [vmem:[#allocation3 + $0xde0] sm:$0xff] }
 0x2a2   :  { %1501 = vmatpush1.bf16.msra.mxu1 %v1195_v3  ;;  %1461 = vmatprep.subr.bf16.mxu0 %v1076_v39  ;;  %v1100_v3 = vld [vmem:[#allocation3 + $0xa28] sm:$0xff] }
 0x2a3   :  { %1502 = vmatprep.subr.bf16.mxu1 %v1204_v29  ;;  %v1228_v39 = vld [vmem:[#allocation3 + $0xe28] sm:$0xff]  ;;  %v1099_v29 = vld [vmem:[#allocation3 + $0xa20] sm:$0xff] }
 0x2a5   :  { %1462 = vmatpush1.bf16.msra.mxu0 %v1075_v45  ;;  %v1227_v45 = vld [vmem:[#allocation3 + $0xe20] sm:$0xff] }
 0x2a6   :  { %1503 = vmatpush1.bf16.msra.mxu1 %v1203_v9  ;;  %1463 = vmatprep.subr.bf16.mxu0 %v1084_v28  ;;  %v1108_v9 = vld [vmem:[#allocation3 + $0xa68] sm:$0xff] }
 0x2a7   :  { %1504 = vmatprep.subr.bf16.mxu1 %v1212_v8  ;;  %v1236_v28 = vld [vmem:[#allocation3 + $0xe68] sm:$0xff]  ;;  %v1107_v8 = vld [vmem:[#allocation3 + $0xa60] sm:$0xff] }
 0x2a9   :  { %1464 = vmatpush1.bf16.msra.mxu0 %v1083_v5  ;;  %v1235_v5 = vld [vmem:[#allocation3 + $0xe60] sm:$0xff] }
 0x2aa   :  { %1505 = vmatpush1.bf16.msra.mxu1 %v1211_v55  ;;  %1465 = vmatprep.subr.bf16.mxu0 %v1092_v32  ;;  %v1116_v55 = vld [vmem:[#allocation3 + $0xaa8] sm:$0xff] }
 0x2ab   :  { %1506 = vmatprep.subr.bf16.mxu1 %v1220_v6  ;;  %v1244_v32 = vld [vmem:[#allocation3 + $0xea8] sm:$0xff]  ;;  %v1115_v6 = vld [vmem:[#allocation3 + $0xaa0] sm:$0xff] }
 0x2ad   :  { %1466 = vmatpush1.bf16.msra.mxu0 %v1091_v17  ;;  %v1243_v17 = vld [vmem:[#allocation3 + $0xea0] sm:$0xff] }
 0x2ae   :  { %1507 = vmatpush1.bf16.msra.mxu1 %v1219_v11  ;;  %1467 = vmatprep.subr.bf16.mxu0 %v1100_v3  ;;  %v1124_v11 = vld [vmem:[#allocation3 + $0xae8] sm:$0xff] }
 0x2af   :  { %1508 = vmatprep.subr.bf16.mxu1 %v1228_v39  ;;  %v1252_v3 = vld [vmem:[#allocation3 + $0xee8] sm:$0xff]  ;;  %v1123_v39 = vld [vmem:[#allocation3 + $0xae0] sm:$0xff] }
 0x2b1   :  { %1468 = vmatpush1.bf16.msra.mxu0 %v1099_v29  ;;  %v1251_v29 = vld [vmem:[#allocation3 + $0xee0] sm:$0xff] }
 0x2b2   :  { %1509 = vmatpush1.bf16.msra.mxu1 %v1227_v45  ;;  %1469 = vmatprep.subr.bf16.mxu0 %v1108_v9  ;;  %v1132_v45 = vld [vmem:[#allocation3 + $0xb28] sm:$0xff] }
 0x2b3   :  { %1510 = vmatprep.subr.bf16.mxu1 %v1236_v28  ;;  %v1260_v9 = vld [vmem:[#allocation3 + $0xf28] sm:$0xff]  ;;  %v1131_v28 = vld [vmem:[#allocation3 + $0xb20] sm:$0xff] }
 0x2b5   :  { %1470 = vmatpush1.bf16.msra.mxu0 %v1107_v8  ;;  %v1259_v8 = vld [vmem:[#allocation3 + $0xf20] sm:$0xff] }
 0x2b6   :  { %1511 = vmatpush1.bf16.msra.mxu1 %v1235_v5  ;;  %1471 = vmatprep.subr.bf16.mxu0 %v1116_v55  ;;  %v1140_v5 = vld [vmem:[#allocation3 + $0xb68] sm:$0xff] }
 0x2b7   :  { %1512 = vmatprep.subr.bf16.mxu1 %v1244_v32  ;;  %v1268_v55 = vld [vmem:[#allocation3 + $0xf68] sm:$0xff]  ;;  %v1139_v32 = vld [vmem:[#allocation3 + $0xb60] sm:$0xff] }
 0x2b9   :  { %1472 = vmatpush1.bf16.msra.mxu0 %v1115_v6  ;;  %v1267_v6 = vld [vmem:[#allocation3 + $0xf60] sm:$0xff] }
 0x2ba   :  { %1513 = vmatpush1.bf16.msra.mxu1 %v1243_v17  ;;  %1473 = vmatprep.subr.bf16.mxu0 %v1124_v11  ;;  %v1148_v17 = vld [vmem:[#allocation3 + $0xba8] sm:$0xff] }
 0x2bb   :  { %1514 = vmatprep.subr.bf16.mxu1 %v1252_v3  ;;  %v1276_v11 = vld [vmem:[#allocation3 + $0xfa8] sm:$0xff]  ;;  %v1147_v3 = vld [vmem:[#allocation3 + $0xba0] sm:$0xff] }
 0x2bd   :  { %1474 = vmatpush1.bf16.msra.mxu0 %v1123_v39  ;;  %v1275_v39 = vld [vmem:[#allocation3 + $0xfa0] sm:$0xff] }
 0x2be   :  { %1515 = vmatpush1.bf16.msra.mxu1 %v1251_v29  ;;  %1475 = vmatprep.subr.bf16.mxu0 %v1132_v45  ;;  %v1156_v29 = vld [vmem:[#allocation3 + $0xbe8] sm:$0xff] }
 0x2bf   :  { %1516 = vmatprep.subr.bf16.mxu1 %v1260_v9  ;;  %v1284_v45 = vld [vmem:[#allocation3 + $0xfe8] sm:$0xff]  ;;  %v1155_v9 = vld [vmem:[#allocation3 + $0xbe0] sm:$0xff] }
 0x2c1   :  { %1476 = vmatpush1.bf16.msra.mxu0 %v1131_v28  ;;  %v1283_v28 = vld [vmem:[#allocation3 + $0xfe0] sm:$0xff] }
 0x2c2   :  { %1517 = vmatpush1.bf16.msra.mxu1 %v1259_v8  ;;  %1477 = vmatprep.subr.bf16.mxu0 %v1140_v5  ;;  %v1038_v8 = vld [vmem:[#allocation3 + $0x838] sm:$0xff] }
 0x2c3   :  { %1518 = vmatprep.subr.bf16.mxu1 %v1268_v55  ;;  %v1166_v5 = vld [vmem:[#allocation3 + $0xc38] sm:$0xff]  ;;  %v1037_v55 = vld [vmem:[#allocation3 + $0x830] sm:$0xff] }
 0x2c5   :  { %1478 = vmatpush1.bf16.msra.mxu0 %v1139_v32  ;;  %v1165_v32 = vld [vmem:[#allocation3 + $0xc30] sm:$0xff] }
 0x2c6   :  { %1519 = vmatpush1.bf16.msra.mxu1 %v1267_v6  ;;  %1479 = vmatprep.subr.bf16.mxu0 %v1148_v17  ;;  %v1046_v6 = vld [vmem:[#allocation3 + $0x878] sm:$0xff] }
 0x2c7   :  { %1520 = vmatprep.subr.bf16.mxu1 %v1276_v11  ;;  %v1174_v17 = vld [vmem:[#allocation3 + $0xc78] sm:$0xff]  ;;  %v1045_v11 = vld [vmem:[#allocation3 + $0x870] sm:$0xff] }
 0x2c9   :  { %1480 = vmatpush1.bf16.msra.mxu0 %v1147_v3  ;;  %v1173_v3 = vld [vmem:[#allocation3 + $0xc70] sm:$0xff] }
 0x2ca   :  { %1521 = vmatpush1.bf16.msra.mxu1 %v1275_v39  ;;  %1481 = vmatprep.subr.bf16.mxu0 %v1156_v29  ;;  %v1054_v39 = vld [vmem:[#allocation3 + $0x8b8] sm:$0xff] }
 0x2cb   :  { %1522 = vmatprep.subr.bf16.mxu1 %v1284_v45  ;;  %v1182_v29 = vld [vmem:[#allocation3 + $0xcb8] sm:$0xff]  ;;  %v1053_v45 = vld [vmem:[#allocation3 + $0x8b0] sm:$0xff] }
 0x2cd   :  { %1482 = vmatpush1.bf16.msra.mxu0 %v1155_v9  ;;  %v1181_v9 = vld [vmem:[#allocation3 + $0xcb0] sm:$0xff] }
 0x2ce   :  { %1523 = vmatpush1.bf16.msra.mxu1 %v1283_v28  ;;  %1533 = vmatprep.subr.bf16.mxu0 %v1038_v8  ;;  %v1062_v28 = vld [vmem:[#allocation3 + $0x8f8] sm:$0xff] }
 0x2cf   :  { %1574 = vmatprep.subr.bf16.mxu1 %v1166_v5  ;;  %v1190_v8 = vld [vmem:[#allocation3 + $0xcf8] sm:$0xff]  ;;  %v1061_v5 = vld [vmem:[#allocation3 + $0x8f0] sm:$0xff] }
 0x2d0   :  { %1484 = vmatmul.mubr.bf16.vlgmr.msra.gmra.mrb[24].mxu0 %v3719_v59 }
 0x2d1   :  { %1525 = vmatmul.mubr.bf16.vlgmr.msra.gmra.mrb[24].mxu1 %v3721_v60  ;;  %1534 = vmatpush1.bf16.msra.mxu0 %v1037_v55  ;;  %v1189_v55 = vld [vmem:[#allocation3 + $0xcf0] sm:$0xff] }
 0x2d2   :  { %1575 = vmatpush1.bf16.msra.mxu1 %v1165_v32  ;;  %1535 = vmatprep.subr.bf16.mxu0 %v1046_v6  ;;  %v1070_v32 = vld [vmem:[#allocation3 + $0x938] sm:$0xff] }
 0x2d3   :  { %1576 = vmatprep.subr.bf16.mxu1 %v1174_v17  ;;  %1565 = vmatprep.mubr.bf16.mxu0 %v3723_v61  ;;  %v1198_v6 = vld [vmem:[#allocation3 + $0xd38] sm:$0xff]  ;;  %v1069_v61 = vld [vmem:[#allocation3 + $0x930] sm:$0xff] }
 0x2d4   :  { %1606 = vmatprep.mubr.bf16.mxu1 %v3725_v62  ;;  %v1197_v62 = vld [vmem:[#allocation3 + $0xd30] sm:$0xff]  ;;  %v1078_v17 = vld [vmem:[#allocation3 + $0x978] sm:$0xff] }
 0x2d5   :  { %1536 = vmatpush1.bf16.msra.mxu0 %v1045_v11  ;;  %v1206_v11 = vld [vmem:[#allocation3 + $0xd78] sm:$0xff] }
 0x2d6   :  { %1577 = vmatpush1.bf16.msra.mxu1 %v1173_v3  ;;  %1537 = vmatprep.subr.bf16.mxu0 %v1054_v39  ;;  %v1077_v3 = vld [vmem:[#allocation3 + $0x970] sm:$0xff] }
 0x2d7   :  { %1578 = vmatprep.subr.bf16.mxu1 %v1182_v29  ;;  %v1205_v39 = vld [vmem:[#allocation3 + $0xd70] sm:$0xff]  ;;  %v1086_v29 = vld [vmem:[#allocation3 + $0x9b8] sm:$0xff] }
 0x2d9   :  { %1538 = vmatpush1.bf16.msra.mxu0 %v1053_v45  ;;  %v1214_v45 = vld [vmem:[#allocation3 + $0xdb8] sm:$0xff] }
 0x2da   :  { %1579 = vmatpush1.bf16.msra.mxu1 %v1181_v9  ;;  %1539 = vmatprep.subr.bf16.mxu0 %v1062_v28  ;;  %v1085_v9 = vld [vmem:[#allocation3 + $0x9b0] sm:$0xff] }
 0x2db   :  { %1580 = vmatprep.subr.bf16.mxu1 %v1190_v8  ;;  %v1213_v28 = vld [vmem:[#allocation3 + $0xdb0] sm:$0xff]  ;;  %v1094_v8 = vld [vmem:[#allocation3 + $0x9f8] sm:$0xff] }
 0x2dd   :  { %1540 = vmatpush1.bf16.msra.mxu0 %v1061_v5  ;;  %v1222_v5 = vld [vmem:[#allocation3 + $0xdf8] sm:$0xff] }
 0x2de   :  { %1581 = vmatpush1.bf16.msra.mxu1 %v1189_v55  ;;  %1541 = vmatprep.subr.bf16.mxu0 %v1070_v32  ;;  %v1093_v55 = vld [vmem:[#allocation3 + $0x9f0] sm:$0xff] }
 0x2df   :  { %1582 = vmatprep.subr.bf16.mxu1 %v1198_v6  ;;  %v1221_v32 = vld [vmem:[#allocation3 + $0xdf0] sm:$0xff]  ;;  %v1102_v6 = vld [vmem:[#allocation3 + $0xa38] sm:$0xff] }
 0x2e1   :  { %1542 = vmatpush1.bf16.msra.mxu0 %v1069_v61  ;;  %v1230_v61 = vld [vmem:[#allocation3 + $0xe38] sm:$0xff] }
 0x2e2   :  { %1583 = vmatpush1.bf16.msra.mxu1 %v1197_v62  ;;  %1543 = vmatprep.subr.bf16.mxu0 %v1078_v17  ;;  %v1101_v62 = vld [vmem:[#allocation3 + $0xa30] sm:$0xff] }
 0x2e3   :  { %1584 = vmatprep.subr.bf16.mxu1 %v1206_v11  ;;  %v1229_v17 = vld [vmem:[#allocation3 + $0xe30] sm:$0xff]  ;;  %v1110_v11 = vld [vmem:[#allocation3 + $0xa78] sm:$0xff] }
 0x2e5   :  { %1544 = vmatpush1.bf16.msra.mxu0 %v1077_v3  ;;  %v1238_v3 = vld [vmem:[#allocation3 + $0xe78] sm:$0xff] }
 0x2e6   :  { %1585 = vmatpush1.bf16.msra.mxu1 %v1205_v39  ;;  %1545 = vmatprep.subr.bf16.mxu0 %v1086_v29  ;;  %v1109_v39 = vld [vmem:[#allocation3 + $0xa70] sm:$0xff] }
 0x2e7   :  { %1586 = vmatprep.subr.bf16.mxu1 %v1214_v45  ;;  %v1237_v29 = vld [vmem:[#allocation3 + $0xe70] sm:$0xff]  ;;  %v1118_v45 = vld [vmem:[#allocation3 + $0xab8] sm:$0xff] }
 0x2e9   :  { %1546 = vmatpush1.bf16.msra.mxu0 %v1085_v9  ;;  %v1246_v9 = vld [vmem:[#allocation3 + $0xeb8] sm:$0xff] }
 0x2ea   :  { %1587 = vmatpush1.bf16.msra.mxu1 %v1213_v28  ;;  %1547 = vmatprep.subr.bf16.mxu0 %v1094_v8  ;;  %v1117_v28 = vld [vmem:[#allocation3 + $0xab0] sm:$0xff] }
 0x2eb   :  { %1588 = vmatprep.subr.bf16.mxu1 %v1222_v5  ;;  %v1245_v8 = vld [vmem:[#allocation3 + $0xeb0] sm:$0xff]  ;;  %v1126_v5 = vld [vmem:[#allocation3 + $0xaf8] sm:$0xff] }
 0x2ed   :  { %1548 = vmatpush1.bf16.msra.mxu0 %v1093_v55  ;;  %v1254_v55 = vld [vmem:[#allocation3 + $0xef8] sm:$0xff] }
 0x2ee   :  { %1589 = vmatpush1.bf16.msra.mxu1 %v1221_v32  ;;  %1549 = vmatprep.subr.bf16.mxu0 %v1102_v6  ;;  %v1125_v32 = vld [vmem:[#allocation3 + $0xaf0] sm:$0xff] }
 0x2ef   :  { %1590 = vmatprep.subr.bf16.mxu1 %v1230_v61  ;;  %v1253_v6 = vld [vmem:[#allocation3 + $0xef0] sm:$0xff]  ;;  %v1134_v61 = vld [vmem:[#allocation3 + $0xb38] sm:$0xff] }
 0x2f1   :  { %1550 = vmatpush1.bf16.msra.mxu0 %v1101_v62  ;;  %v1262_v62 = vld [vmem:[#allocation3 + $0xf38] sm:$0xff] }
 0x2f2   :  { %1591 = vmatpush1.bf16.msra.mxu1 %v1229_v17  ;;  %1551 = vmatprep.subr.bf16.mxu0 %v1110_v11  ;;  %v1133_v17 = vld [vmem:[#allocation3 + $0xb30] sm:$0xff] }
 0x2f3   :  { %1592 = vmatprep.subr.bf16.mxu1 %v1238_v3  ;;  %v1261_v11 = vld [vmem:[#allocation3 + $0xf30] sm:$0xff]  ;;  %v1142_v3 = vld [vmem:[#allocation3 + $0xb78] sm:$0xff] }
 0x2f5   :  { %1552 = vmatpush1.bf16.msra.mxu0 %v1109_v39  ;;  %v1270_v39 = vld [vmem:[#allocation3 + $0xf78] sm:$0xff] }
 0x2f6   :  { %1593 = vmatpush1.bf16.msra.mxu1 %v1237_v29  ;;  %1553 = vmatprep.subr.bf16.mxu0 %v1118_v45  ;;  %v1141_v29 = vld [vmem:[#allocation3 + $0xb70] sm:$0xff] }
 0x2f7   :  { %1594 = vmatprep.subr.bf16.mxu1 %v1246_v9  ;;  %v1269_v45 = vld [vmem:[#allocation3 + $0xf70] sm:$0xff]  ;;  %v1150_v9 = vld [vmem:[#allocation3 + $0xbb8] sm:$0xff] }
 0x2f9   :  { %1554 = vmatpush1.bf16.msra.mxu0 %v1117_v28  ;;  %v1278_v28 = vld [vmem:[#allocation3 + $0xfb8] sm:$0xff] }
 0x2fa   :  { %1595 = vmatpush1.bf16.msra.mxu1 %v1245_v8  ;;  %1555 = vmatprep.subr.bf16.mxu0 %v1126_v5  ;;  %v1149_v8 = vld [vmem:[#allocation3 + $0xbb0] sm:$0xff] }
 0x2fb   :  { %1596 = vmatprep.subr.bf16.mxu1 %v1254_v55  ;;  %v1277_v5 = vld [vmem:[#allocation3 + $0xfb0] sm:$0xff]  ;;  %v1158_v55 = vld [vmem:[#allocation3 + $0xbf8] sm:$0xff] }
 0x2fd   :  { %1556 = vmatpush1.bf16.msra.mxu0 %v1125_v32  ;;  %v1286_v32 = vld [vmem:[#allocation3 + $0xff8] sm:$0xff] }
 0x2fe   :  { %1597 = vmatpush1.bf16.msra.mxu1 %v1253_v6  ;;  %1557 = vmatprep.subr.bf16.mxu0 %v1134_v61  ;;  %v1157_v6 = vld [vmem:[#allocation3 + $0xbf0] sm:$0xff] }
 0x2ff   :  { %1598 = vmatprep.subr.bf16.mxu1 %v1262_v62  ;;  %v1285_v61 = vld [vmem:[#allocation3 + $0xff0] sm:$0xff]  ;;  %v4994_v62 = vld [vmem:[#allocation77_spill] sm:$0xff] }
 0x301   :  { %1558 = vmatpush1.bf16.msra.mxu0 %v1133_v17  ;;  %v4995_v17 = vld [vmem:[#allocation182_spill] sm:$0xff] }
 0x302   :  { %1599 = vmatpush1.bf16.msra.mxu1 %v1261_v11  ;;  %1559 = vmatprep.subr.bf16.mxu0 %v1142_v3  ;;  %v4996_v11 = vld [vmem:[#allocation76_spill] sm:$0xff]  ;;  %v4997_v3 = vld [vmem:[#allocation181_spill] sm:$0xff] }
 0x303   :  { %1600 = vmatprep.subr.bf16.mxu1 %v1270_v39  ;;  %v4998_v39 = vld [vmem:[#allocation83_spill] sm:$0xff] }
 0x305   :  { %1560 = vmatpush1.bf16.msra.mxu0 %v1141_v29  ;;  %v4999_v29 = vld [vmem:[#allocation188_spill] sm:$0xff] }
 0x306   :  { %1601 = vmatpush1.bf16.msra.mxu1 %v1269_v45  ;;  %1561 = vmatprep.subr.bf16.mxu0 %v1150_v9 }
 0x307   :  { %1602 = vmatprep.subr.bf16.mxu1 %v1278_v28 }
 0x309   :  { %1562 = vmatpush1.bf16.msra.mxu0 %v1149_v8 }
 0x30a   :  { %1603 = vmatpush1.bf16.msra.mxu1 %v1277_v5  ;;  %1563 = vmatprep.subr.bf16.mxu0 %v1158_v55 }
 0x30b   :  { %1604 = vmatprep.subr.bf16.mxu1 %v1286_v32 }
 0x30d   :  { %1564 = vmatpush1.bf16.msra.mxu0 %v1157_v6 }
 0x30e   :  { %1605 = vmatpush1.bf16.msra.mxu1 %v1285_v61  ;;  %1615 = vmatprep.subr.bf16.mxu0 %v3753_v1  ;;  %v5000_v61 = vld [vmem:[#allocation82_spill] sm:$0xff] }
 0x30f   :  { %1656 = vmatprep.subr.bf16.mxu1 %v4009_v53  ;;  %v4992_v53 = vld [vmem:[#allocation70_spill] sm:$0xff] }
 0x310   :  { %1566 = vmatmul.mubr.bf16.vlgmr.msra.gmra.mrb[28].mxu0 %v3719_v59 }
 0x311   :  { %1607 = vmatmul.mubr.bf16.vlgmr.msra.gmra.mrb[28].mxu1 %v3721_v60  ;;  %1616 = vmatpush1.bf16.msra.mxu0 %v3751_v0 }
 0x312   :  { %1657 = vmatpush1.bf16.msra.mxu1 %v4007_v44  ;;  %1617 = vmatprep.subr.bf16.mxu0 %v3769_v14  ;;  %v4984_v44 = vld [vmem:[#allocation58_spill] sm:$0xff] }
 0x313   :  { %1658 = vmatprep.subr.bf16.mxu1 %v4025_v24  ;;  %1647 = vmatprep.mubr.bf16.mxu0 %v3703_v33 }
 0x314   :  { %1688 = vmatprep.mubr.bf16.mxu1 %v3705_v34 }
 0x315   :  { %1618 = vmatpush1.bf16.msra.mxu0 %v3767_v13 }
 0x316   :  { %1659 = vmatpush1.bf16.msra.mxu1 %v4023_v16  ;;  %1619 = vmatprep.subr.bf16.mxu0 %v3785_v21  ;;  %v4976_v21 = vld [vmem:[#allocation53_spill] sm:$0xff] }
 0x317   :  { %1660 = vmatprep.subr.bf16.mxu1 %v4041_v19 }
 0x319   :  { %1620 = vmatpush1.bf16.msra.mxu0 %v3783_v20  ;;  %v4975_v20 = vld [vmem:[#allocation255_spill] sm:$0xff] }
 0x31a   :  { %1661 = vmatpush1.bf16.msra.mxu1 %v4039_v46  ;;  %1621 = vmatprep.subr.bf16.mxu0 %v3801_v41  ;;  %v4981_v41 = vld [vmem:[#allocation157_spill] sm:$0xff]  ;;  %v4985_v46 = vld [vmem:[#allocation163_spill] sm:$0xff] }
 0x31b   :  { %1662 = vmatprep.subr.bf16.mxu1 %v4057_v50  ;;  %v4989_v50 = vld [vmem:[#allocation169_spill] sm:$0xff] }
 0x31d   :  { %1622 = vmatpush1.bf16.msra.mxu0 %v3799_v40  ;;  %v4980_v40 = vld [vmem:[#allocation52_spill] sm:$0xff] }
 0x31e   :  { %1663 = vmatpush1.bf16.msra.mxu1 %v4055_v35  ;;  %1623 = vmatprep.subr.bf16.mxu0 %v3817_v49  ;;  %v4988_v49 = vld [vmem:[#allocation64_spill] sm:$0xff] }
 0x31f   :  { %1664 = vmatprep.subr.bf16.mxu1 %v4073_v22  ;;  %v4977_v22 = vld [vmem:[#allocation158_spill] sm:$0xff] }
 0x321   :  { %1624 = vmatpush1.bf16.msra.mxu0 %v3815_v48  ;;  %v4987_v48 = vld [vmem:[#allocation170_spill] sm:$0xff] }
 0x322   :  { %1665 = vmatpush1.bf16.msra.mxu1 %v4071_v43  ;;  %1625 = vmatprep.subr.bf16.mxu0 %v3833_v36  ;;  %v4959_v36 = vld [vmem:[#allocation223_spill] sm:$0xff]  ;;  %v4983_v43 = vld [vmem:[#allocation164_spill] sm:$0xff] }
 0x323   :  { %1666 = vmatprep.subr.bf16.mxu1 %v4089_v51  ;;  %v1321_v59 = vpop.f32.mrb[16].mxu0  ;;  %v4990_v51 = vld [vmem:[#allocation71_spill] sm:$0xff] }
 0x324   :  { %v1362_v60 = vpop.f32.mrb[16].mxu1  ;;  %v1323_v0 = vpop.f32.mrb[17].mxu0 }
 0x325   :  { %v4303_v24 = vadd.f32 %v1362_v60, %v1321_v59  ;;  %v1364_v1 = vpop.f32.mrb[17].mxu1  ;;  %v1325_v35 = vpop.f32.mrb[18].mxu0  ;;  %1626 = vmatpush1.bf16.msra.mxu0 %v3831_v38  ;;  %v4961_v38 = vld [vmem:[#allocation232_spill] sm:$0xff]  ;;  %v5001_v59 = vld [vmem:[#allocation187_spill] sm:$0xff] }
 0x326   :  { %v4305_v13 = vadd.f32 %v1364_v1, %v1323_v0  ;;  %v1366_v14 = vpop.f32.mrb[18].mxu1  ;;  %1667 = vmatpush1.bf16.msra.mxu1 %v4087_v7  ;;  %v1326_v16 = vpop.f32.mrb[19].mxu0  ;;  %1627 = vmatprep.subr.bf16.mxu0 %v3849_v56  ;;  %v4957_v7 = vld [vmem:[#allocation224_spill] sm:$0xff]  ;;  %v4966_v56 = vld [vmem:[#allocation133_spill] sm:$0xff]  ;;  %v5003_v35 = vld [vmem:[#allocation194_spill] sm:$0xff] }
 0x327   :  { %v1367_v19 = vpop.f32.mrb[19].mxu1  ;;  %1668 = vmatprep.subr.bf16.mxu1 %v4105_v23  ;;  %v4978_v23 = vld [vmem:[#allocation38_spill] sm:$0xff]  ;;  %v5002_v1 = vld [vmem:[#allocation89_spill] sm:$0xff]  ;;  %v5004_v14 = vld [vmem:[#allocation88_spill] sm:$0xff] }
 0x328   :  { %v5005_v16 = vld [vmem:[#allocation193_spill] sm:$0xff]  ;;  %v5006_v19 = vld [vmem:[#allocation95_spill] sm:$0xff] }
 0x329   :  { %1628 = vmatpush1.bf16.msra.mxu0 %v3847_v57  ;;  %v4967_v57 = vld [vmem:[#allocation239_spill] sm:$0xff] }
 0x32a   :  { %1669 = vmatpush1.bf16.msra.mxu1 %v4103_v63  ;;  %1629 = vmatprep.subr.bf16.mxu0 %v3865_v10  ;;  %v4958_v10 = vld [vmem:[#allocation118_spill] sm:$0xff]  ;;  %v4969_v63 = vld [vmem:[#allocation248_spill] sm:$0xff] }
 0x32b   :  { %1670 = vmatprep.subr.bf16.mxu1 %v4121_v15  ;;  %v4972_v15 = vld [vmem:[#allocation150_spill] sm:$0xff] }
 0x32d   :  { %1630 = vmatpush1.bf16.msra.mxu0 %v3863_v54  ;;  %v4993_v54 = vld [vmem:[#allocation175_spill] sm:$0xff] }
 0x32e   :  { %1671 = vmatpush1.bf16.msra.mxu1 %v4119_v37  ;;  %1631 = vmatprep.subr.bf16.mxu0 %v3881_v27  ;;  %v4960_v37 = vld [vmem:[#allocation126_spill] sm:$0xff]  ;;  %v4965_v27 = vld [vmem:[#allocation240_spill] sm:$0xff] }
 0x32f   :  { %1672 = vmatprep.subr.bf16.mxu1 %v4137_v2  ;;  %v4973_v2 = vld [vmem:[#allocation256_spill] sm:$0xff] }
 0x331   :  { %1632 = vmatpush1.bf16.msra.mxu0 %v3879_v18  ;;  %v4974_v18 = vld [vmem:[#allocation149_spill] sm:$0xff] }
 0x332   :  { %1673 = vmatpush1.bf16.msra.mxu1 %v4135_v42  ;;  %1633 = vmatprep.subr.bf16.mxu0 %v3897_v30  ;;  %v4979_v30 = vld [vmem:[#allocation39_spill] sm:$0xff] }
 0x333   :  { %1674 = vmatprep.subr.bf16.mxu1 %v4153_v4  ;;  %v4970_v4 = vld [vmem:[#allocation141_spill] sm:$0xff]  ;;  %v4982_v42 = vld [vmem:[#allocation59_spill] sm:$0xff] }
 0x335   :  { %1634 = vmatpush1.bf16.msra.mxu0 %v3895_v47  ;;  %v4986_v47 = vld [vmem:[#allocation65_spill] sm:$0xff] }
 0x336   :  { %1675 = vmatpush1.bf16.msra.mxu1 %v4151_v26  ;;  %1635 = vmatprep.subr.bf16.mxu0 %v3913_v25  ;;  %v4962_v26 = vld [vmem:[#allocation125_spill] sm:$0xff]  ;;  %v4963_v25 = vld [vmem:[#allocation231_spill] sm:$0xff] }
 0x337   :  { %1676 = vmatprep.subr.bf16.mxu1 %v4169_v31  ;;  %v4964_v31 = vld [vmem:[#allocation134_spill] sm:$0xff] }
 0x339   :  { %1636 = vmatpush1.bf16.msra.mxu0 %v3911_v12  ;;  %v4971_v12 = vld [vmem:[#allocation247_spill] sm:$0xff] }
 0x33a   :  { %1677 = vmatpush1.bf16.msra.mxu1 %v4167_v58  ;;  %1637 = vmatprep.subr.bf16.mxu0 %v3929_v52  ;;  %v4968_v58 = vld [vmem:[#allocation142_spill] sm:$0xff]  ;;  %v4991_v52 = vld [vmem:[#allocation176_spill] sm:$0xff] }
 0x33b   :  { %1678 = vmatprep.subr.bf16.mxu1 %v4957_v7  ;;  %v5007_v7 = vld [vmem:[#allocation200_spill] sm:$0xff] }
 0x33d   :  { %1638 = vmatpush1.bf16.msra.mxu0 %v4958_v10  ;;  %v5008_v10 = vld [vmem:[#allocation94_spill] sm:$0xff] }
 0x33e   :  { %1679 = vmatpush1.bf16.msra.mxu1 %v4959_v36  ;;  %1639 = vmatprep.subr.bf16.mxu0 %v4960_v37  ;;  %v5009_v36 = vld [vmem:[#allocation199_spill] sm:$0xff]  ;;  %v5010_v37 = vld [vmem:[#allocation101_spill] sm:$0xff] }
 0x33f   :  { %1680 = vmatprep.subr.bf16.mxu1 %v4961_v38  ;;  %v5011_v38 = vld [vmem:[#allocation206_spill] sm:$0xff] }
 0x341   :  { %1640 = vmatpush1.bf16.msra.mxu0 %v4962_v26  ;;  %v5012_v26 = vld [vmem:[#allocation100_spill] sm:$0xff] }
 0x342   :  { %1681 = vmatpush1.bf16.msra.mxu1 %v4963_v25  ;;  %1641 = vmatprep.subr.bf16.mxu0 %v4964_v31  ;;  %v5013_v25 = vld [vmem:[#allocation205_spill] sm:$0xff]  ;;  %v5014_v31 = vld [vmem:[#allocation107_spill] sm:$0xff] }
 0x343   :  { %1682 = vmatprep.subr.bf16.mxu1 %v4965_v27  ;;  %v5015_v27 = vld [vmem:[#allocation212_spill] sm:$0xff] }
 0x345   :  { %1642 = vmatpush1.bf16.msra.mxu0 %v4966_v56  ;;  %v5016_v56 = vld [vmem:[#allocation106_spill] sm:$0xff] }
 0x346   :  { %1683 = vmatpush1.bf16.msra.mxu1 %v4967_v57  ;;  %1643 = vmatprep.subr.bf16.mxu0 %v4968_v58  ;;  %v5017_v57 = vld [vmem:[#allocation211_spill] sm:$0xff]  ;;  %v5018_v58 = vld [vmem:[#allocation113_spill] sm:$0xff] }
 0x347   :  { %1684 = vmatprep.subr.bf16.mxu1 %v4969_v63  ;;  %v5019_v63 = vld [vmem:[#allocation218_spill] sm:$0xff] }
 0x349   :  { %1644 = vmatpush1.bf16.msra.mxu0 %v4970_v4  ;;  %v5020_v4 = vld [vmem:[#allocation112_spill] sm:$0xff] }
 0x34a   :  { %1685 = vmatpush1.bf16.msra.mxu1 %v4971_v12  ;;  %1645 = vmatprep.subr.bf16.mxu0 %v4972_v15  ;;  %v5021_v12 = vld [vmem:[#allocation217_spill] sm:$0xff]  ;;  %v5022_v15 = vld [vmem:[#allocation120_spill] sm:$0xff] }
 0x34b   :  { %1686 = vmatprep.subr.bf16.mxu1 %v4973_v2  ;;  %v5023_v2 = vld [vmem:[#allocation226_spill] sm:$0xff] }
 0x34d   :  { %1646 = vmatpush1.bf16.msra.mxu0 %v4974_v18  ;;  %v5024_v18 = vld [vmem:[#allocation119_spill] sm:$0xff] }
 0x34e   :  { %1687 = vmatpush1.bf16.msra.mxu1 %v4975_v20  ;;  %1697 = vmatprep.subr.bf16.mxu0 %v4976_v21  ;;  %v5025_v20 = vld [vmem:[#allocation225_spill] sm:$0xff]  ;;  %v5026_v21 = vld [vmem:[#allocation128_spill] sm:$0xff] }
 0x34f   :  { %1738 = vmatprep.subr.bf16.mxu1 %v4977_v22  ;;  %v5027_v22 = vld [vmem:[#allocation234_spill] sm:$0xff] }
 0x350   :  { %1648 = vmatmul.mubr.bf16.vlgmr.msra.gmra.mrb[32].mxu0 %v4978_v23 }
 0x351   :  { %1689 = vmatmul.mubr.bf16.vlgmr.msra.gmra.mrb[32].mxu1 %v4979_v30  ;;  %1698 = vmatpush1.bf16.msra.mxu0 %v4980_v40  ;;  %v5028_v40 = vld [vmem:[#allocation127_spill] sm:$0xff] }
 0x352   :  { %1739 = vmatpush1.bf16.msra.mxu1 %v4981_v41  ;;  %1699 = vmatprep.subr.bf16.mxu0 %v4982_v42  ;;  %v5029_v41 = vld [vmem:[#allocation233_spill] sm:$0xff]  ;;  %v5030_v42 = vld [vmem:[#allocation136_spill] sm:$0xff] }
 0x353   :  { %1740 = vmatprep.subr.bf16.mxu1 %v4983_v43  ;;  %1729 = vmatprep.mubr.bf16.mxu0 %v3703_v33  ;;  %v5031_v43 = vld [vmem:[#allocation242_spill] sm:$0xff] }
 0x354   :  { %1770 = vmatprep.mubr.bf16.mxu1 %v3705_v34 }
 0x355   :  { %1700 = vmatpush1.bf16.msra.mxu0 %v4984_v44  ;;  %v5032_v44 = vld [vmem:[#allocation135_spill] sm:$0xff] }
 0x356   :  { %1741 = vmatpush1.bf16.msra.mxu1 %v4985_v46  ;;  %1701 = vmatprep.subr.bf16.mxu0 %v4986_v47  ;;  %v5033_v46 = vld [vmem:[#allocation241_spill] sm:$0xff]  ;;  %v5034_v47 = vld [vmem:[#allocation144_spill] sm:$0xff] }
 0x357   :  { %1742 = vmatprep.subr.bf16.mxu1 %v4987_v48  ;;  %v5035_v48 = vld [vmem:[#allocation250_spill] sm:$0xff] }
 0x359   :  { %1702 = vmatpush1.bf16.msra.mxu0 %v4988_v49  ;;  %v5036_v49 = vld [vmem:[#allocation143_spill] sm:$0xff] }
 0x35a   :  { %1743 = vmatpush1.bf16.msra.mxu1 %v4989_v50  ;;  %1703 = vmatprep.subr.bf16.mxu0 %v4990_v51  ;;  %v5037_v50 = vld [vmem:[#allocation249_spill] sm:$0xff]  ;;  %v5038_v51 = vld [vmem:[#allocation152_spill] sm:$0xff] }
 0x35b   :  { %1744 = vmatprep.subr.bf16.mxu1 %v4991_v52  ;;  %v5039_v52 = vld [vmem:[#allocation258_spill] sm:$0xff] }
 0x35d   :  { %1704 = vmatpush1.bf16.msra.mxu0 %v4992_v53  ;;  %v5040_v53 = vld [vmem:[#allocation151_spill] sm:$0xff] }
 0x35e   :  { %1745 = vmatpush1.bf16.msra.mxu1 %v4993_v54  ;;  %1705 = vmatprep.subr.bf16.mxu0 %v4994_v62  ;;  %v5041_v54 = vld [vmem:[#allocation257_spill] sm:$0xff]  ;;  %v5042_v62 = vld [vmem:[#allocation55_spill] sm:$0xff] }
 0x35f   :  { %1746 = vmatprep.subr.bf16.mxu1 %v4995_v17  ;;  %v5043_v17 = vld [vmem:[#allocation160_spill] sm:$0xff] }
 0x361   :  { %1706 = vmatpush1.bf16.msra.mxu0 %v4996_v11  ;;  %v5044_v11 = vld [vmem:[#allocation54_spill] sm:$0xff] }
 0x362   :  { %1747 = vmatpush1.bf16.msra.mxu1 %v4997_v3  ;;  %1707 = vmatprep.subr.bf16.mxu0 %v4998_v39  ;;  %v5045_v3 = vld [vmem:[#allocation159_spill] sm:$0xff]  ;;  %v5046_v39 = vld [vmem:[#allocation61_spill] sm:$0xff] }
 0x363   :  { %1748 = vmatprep.subr.bf16.mxu1 %v4999_v29  ;;  %v1403_v45 = vpop.f32.mrb[20].mxu0  ;;  %v5047_v29 = vld [vmem:[#allocation166_spill] sm:$0xff] }
 0x364   :  { %v1444_v9 = vpop.f32.mrb[20].mxu1  ;;  %v1405_v8 = vpop.f32.mrb[21].mxu0 }
 0x365   :  { %v4375_v28 = vadd.f32 %v1444_v9, %v1403_v45  ;;  %v1446_v5 = vpop.f32.mrb[21].mxu1  ;;  %v1407_v32 = vpop.f32.mrb[22].mxu0  ;;  %1708 = vmatpush1.bf16.msra.mxu0 %v5000_v61  ;;  %v5048_v45 = vld [vmem:[#allocation60_spill] sm:$0xff]  ;;  %v5049_v9 = vld [vmem:[#allocation165_spill] sm:$0xff] }
 0x366   :  { %v4377_v55 = vadd.f32 %v1446_v5, %v1405_v8  ;;  %v1448_v6 = vpop.f32.mrb[22].mxu1  ;;  %1749 = vmatpush1.bf16.msra.mxu1 %v5001_v59  ;;  %v1408_v60 = vpop.f32.mrb[23].mxu0  ;;  %1709 = vmatprep.subr.bf16.mxu0 %v5002_v1  ;;  %v5050_v8 = vld [vmem:[#allocation67_spill] sm:$0xff]  ;;  %v5051_v5 = vld [vmem:[#allocation172_spill] sm:$0xff]  ;;  %v5052_v32 = vld [vmem:[#allocation66_spill] sm:$0xff] }
 0x367   :  { %v1449_v0 = vpop.f32.mrb[23].mxu1  ;;  %1750 = vmatprep.subr.bf16.mxu1 %v5003_v35  ;;  %v5053_v6 = vld [vmem:[#allocation171_spill] sm:$0xff]  ;;  %v5054_v61 = vld [vmem:[#allocation73_spill] sm:$0xff]  ;;  %v5055_v59 = vld [vmem:[#allocation178_spill] sm:$0xff] }
 0x368   :  { %v5056_v60 = vld [vmem:[#allocation72_spill] sm:$0xff]  ;;  %v5057_v0 = vld [vmem:[#allocation177_spill] sm:$0xff]  ;;  %v5058_v1 = vld [vmem:[#allocation79_spill] sm:$0xff] }
 0x369   :  { %1710 = vmatpush1.bf16.msra.mxu0 %v5004_v14  ;;  %v5059_v35 = vld [vmem:[#allocation184_spill] sm:$0xff]  ;;  %v5060_v14 = vld [vmem:[#allocation78_spill] sm:$0xff] }
 0x36a   :  { %1751 = vmatpush1.bf16.msra.mxu1 %v5005_v16  ;;  %1711 = vmatprep.subr.bf16.mxu0 %v5006_v19  ;;  %v5061_v16 = vld [vmem:[#allocation183_spill] sm:$0xff]  ;;  %v5062_v19 = vld [vmem:[#allocation85_spill] sm:$0xff] }
 0x36b   :  { %1752 = vmatprep.subr.bf16.mxu1 %v5007_v7  ;;  %v5063_v7 = vld [vmem:[#allocation190_spill] sm:$0xff] }
 0x36d   :  { %1712 = vmatpush1.bf16.msra.mxu0 %v5008_v10 }
 0x36e   :  { %1753 = vmatpush1.bf16.msra.mxu1 %v5009_v36  ;;  %1713 = vmatprep.subr.bf16.mxu0 %v5010_v37 }
 0x36f   :  { %1754 = vmatprep.subr.bf16.mxu1 %v5011_v38 }
 0x371   :  { %1714 = vmatpush1.bf16.msra.mxu0 %v5012_v26 }
 0x372   :  { %1755 = vmatpush1.bf16.msra.mxu1 %v5013_v25  ;;  %1715 = vmatprep.subr.bf16.mxu0 %v5014_v31 }
 0x373   :  { %1756 = vmatprep.subr.bf16.mxu1 %v5015_v27 }
 0x375   :  { %1716 = vmatpush1.bf16.msra.mxu0 %v5016_v56  ;;  %v5064_v56 = vld [vmem:[#allocation84_spill] sm:$0xff] }
 0x376   :  { %1757 = vmatpush1.bf16.msra.mxu1 %v5017_v57  ;;  %1717 = vmatprep.subr.bf16.mxu0 %v5018_v58  ;;  %v5065_v57 = vld [vmem:[#allocation189_spill] sm:$0xff] }
 0x377   :  { %1758 = vmatprep.subr.bf16.mxu1 %v5019_v63 }
 0x379   :  { %1718 = vmatpush1.bf16.msra.mxu0 %v5020_v4  ;;  %v5066_v4 = vld [vmem:[#allocation91_spill] sm:$0xff] }
 0x37a   :  { %1759 = vmatpush1.bf16.msra.mxu1 %v5021_v12  ;;  %1719 = vmatprep.subr.bf16.mxu0 %v5022_v15  ;;  %v5067_v12 = vld [vmem:[#allocation196_spill] sm:$0xff]  ;;  %v5068_v15 = vld [vmem:[#allocation90_spill] sm:$0xff] }
 0x37b   :  { %1760 = vmatprep.subr.bf16.mxu1 %v5023_v2  ;;  %v5069_v2 = vld [vmem:[#allocation195_spill] sm:$0xff] }
 0x37d   :  { %1720 = vmatpush1.bf16.msra.mxu0 %v5024_v18  ;;  %v5070_v18 = vld [vmem:[#allocation97_spill] sm:$0xff] }
 0x37e   :  { %1761 = vmatpush1.bf16.msra.mxu1 %v5025_v20  ;;  %1721 = vmatprep.subr.bf16.mxu0 %v5026_v21  ;;  %v5071_v20 = vld [vmem:[#allocation202_spill] sm:$0xff]  ;;  %v5072_v21 = vld [vmem:[#allocation96_spill] sm:$0xff] }
 0x37f   :  { %1762 = vmatprep.subr.bf16.mxu1 %v5027_v22  ;;  %v5073_v22 = vld [vmem:[#allocation201_spill] sm:$0xff] }
 0x381   :  { %1722 = vmatpush1.bf16.msra.mxu0 %v5028_v40  ;;  %v5074_v40 = vld [vmem:[#allocation103_spill] sm:$0xff] }
 0x382   :  { %1763 = vmatpush1.bf16.msra.mxu1 %v5029_v41  ;;  %1723 = vmatprep.subr.bf16.mxu0 %v5030_v42  ;;  %v5075_v41 = vld [vmem:[#allocation208_spill] sm:$0xff]  ;;  %v5076_v42 = vld [vmem:[#allocation102_spill] sm:$0xff] }
 0x383   :  { %1764 = vmatprep.subr.bf16.mxu1 %v5031_v43  ;;  %v5077_v43 = vld [vmem:[#allocation207_spill] sm:$0xff] }
 0x385   :  { %1724 = vmatpush1.bf16.msra.mxu0 %v5032_v44  ;;  %v5078_v44 = vld [vmem:[#allocation109_spill] sm:$0xff] }
 0x386   :  { %1765 = vmatpush1.bf16.msra.mxu1 %v5033_v46  ;;  %1725 = vmatprep.subr.bf16.mxu0 %v5034_v47  ;;  %v5079_v46 = vld [vmem:[#allocation214_spill] sm:$0xff]  ;;  %v5080_v47 = vld [vmem:[#allocation108_spill] sm:$0xff] }
 0x387   :  { %1766 = vmatprep.subr.bf16.mxu1 %v5035_v48  ;;  %v5081_v48 = vld [vmem:[#allocation213_spill] sm:$0xff] }
 0x389   :  { %1726 = vmatpush1.bf16.msra.mxu0 %v5036_v49  ;;  %v5082_v49 = vld [vmem:[#allocation115_spill] sm:$0xff] }
 0x38a   :  { %1767 = vmatpush1.bf16.msra.mxu1 %v5037_v50  ;;  %1727 = vmatprep.subr.bf16.mxu0 %v5038_v51  ;;  %v5083_v50 = vld [vmem:[#allocation220_spill] sm:$0xff]  ;;  %v5084_v51 = vld [vmem:[#allocation114_spill] sm:$0xff] }
 0x38b   :  { %1768 = vmatprep.subr.bf16.mxu1 %v5039_v52  ;;  %v5085_v52 = vld [vmem:[#allocation219_spill] sm:$0xff] }
 0x38d   :  { %1728 = vmatpush1.bf16.msra.mxu0 %v5040_v53  ;;  %v5086_v53 = vld [vmem:[#allocation122_spill] sm:$0xff] }
 0x38e   :  { %1769 = vmatpush1.bf16.msra.mxu1 %v5041_v54  ;;  %1779 = vmatprep.subr.bf16.mxu0 %v5042_v62  ;;  %v5087_v54 = vld [vmem:[#allocation228_spill] sm:$0xff]  ;;  %v5088_v62 = vld [vmem:[#allocation121_spill] sm:$0xff] }
 0x38f   :  { %1820 = vmatprep.subr.bf16.mxu1 %v5043_v17  ;;  %v5089_v17 = vld [vmem:[#allocation227_spill] sm:$0xff] }
 0x390   :  { %1730 = vmatmul.mubr.bf16.vlgmr.msra.gmra.mrb[36].mxu0 %v4978_v23 }
 0x391   :  { %1771 = vmatmul.mubr.bf16.vlgmr.msra.gmra.mrb[36].mxu1 %v4979_v30  ;;  %1780 = vmatpush1.bf16.msra.mxu0 %v5044_v11  ;;  %v5090_v11 = vld [vmem:[#allocation130_spill] sm:$0xff] }
 0x392   :  { %1821 = vmatpush1.bf16.msra.mxu1 %v5045_v3  ;;  %1781 = vmatprep.subr.bf16.mxu0 %v5046_v39  ;;  %v5091_v3 = vld [vmem:[#allocation236_spill] sm:$0xff]  ;;  %v5092_v39 = vld [vmem:[#allocation129_spill] sm:$0xff] }
 0x393   :  { %1822 = vmatprep.subr.bf16.mxu1 %v5047_v29  ;;  %1811 = vmatprep.mubr.bf16.mxu0 %v3703_v33  ;;  %v5093_v29 = vld [vmem:[#allocation235_spill] sm:$0xff] }
 0x394   :  { %1852 = vmatprep.mubr.bf16.mxu1 %v3705_v34 }
 0x395   :  { %1782 = vmatpush1.bf16.msra.mxu0 %v5048_v45  ;;  %v5094_v45 = vld [vmem:[#allocation138_spill] sm:$0xff] }
 0x396   :  { %1823 = vmatpush1.bf16.msra.mxu1 %v5049_v9  ;;  %1783 = vmatprep.subr.bf16.mxu0 %v5050_v8  ;;  %v5095_v9 = vld [vmem:[#allocation244_spill] sm:$0xff]  ;;  %v5096_v8 = vld [vmem:[#allocation137_spill] sm:$0xff] }
 0x397   :  { %1824 = vmatprep.subr.bf16.mxu1 %v5051_v5  ;;  %v5097_v5 = vld [vmem:[#allocation243_spill] sm:$0xff] }
 0x399   :  { %1784 = vmatpush1.bf16.msra.mxu0 %v5052_v32  ;;  %v5098_v32 = vld [vmem:[#allocation146_spill] sm:$0xff] }
 0x39a   :  { %1825 = vmatpush1.bf16.msra.mxu1 %v5053_v6  ;;  %1785 = vmatprep.subr.bf16.mxu0 %v5054_v61  ;;  %v5099_v6 = vld [vmem:[#allocation252_spill] sm:$0xff]  ;;  %v5100_v61 = vld [vmem:[#allocation145_spill] sm:$0xff] }
 0x39b   :  { %1826 = vmatprep.subr.bf16.mxu1 %v5055_v59  ;;  %v5101_v59 = vld [vmem:[#allocation251_spill] sm:$0xff] }
 0x39d   :  { %1786 = vmatpush1.bf16.msra.mxu0 %v5056_v60  ;;  %v5102_v60 = vld [vmem:[#allocation154_spill] sm:$0xff] }
 0x39e   :  { %1827 = vmatpush1.bf16.msra.mxu1 %v5057_v0  ;;  %1787 = vmatprep.subr.bf16.mxu0 %v5058_v1  ;;  %v5103_v0 = vld [vmem:[#allocation260_spill] sm:$0xff]  ;;  %v5104_v1 = vld [vmem:[#allocation153_spill] sm:$0xff] }
 0x39f   :  { %1828 = vmatprep.subr.bf16.mxu1 %v5059_v35  ;;  %v5105_v35 = vld [vmem:[#allocation259_spill] sm:$0xff] }
 0x3a1   :  { %1788 = vmatpush1.bf16.msra.mxu0 %v5060_v14  ;;  %v5106_v14 = vld [vmem:[#allocation57_spill] sm:$0xff] }
 0x3a2   :  { %1829 = vmatpush1.bf16.msra.mxu1 %v5061_v16  ;;  %1789 = vmatprep.subr.bf16.mxu0 %v5062_v19  ;;  %v5107_v16 = vld [vmem:[#allocation162_spill] sm:$0xff]  ;;  %v5108_v19 = vld [vmem:[#allocation56_spill] sm:$0xff] }
 0x3a3   :  { %1830 = vmatprep.subr.bf16.mxu1 %v5063_v7  ;;  %v1485_v10 = vpop.f32.mrb[24].mxu0  ;;  %v5109_v7 = vld [vmem:[#allocation161_spill] sm:$0xff] }
 0x3a4   :  { %v1526_v36 = vpop.f32.mrb[24].mxu1  ;;  %v1487_v38 = vpop.f32.mrb[25].mxu0 }
 0x3a5   :  { %v4447_v37 = vadd.f32 %v1526_v36, %v1485_v10  ;;  %v1528_v26 = vpop.f32.mrb[25].mxu1  ;;  %v1489_v31 = vpop.f32.mrb[26].mxu0  ;;  %1790 = vmatpush1.bf16.msra.mxu0 %v5064_v56  ;;  %v5110_v10 = vld [vmem:[#allocation63_spill] sm:$0xff]  ;;  %v5111_v36 = vld [vmem:[#allocation168_spill] sm:$0xff] }
 0x3a6   :  { %v4449_v25 = vadd.f32 %v1528_v26, %v1487_v38  ;;  %v1530_v27 = vpop.f32.mrb[26].mxu1  ;;  %1831 = vmatpush1.bf16.msra.mxu1 %v5065_v57  ;;  %v1490_v58 = vpop.f32.mrb[27].mxu0  ;;  %1791 = vmatprep.subr.bf16.mxu0 %v5066_v4  ;;  %v5112_v38 = vld [vmem:[#allocation62_spill] sm:$0xff]  ;;  %v5113_v26 = vld [vmem:[#allocation167_spill] sm:$0xff]  ;;  %v5114_v31 = vld [vmem:[#allocation69_spill] sm:$0xff] }
 0x3a7   :  { %v1531_v63 = vpop.f32.mrb[27].mxu1  ;;  %1832 = vmatprep.subr.bf16.mxu1 %v5067_v12  ;;  %v5115_v27 = vld [vmem:[#allocation174_spill] sm:$0xff]  ;;  %v5116_v56 = vld [vmem:[#allocation68_spill] sm:$0xff]  ;;  %v5117_v57 = vld [vmem:[#allocation173_spill] sm:$0xff] }
 0x3a8   :  { %v5118_v58 = vld [vmem:[#allocation75_spill] sm:$0xff]  ;;  %v5119_v63 = vld [vmem:[#allocation180_spill] sm:$0xff]  ;;  %v5120_v4 = vld [vmem:[#allocation74_spill] sm:$0xff] }
 0x3a9   :  { %1792 = vmatpush1.bf16.msra.mxu0 %v5068_v15  ;;  %v5123_v12 = vld [vmem:[#allocation186_spill] sm:$0xff]  ;;  %v5124_v15 = vld [vmem:[#allocation80_spill] sm:$0xff] }
 0x3aa   :  { %1833 = vmatpush1.bf16.msra.mxu1 %v5069_v2  ;;  %1793 = vmatprep.subr.bf16.mxu0 %v5070_v18  ;;  %v5125_v2 = vld [vmem:[#allocation185_spill] sm:$0xff]  ;;  %v5126_v18 = vld [vmem:[#allocation87_spill] sm:$0xff] }
 0x3ab   :  { %1834 = vmatprep.subr.bf16.mxu1 %v5071_v20  ;;  %v5127_v20 = vld [vmem:[#allocation192_spill] sm:$0xff] }
 0x3ad   :  { %1794 = vmatpush1.bf16.msra.mxu0 %v5072_v21 }
 0x3ae   :  { %1835 = vmatpush1.bf16.msra.mxu1 %v5073_v22  ;;  %1795 = vmatprep.subr.bf16.mxu0 %v5074_v40 }
 0x3af   :  { %1836 = vmatprep.subr.bf16.mxu1 %v5075_v41 }
 0x3b1   :  { %1796 = vmatpush1.bf16.msra.mxu0 %v5076_v42 }
 0x3b2   :  { %1837 = vmatpush1.bf16.msra.mxu1 %v5077_v43  ;;  %1797 = vmatprep.subr.bf16.mxu0 %v5078_v44 }
 0x3b3   :  { %1838 = vmatprep.subr.bf16.mxu1 %v5079_v46 }
 0x3b5   :  { %1798 = vmatpush1.bf16.msra.mxu0 %v5080_v47  ;;  %v5128_v47 = vld [vmem:[#allocation86_spill] sm:$0xff] }
 0x3b6   :  { %1839 = vmatpush1.bf16.msra.mxu1 %v5081_v48  ;;  %1799 = vmatprep.subr.bf16.mxu0 %v5082_v49  ;;  %v5129_v48 = vld [vmem:[#allocation191_spill] sm:$0xff] }
 0x3b7   :  { %1840 = vmatprep.subr.bf16.mxu1 %v5083_v50 }
 0x3b9   :  { %1800 = vmatpush1.bf16.msra.mxu0 %v5084_v51  ;;  %v5130_v51 = vld [vmem:[#allocation93_spill] sm:$0xff] }
 0x3ba   :  { %1841 = vmatpush1.bf16.msra.mxu1 %v5085_v52  ;;  %1801 = vmatprep.subr.bf16.mxu0 %v5086_v53  ;;  %v5131_v52 = vld [vmem:[#allocation198_spill] sm:$0xff]  ;;  %v5132_v53 = vld [vmem:[#allocation92_spill] sm:$0xff] }
 0x3bb   :  { %1842 = vmatprep.subr.bf16.mxu1 %v5087_v54  ;;  %v5133_v54 = vld [vmem:[#allocation197_spill] sm:$0xff] }
 0x3bd   :  { %1802 = vmatpush1.bf16.msra.mxu0 %v5088_v62  ;;  %v5134_v62 = vld [vmem:[#allocation99_spill] sm:$0xff] }
 0x3be   :  { %1843 = vmatpush1.bf16.msra.mxu1 %v5089_v17  ;;  %1803 = vmatprep.subr.bf16.mxu0 %v5090_v11  ;;  %v5135_v17 = vld [vmem:[#allocation204_spill] sm:$0xff]  ;;  %v5136_v11 = vld [vmem:[#allocation98_spill] sm:$0xff] }
 0x3bf   :  { %1844 = vmatprep.subr.bf16.mxu1 %v5091_v3  ;;  %v5137_v3 = vld [vmem:[#allocation203_spill] sm:$0xff] }
 0x3c1   :  { %1804 = vmatpush1.bf16.msra.mxu0 %v5092_v39  ;;  %v5138_v39 = vld [vmem:[#allocation105_spill] sm:$0xff] }
 0x3c2   :  { %1845 = vmatpush1.bf16.msra.mxu1 %v5093_v29  ;;  %1805 = vmatprep.subr.bf16.mxu0 %v5094_v45  ;;  %v5139_v29 = vld [vmem:[#allocation210_spill] sm:$0xff]  ;;  %v5140_v45 = vld [vmem:[#allocation104_spill] sm:$0xff] }
 0x3c3   :  { %1846 = vmatprep.subr.bf16.mxu1 %v5095_v9  ;;  %v5141_v9 = vld [vmem:[#allocation209_spill] sm:$0xff] }
 0x3c5   :  { %1806 = vmatpush1.bf16.msra.mxu0 %v5096_v8  ;;  %v5142_v8 = vld [vmem:[#allocation111_spill] sm:$0xff] }
 0x3c6   :  { %1847 = vmatpush1.bf16.msra.mxu1 %v5097_v5  ;;  %1807 = vmatprep.subr.bf16.mxu0 %v5098_v32  ;;  %v5143_v5 = vld [vmem:[#allocation216_spill] sm:$0xff]  ;;  %v5144_v32 = vld [vmem:[#allocation110_spill] sm:$0xff] }
 0x3c7   :  { %1848 = vmatprep.subr.bf16.mxu1 %v5099_v6  ;;  %v5145_v6 = vld [vmem:[#allocation215_spill] sm:$0xff] }
 0x3c9   :  { %1808 = vmatpush1.bf16.msra.mxu0 %v5100_v61  ;;  %v5146_v61 = vld [vmem:[#allocation117_spill] sm:$0xff] }
 0x3ca   :  { %1849 = vmatpush1.bf16.msra.mxu1 %v5101_v59  ;;  %1809 = vmatprep.subr.bf16.mxu0 %v5102_v60  ;;  %v5147_v59 = vld [vmem:[#allocation222_spill] sm:$0xff]  ;;  %v5148_v60 = vld [vmem:[#allocation116_spill] sm:$0xff] }
 0x3cb   :  { %1850 = vmatprep.subr.bf16.mxu1 %v5103_v0  ;;  %v5149_v0 = vld [vmem:[#allocation221_spill] sm:$0xff] }
 0x3cd   :  { %1810 = vmatpush1.bf16.msra.mxu0 %v5104_v1  ;;  %v5150_v1 = vld [vmem:[#allocation124_spill] sm:$0xff] }
 0x3ce   :  { %1851 = vmatpush1.bf16.msra.mxu1 %v5105_v35  ;;  %1861 = vmatprep.subr.bf16.mxu0 %v5106_v14  ;;  %v5151_v35 = vld [vmem:[#allocation230_spill] sm:$0xff]  ;;  %v5152_v14 = vld [vmem:[#allocation123_spill] sm:$0xff] }
 0x3cf   :  { %1902 = vmatprep.subr.bf16.mxu1 %v5107_v16  ;;  %v5153_v16 = vld [vmem:[#allocation229_spill] sm:$0xff] }
 0x3d0   :  { %1812 = vmatmul.mubr.bf16.vlgmr.msra.gmra.mrb[40].mxu0 %v4978_v23 }
 0x3d1   :  { %1853 = vmatmul.mubr.bf16.vlgmr.msra.gmra.mrb[40].mxu1 %v4979_v30  ;;  %1862 = vmatpush1.bf16.msra.mxu0 %v5108_v19  ;;  %v5154_v19 = vld [vmem:[#allocation132_spill] sm:$0xff] }
 0x3d2   :  { %1903 = vmatpush1.bf16.msra.mxu1 %v5109_v7  ;;  %1863 = vmatprep.subr.bf16.mxu0 %v5110_v10  ;;  %v5155_v7 = vld [vmem:[#allocation238_spill] sm:$0xff]  ;;  %v5156_v10 = vld [vmem:[#allocation131_spill] sm:$0xff] }
 0x3d3   :  { %1904 = vmatprep.subr.bf16.mxu1 %v5111_v36  ;;  %1893 = vmatprep.mubr.bf16.mxu0 %v3703_v33  ;;  %v5121_v33 = vld [vmem:[#allocation179_spill] sm:$0xff]  ;;  %v5157_v36 = vld [vmem:[#allocation237_spill] sm:$0xff] }
 0x3d4   :  { %1934 = vmatprep.mubr.bf16.mxu1 %v3705_v34  ;;  %v5122_v34 = vld [vmem:[#allocation81_spill] sm:$0xff] }
 0x3d5   :  { %1864 = vmatpush1.bf16.msra.mxu0 %v5112_v38  ;;  %v5158_v38 = vld [vmem:[#allocation140_spill] sm:$0xff] }
 0x3d6   :  { %1905 = vmatpush1.bf16.msra.mxu1 %v5113_v26  ;;  %1865 = vmatprep.subr.bf16.mxu0 %v5114_v31  ;;  %v5159_v26 = vld [vmem:[#allocation246_spill] sm:$0xff]  ;;  %v5160_v31 = vld [vmem:[#allocation139_spill] sm:$0xff] }
 0x3d7   :  { %1906 = vmatprep.subr.bf16.mxu1 %v5115_v27  ;;  %v5161_v27 = vld [vmem:[#allocation245_spill] sm:$0xff] }
 0x3d9   :  { %1866 = vmatpush1.bf16.msra.mxu0 %v5116_v56  ;;  %v5162_v56 = vld [vmem:[#allocation148_spill] sm:$0xff] }
 0x3da   :  { %1907 = vmatpush1.bf16.msra.mxu1 %v5117_v57  ;;  %1867 = vmatprep.subr.bf16.mxu0 %v5118_v58  ;;  %v5163_v57 = vld [vmem:[#allocation254_spill] sm:$0xff]  ;;  %v5164_v58 = vld [vmem:[#allocation147_spill] sm:$0xff] }
 0x3db   :  { %1908 = vmatprep.subr.bf16.mxu1 %v5119_v63  ;;  %v5165_v63 = vld [vmem:[#allocation253_spill] sm:$0xff] }
 0x3dd   :  { %1868 = vmatpush1.bf16.msra.mxu0 %v5120_v4  ;;  %v5166_v4 = vld [vmem:[#allocation156_spill] sm:$0xff] }
 0x3de   :  { %1909 = vmatpush1.bf16.msra.mxu1 %v5121_v33  ;;  %1869 = vmatprep.subr.bf16.mxu0 %v5122_v34  ;;  %v5167_v33 = vld [vmem:[#allocation262_spill] sm:$0xff]  ;;  %v5168_v34 = vld [vmem:[#allocation155_spill] sm:$0xff] }
 0x3df   :  { %1910 = vmatprep.subr.bf16.mxu1 %v5123_v12  ;;  %v5169_v12 = vld [vmem:[#allocation261_spill] sm:$0xff] }
 0x3e1   :  { %1870 = vmatpush1.bf16.msra.mxu0 %v5124_v15 }
 0x3e2   :  { %1911 = vmatpush1.bf16.msra.mxu1 %v5125_v2  ;;  %1871 = vmatprep.subr.bf16.mxu0 %v5126_v18 }
 0x3e3   :  { %1912 = vmatprep.subr.bf16.mxu1 %v5127_v20  ;;  %v1567_v21 = vpop.f32.mrb[28].mxu0 }
 0x3e4   :  { %v1608_v22 = vpop.f32.mrb[28].mxu1  ;;  %v1569_v41 = vpop.f32.mrb[29].mxu0 }
 0x3e5   :  { %v4519_v40 = vadd.f32 %v1608_v22, %v1567_v21  ;;  %v1610_v42 = vpop.f32.mrb[29].mxu1  ;;  %v1571_v44 = vpop.f32.mrb[30].mxu0  ;;  %1872 = vmatpush1.bf16.msra.mxu0 %v5128_v47 }
 0x3e6   :  { %v4521_v43 = vadd.f32 %v1610_v42, %v1569_v41  ;;  %v1612_v46 = vpop.f32.mrb[30].mxu1  ;;  %1913 = vmatpush1.bf16.msra.mxu1 %v5129_v48  ;;  %v1572_v49 = vpop.f32.mrb[31].mxu0  ;;  %1873 = vmatprep.subr.bf16.mxu0 %v5130_v51 }
 0x3e7   :  { %v1613_v50 = vpop.f32.mrb[31].mxu1  ;;  %1914 = vmatprep.subr.bf16.mxu1 %v5131_v52 }
 0x3e9   :  { %1874 = vmatpush1.bf16.msra.mxu0 %v5132_v53 }
 0x3ea   :  { %1915 = vmatpush1.bf16.msra.mxu1 %v5133_v54  ;;  %1875 = vmatprep.subr.bf16.mxu0 %v5134_v62 }
 0x3eb   :  { %1916 = vmatprep.subr.bf16.mxu1 %v5135_v17 }
 0x3ed   :  { %1876 = vmatpush1.bf16.msra.mxu0 %v5136_v11 }
 0x3ee   :  { %1917 = vmatpush1.bf16.msra.mxu1 %v5137_v3  ;;  %1877 = vmatprep.subr.bf16.mxu0 %v5138_v39 }
 0x3ef   :  { %1918 = vmatprep.subr.bf16.mxu1 %v5139_v29 }
 0x3f1   :  { %1878 = vmatpush1.bf16.msra.mxu0 %v5140_v45 }
 0x3f2   :  { %1919 = vmatpush1.bf16.msra.mxu1 %v5141_v9  ;;  %1879 = vmatprep.subr.bf16.mxu0 %v5142_v8 }
 0x3f3   :  { %1920 = vmatprep.subr.bf16.mxu1 %v5143_v5 }
 0x3f5   :  { %1880 = vmatpush1.bf16.msra.mxu0 %v5144_v32 }
 0x3f6   :  { %1921 = vmatpush1.bf16.msra.mxu1 %v5145_v6  ;;  %1881 = vmatprep.subr.bf16.mxu0 %v5146_v61 }
 0x3f7   :  { %1922 = vmatprep.subr.bf16.mxu1 %v5147_v59 }
 0x3f9   :  { %1882 = vmatpush1.bf16.msra.mxu0 %v5148_v60 }
 0x3fa   :  { %1923 = vmatpush1.bf16.msra.mxu1 %v5149_v0  ;;  %1883 = vmatprep.subr.bf16.mxu0 %v5150_v1 }
 0x3fb   :  { %1924 = vmatprep.subr.bf16.mxu1 %v5151_v35 }
 0x3fd   :  { %1884 = vmatpush1.bf16.msra.mxu0 %v5152_v14 }
 0x3fe   :  { %1925 = vmatpush1.bf16.msra.mxu1 %v5153_v16  ;;  %1885 = vmatprep.subr.bf16.mxu0 %v5154_v19 }
 0x3ff   :  { %1926 = vmatprep.subr.bf16.mxu1 %v5155_v7 }
 0x401   :  { %1886 = vmatpush1.bf16.msra.mxu0 %v5156_v10 }
 0x402   :  { %1927 = vmatpush1.bf16.msra.mxu1 %v5157_v36  ;;  %1887 = vmatprep.subr.bf16.mxu0 %v5158_v38 }
 0x403   :  { %1928 = vmatprep.subr.bf16.mxu1 %v5159_v26 }
 0x405   :  { %1888 = vmatpush1.bf16.msra.mxu0 %v5160_v31 }
 0x406   :  { %1929 = vmatpush1.bf16.msra.mxu1 %v5161_v27  ;;  %1889 = vmatprep.subr.bf16.mxu0 %v5162_v56 }
 0x407   :  { %1930 = vmatprep.subr.bf16.mxu1 %v5163_v57 }
 0x409   :  { %1890 = vmatpush1.bf16.msra.mxu0 %v5164_v58 }
 0x40a   :  { %1931 = vmatpush1.bf16.msra.mxu1 %v5165_v63  ;;  %1891 = vmatprep.subr.bf16.mxu0 %v5166_v4 }
 0x40b   :  { %1932 = vmatprep.subr.bf16.mxu1 %v5167_v33 }
 0x40d   :  { %1892 = vmatpush1.bf16.msra.mxu0 %v5168_v34 }
 0x40e   :  { %1933 = vmatpush1.bf16.msra.mxu1 %v5169_v12 }
 0x410   :  { %1894 = vmatmul.mubr.bf16.vlgmr.msra.gmra.mrb[44].mxu0 %v4978_v23 }
 0x411   :  { %1935 = vmatmul.mubr.bf16.vlgmr.msra.gmra.mrb[44].mxu1 %v4979_v30 }
 0x423   :  { %v1649_v15 = vpop.f32.mrb[32].mxu0 }
 0x424   :  { %v1690_v2 = vpop.f32.mrb[32].mxu1  ;;  %v1650_v18 = vadd.f32 %v1649_v15, %v4303_v24  ;;  %v1651_v20 = vpop.f32.mrb[33].mxu0 }
 0x425   :  { %v1692_v21 = vpop.f32.mrb[33].mxu1  ;;  %v1652_v22 = vadd.f32 %v1651_v20, %v4305_v13  ;;  %v1653_v41 = vpop.f32.mrb[34].mxu0 }
 0x426   :  { %v1694_v42 = vpop.f32.mrb[34].mxu1  ;;  %v4569_v44 = vadd.f32 %v1690_v2, %v1650_v18  ;;  %v1654_v46 = vpop.f32.mrb[35].mxu0 }
 0x427   :  { %v1695_v47 = vpop.f32.mrb[35].mxu1  ;;  %v4571_v48 = vadd.f32 %v1692_v21, %v1652_v22 }
 0x463   :  { %v1731_v49 = vpop.f32.mrb[36].mxu0 }
 0x464   :  { %v1772_v23 = vpop.f32.mrb[36].mxu1  ;;  %v1732_v30 = vadd.f32 %v1731_v49, %v4375_v28  ;;  %v1733_v50 = vpop.f32.mrb[37].mxu0 }
 0x465   :  { %v1774_v51 = vpop.f32.mrb[37].mxu1  ;;  %v1734_v24 = vadd.f32 %v1733_v50, %v4377_v55  ;;  %v1735_v52 = vpop.f32.mrb[38].mxu0 }
 0x466   :  { %v1776_v53 = vpop.f32.mrb[38].mxu1  ;;  %v4575_v54 = vadd.f32 %v1772_v23, %v1732_v30  ;;  %v1736_v13 = vpop.f32.mrb[39].mxu0 }
 0x467   :  { %v1777_v62 = vpop.f32.mrb[39].mxu1  ;;  %v4577_v17 = vadd.f32 %v1774_v51, %v1734_v24 }
 0x4a3   :  { %v1813_v11 = vpop.f32.mrb[40].mxu0 }
 0x4a4   :  { %v1854_v3 = vpop.f32.mrb[40].mxu1  ;;  %v1814_v39 = vadd.f32 %v1813_v11, %v4447_v37  ;;  %v1815_v29 = vpop.f32.mrb[41].mxu0 }
 0x4a5   :  { %v1856_v45 = vpop.f32.mrb[41].mxu1  ;;  %v1816_v28 = vadd.f32 %v1815_v29, %v4449_v25  ;;  %v1817_v9 = vpop.f32.mrb[42].mxu0 }
 0x4a6   :  { %v1858_v8 = vpop.f32.mrb[42].mxu1  ;;  %v4581_v5 = vadd.f32 %v1854_v3, %v1814_v39  ;;  %v1818_v55 = vpop.f32.mrb[43].mxu0 }
 0x4a7   :  { %v1859_v32 = vpop.f32.mrb[43].mxu1  ;;  %v4583_v6 = vadd.f32 %v1856_v45, %v1816_v28 }
 0x4e3   :  { %v1895_v61 = vpop.f32.mrb[44].mxu0 }
 0x4e4   :  { %v1936_v59 = vpop.f32.mrb[44].mxu1  ;;  %v1896_v60 = vadd.f32 %v1895_v61, %v4519_v40  ;;  %v1897_v0 = vpop.f32.mrb[45].mxu0 }
 0x4e5   :  { %v1938_v1 = vpop.f32.mrb[45].mxu1  ;;  %v1898_v37 = vadd.f32 %v1897_v0, %v4521_v43  ;;  %v1899_v35 = vpop.f32.mrb[46].mxu0 }
 0x4e6   :  { %v1940_v14 = vpop.f32.mrb[46].mxu1  ;;  %v4587_v16 = vadd.f32 %v1936_v59, %v1896_v60  ;;  %v1900_v25 = vpop.f32.mrb[47].mxu0 }
 0x4e7   :  { %v1941_v19 = vpop.f32.mrb[47].mxu1  ;;  %v4589_v7 = vadd.f32 %v1938_v1, %v1898_v37 }
 0x4e8   :  { %3471 = dma.done.wait [#allocation5 + $0x3], 32768 }
 0x4e9   :  { %3472 = vsyncadd [#allocation5 + $0x3], 4294934528  ;;  %v5170_v10 = vld [vmem:[#allocation46_spill] sm:$0xff]  ;;  %v5171_v36 = vld [vmem:[#allocation47_spill] sm:$0xff] }
 0x4ea   :  { %2233 = vmatprep.mubr.bf16.mxu0 %v5170_v10  ;;  %2274 = vmatprep.mubr.bf16.mxu1 %v5171_v36  ;;  %v1946_v38 = vld [vmem:[#allocation3 + $0x1008] sm:$0xff]  ;;  %v1945_v26 = vld [vmem:[#allocation3 + $0x1000] sm:$0xff] }
 0x4eb   :  { %v2074_v40 = vld [vmem:[#allocation3 + $0x1408] sm:$0xff]  ;;  %2201 = vmatprep.subr.bf16.mxu0 %v1946_v38  ;;  %v2073_v43 = vld [vmem:[#allocation3 + $0x1400] sm:$0xff] }
 0x4ec   :  { %2242 = vmatprep.subr.bf16.mxu1 %v2074_v40  ;;  %v1954_v31 = vld [vmem:[#allocation3 + $0x1048] sm:$0xff]  ;;  %2202 = vmatpush1.bf16.msra.mxu0 %v1945_v26  ;;  %v1953_v56 = vld [vmem:[#allocation3 + $0x1040] sm:$0xff] }
 0x4ed   :  { %v2082_v27 = vld [vmem:[#allocation3 + $0x1448] sm:$0xff]  ;;  %2243 = vmatpush1.bf16.msra.mxu1 %v2073_v43  ;;  %2203 = vmatprep.subr.bf16.mxu0 %v1954_v31  ;;  %v2081_v57 = vld [vmem:[#allocation3 + $0x1440] sm:$0xff] }
 0x4ee   :  { %2244 = vmatprep.subr.bf16.mxu1 %v2082_v27  ;;  %v1962_v58 = vld [vmem:[#allocation3 + $0x1088] sm:$0xff]  ;;  %v1961_v4 = vld [vmem:[#allocation3 + $0x1080] sm:$0xff] }
 0x4ef   :  { %v2090_v63 = vld [vmem:[#allocation3 + $0x1488] sm:$0xff]  ;;  %v2089_v33 = vld [vmem:[#allocation3 + $0x1480] sm:$0xff] }
 0x4f0   :  { %2204 = vmatpush1.bf16.msra.mxu0 %v1953_v56  ;;  %v1970_v34 = vld [vmem:[#allocation3 + $0x10c8] sm:$0xff]  ;;  %v1969_v15 = vld [vmem:[#allocation3 + $0x10c0] sm:$0xff] }
 0x4f1   :  { %2245 = vmatpush1.bf16.msra.mxu1 %v2081_v57  ;;  %2205 = vmatprep.subr.bf16.mxu0 %v1962_v58  ;;  %v2098_v12 = vld [vmem:[#allocation3 + $0x14c8] sm:$0xff]  ;;  %v2097_v2 = vld [vmem:[#allocation3 + $0x14c0] sm:$0xff] }
 0x4f2   :  { %2246 = vmatprep.subr.bf16.mxu1 %v2090_v63  ;;  %v1978_v18 = vld [vmem:[#allocation3 + $0x1108] sm:$0xff]  ;;  %v1977_v21 = vld [vmem:[#allocation3 + $0x1100] sm:$0xff] }
 0x4f3   :  { %v2106_v20 = vld [vmem:[#allocation3 + $0x1508] sm:$0xff]  ;;  %v2105_v22 = vld [vmem:[#allocation3 + $0x1500] sm:$0xff] }
 0x4f4   :  { %2206 = vmatpush1.bf16.msra.mxu0 %v1961_v4  ;;  %v1986_v41 = vld [vmem:[#allocation3 + $0x1148] sm:$0xff]  ;;  %v1985_v46 = vld [vmem:[#allocation3 + $0x1140] sm:$0xff]  ;;  %v1948_v4 = vld [vmem:[#allocation3 + $0x1018] sm:$0xff] }
 0x4f5   :  { %2247 = vmatpush1.bf16.msra.mxu1 %v2089_v33  ;;  %2207 = vmatprep.subr.bf16.mxu0 %v1970_v34  ;;  %v2114_v42 = vld [vmem:[#allocation3 + $0x1548] sm:$0xff]  ;;  %v2113_v47 = vld [vmem:[#allocation3 + $0x1540] sm:$0xff]  ;;  %v2076_v33 = vld [vmem:[#allocation3 + $0x1418] sm:$0xff] }
 0x4f6   :  { %2248 = vmatprep.subr.bf16.mxu1 %v2098_v12  ;;  %v1994_v49 = vld [vmem:[#allocation3 + $0x1188] sm:$0xff]  ;;  %v1993_v30 = vld [vmem:[#allocation3 + $0x1180] sm:$0xff]  ;;  %v1947_v34 = vld [vmem:[#allocation3 + $0x1010] sm:$0xff] }
 0x4f7   :  { %v2122_v23 = vld [vmem:[#allocation3 + $0x1588] sm:$0xff]  ;;  %v2121_v50 = vld [vmem:[#allocation3 + $0x1580] sm:$0xff]  ;;  %v2075_v12 = vld [vmem:[#allocation3 + $0x1410] sm:$0xff] }
 0x4f8   :  { %2208 = vmatpush1.bf16.msra.mxu0 %v1969_v15  ;;  %v2002_v51 = vld [vmem:[#allocation3 + $0x11c8] sm:$0xff]  ;;  %v2001_v52 = vld [vmem:[#allocation3 + $0x11c0] sm:$0xff]  ;;  %v1956_v15 = vld [vmem:[#allocation3 + $0x1058] sm:$0xff] }
 0x4f9   :  { %2249 = vmatpush1.bf16.msra.mxu1 %v2097_v2  ;;  %2209 = vmatprep.subr.bf16.mxu0 %v1978_v18  ;;  %v2130_v24 = vld [vmem:[#allocation3 + $0x15c8] sm:$0xff]  ;;  %v2129_v53 = vld [vmem:[#allocation3 + $0x15c0] sm:$0xff]  ;;  %v2084_v2 = vld [vmem:[#allocation3 + $0x1458] sm:$0xff] }
 0x4fa   :  { %2250 = vmatprep.subr.bf16.mxu1 %v2106_v20  ;;  %v2010_v13 = vld [vmem:[#allocation3 + $0x1208] sm:$0xff]  ;;  %v2009_v11 = vld [vmem:[#allocation3 + $0x1200] sm:$0xff] }
 0x4fb   :  { %v2138_v62 = vld [vmem:[#allocation3 + $0x1608] sm:$0xff]  ;;  %v2137_v3 = vld [vmem:[#allocation3 + $0x1600] sm:$0xff] }
 0x4fc   :  { %2210 = vmatpush1.bf16.msra.mxu0 %v1977_v21  ;;  %v2018_v39 = vld [vmem:[#allocation3 + $0x1248] sm:$0xff]  ;;  %v2017_v45 = vld [vmem:[#allocation3 + $0x1240] sm:$0xff]  ;;  %v1955_v21 = vld [vmem:[#allocation3 + $0x1050] sm:$0xff] }
 0x4fd   :  { %2251 = vmatpush1.bf16.msra.mxu1 %v2105_v22  ;;  %2211 = vmatprep.subr.bf16.mxu0 %v1986_v41  ;;  %v2146_v29 = vld [vmem:[#allocation3 + $0x1648] sm:$0xff]  ;;  %v2145_v28 = vld [vmem:[#allocation3 + $0x1640] sm:$0xff]  ;;  %v2083_v22 = vld [vmem:[#allocation3 + $0x1450] sm:$0xff] }
 0x4fe   :  { %2252 = vmatprep.subr.bf16.mxu1 %v2114_v42  ;;  %v2026_v9 = vld [vmem:[#allocation3 + $0x1288] sm:$0xff]  ;;  %v2025_v55 = vld [vmem:[#allocation3 + $0x1280] sm:$0xff]  ;;  %v1964_v41 = vld [vmem:[#allocation3 + $0x1098] sm:$0xff] }
 0x4ff   :  { %v2154_v8 = vld [vmem:[#allocation3 + $0x1688] sm:$0xff]  ;;  %v2153_v32 = vld [vmem:[#allocation3 + $0x1680] sm:$0xff]  ;;  %v2092_v42 = vld [vmem:[#allocation3 + $0x1498] sm:$0xff] }
 0x500   :  { %2212 = vmatpush1.bf16.msra.mxu0 %v1985_v46  ;;  %v2034_v61 = vld [vmem:[#allocation3 + $0x12c8] sm:$0xff]  ;;  %v2033_v60 = vld [vmem:[#allocation3 + $0x12c0] sm:$0xff]  ;;  %v1963_v46 = vld [vmem:[#allocation3 + $0x1090] sm:$0xff] }
 0x501   :  { %2253 = vmatpush1.bf16.msra.mxu1 %v2113_v47  ;;  %2213 = vmatprep.subr.bf16.mxu0 %v1994_v49  ;;  %v2162_v59 = vld [vmem:[#allocation3 + $0x16c8] sm:$0xff]  ;;  %v2161_v0 = vld [vmem:[#allocation3 + $0x16c0] sm:$0xff]  ;;  %v2091_v47 = vld [vmem:[#allocation3 + $0x1490] sm:$0xff] }
 0x502   :  { %2254 = vmatprep.subr.bf16.mxu1 %v2122_v23  ;;  %v2042_v1 = vld [vmem:[#allocation3 + $0x1308] sm:$0xff]  ;;  %v2041_v35 = vld [vmem:[#allocation3 + $0x1300] sm:$0xff]  ;;  %v1972_v49 = vld [vmem:[#allocation3 + $0x10d8] sm:$0xff] }
 0x503   :  { %v2170_v37 = vld [vmem:[#allocation3 + $0x1708] sm:$0xff]  ;;  %v2169_v14 = vld [vmem:[#allocation3 + $0x1700] sm:$0xff]  ;;  %v2100_v23 = vld [vmem:[#allocation3 + $0x14d8] sm:$0xff] }
 0x504   :  { %2214 = vmatpush1.bf16.msra.mxu0 %v1993_v30  ;;  %v2050_v25 = vld [vmem:[#allocation3 + $0x1348] sm:$0xff]  ;;  %v2049_v38 = vld [vmem:[#allocation3 + $0x1340] sm:$0xff]  ;;  %v1971_v30 = vld [vmem:[#allocation3 + $0x10d0] sm:$0xff] }
 0x505   :  { %2255 = vmatpush1.bf16.msra.mxu1 %v2121_v50  ;;  %2215 = vmatprep.subr.bf16.mxu0 %v2002_v51  ;;  %v2178_v19 = vld [vmem:[#allocation3 + $0x1748] sm:$0xff]  ;;  %v2177_v40 = vld [vmem:[#allocation3 + $0x1740] sm:$0xff]  ;;  %v2099_v50 = vld [vmem:[#allocation3 + $0x14d0] sm:$0xff] }
 0x506   :  { %2256 = vmatprep.subr.bf16.mxu1 %v2130_v24  ;;  %v2058_v26 = vld [vmem:[#allocation3 + $0x1388] sm:$0xff]  ;;  %v2057_v31 = vld [vmem:[#allocation3 + $0x1380] sm:$0xff]  ;;  %v1980_v51 = vld [vmem:[#allocation3 + $0x1118] sm:$0xff] }
 0x507   :  { %v2186_v43 = vld [vmem:[#allocation3 + $0x1788] sm:$0xff]  ;;  %v2185_v27 = vld [vmem:[#allocation3 + $0x1780] sm:$0xff]  ;;  %v2108_v24 = vld [vmem:[#allocation3 + $0x1518] sm:$0xff] }
 0x508   :  { %2216 = vmatpush1.bf16.msra.mxu0 %v2001_v52  ;;  %v2066_v56 = vld [vmem:[#allocation3 + $0x13c8] sm:$0xff]  ;;  %v2065_v58 = vld [vmem:[#allocation3 + $0x13c0] sm:$0xff]  ;;  %v1979_v52 = vld [vmem:[#allocation3 + $0x1110] sm:$0xff] }
 0x509   :  { %2257 = vmatpush1.bf16.msra.mxu1 %v2129_v53  ;;  %2217 = vmatprep.subr.bf16.mxu0 %v2010_v13  ;;  %v2194_v57 = vld [vmem:[#allocation3 + $0x17c8] sm:$0xff]  ;;  %v2193_v63 = vld [vmem:[#allocation3 + $0x17c0] sm:$0xff]  ;;  %v2107_v53 = vld [vmem:[#allocation3 + $0x1510] sm:$0xff] }
 0x50a   :  { %2258 = vmatprep.subr.bf16.mxu1 %v2138_v62  ;;  %v5172_v18 = vld [vmem:[#allocation44_spill] sm:$0xff]  ;;  %v5173_v20 = vld [vmem:[#allocation45_spill] sm:$0xff] }
 0x50b   :  { %v1988_v13 = vld [vmem:[#allocation3 + $0x1158] sm:$0xff] }
 0x50c   :  { %2218 = vmatpush1.bf16.msra.mxu0 %v2009_v11  ;;  %v2116_v62 = vld [vmem:[#allocation3 + $0x1558] sm:$0xff]  ;;  %v1987_v11 = vld [vmem:[#allocation3 + $0x1150] sm:$0xff] }
 0x50d   :  { %2259 = vmatpush1.bf16.msra.mxu1 %v2137_v3  ;;  %2219 = vmatprep.subr.bf16.mxu0 %v2018_v39  ;;  %v2115_v3 = vld [vmem:[#allocation3 + $0x1550] sm:$0xff]  ;;  %v1996_v39 = vld [vmem:[#allocation3 + $0x1198] sm:$0xff] }
 0x50e   :  { %2260 = vmatprep.subr.bf16.mxu1 %v2146_v29  ;;  %v2124_v29 = vld [vmem:[#allocation3 + $0x1598] sm:$0xff] }
 0x510   :  { %2220 = vmatpush1.bf16.msra.mxu0 %v2017_v45  ;;  %v1995_v45 = vld [vmem:[#allocation3 + $0x1190] sm:$0xff] }
 0x511   :  { %2261 = vmatpush1.bf16.msra.mxu1 %v2145_v28  ;;  %2221 = vmatprep.subr.bf16.mxu0 %v2026_v9  ;;  %v2123_v28 = vld [vmem:[#allocation3 + $0x1590] sm:$0xff]  ;;  %v2004_v9 = vld [vmem:[#allocation3 + $0x11d8] sm:$0xff] }
 0x512   :  { %2262 = vmatprep.subr.bf16.mxu1 %v2154_v8  ;;  %v2132_v8 = vld [vmem:[#allocation3 + $0x15d8] sm:$0xff] }
 0x514   :  { %2222 = vmatpush1.bf16.msra.mxu0 %v2025_v55  ;;  %v2003_v55 = vld [vmem:[#allocation3 + $0x11d0] sm:$0xff] }
 0x515   :  { %2263 = vmatpush1.bf16.msra.mxu1 %v2153_v32  ;;  %2223 = vmatprep.subr.bf16.mxu0 %v2034_v61  ;;  %v2131_v32 = vld [vmem:[#allocation3 + $0x15d0] sm:$0xff]  ;;  %v2012_v61 = vld [vmem:[#allocation3 + $0x1218] sm:$0xff] }
 0x516   :  { %2264 = vmatprep.subr.bf16.mxu1 %v2162_v59  ;;  %v2140_v59 = vld [vmem:[#allocation3 + $0x1618] sm:$0xff] }
 0x518   :  { %2224 = vmatpush1.bf16.msra.mxu0 %v2033_v60  ;;  %v2011_v60 = vld [vmem:[#allocation3 + $0x1210] sm:$0xff] }
 0x519   :  { %2265 = vmatpush1.bf16.msra.mxu1 %v2161_v0  ;;  %2225 = vmatprep.subr.bf16.mxu0 %v2042_v1  ;;  %v2139_v0 = vld [vmem:[#allocation3 + $0x1610] sm:$0xff]  ;;  %v2020_v1 = vld [vmem:[#allocation3 + $0x1258] sm:$0xff] }
 0x51a   :  { %2266 = vmatprep.subr.bf16.mxu1 %v2170_v37  ;;  %v2148_v37 = vld [vmem:[#allocation3 + $0x1658] sm:$0xff] }
 0x51c   :  { %2226 = vmatpush1.bf16.msra.mxu0 %v2041_v35  ;;  %v2019_v35 = vld [vmem:[#allocation3 + $0x1250] sm:$0xff] }
 0x51d   :  { %2267 = vmatpush1.bf16.msra.mxu1 %v2169_v14  ;;  %2227 = vmatprep.subr.bf16.mxu0 %v2050_v25  ;;  %v2147_v14 = vld [vmem:[#allocation3 + $0x1650] sm:$0xff]  ;;  %v2028_v25 = vld [vmem:[#allocation3 + $0x1298] sm:$0xff] }
 0x51e   :  { %2268 = vmatprep.subr.bf16.mxu1 %v2178_v19  ;;  %v2156_v19 = vld [vmem:[#allocation3 + $0x1698] sm:$0xff] }
 0x520   :  { %2228 = vmatpush1.bf16.msra.mxu0 %v2049_v38  ;;  %v2027_v38 = vld [vmem:[#allocation3 + $0x1290] sm:$0xff] }
 0x521   :  { %2269 = vmatpush1.bf16.msra.mxu1 %v2177_v40  ;;  %2229 = vmatprep.subr.bf16.mxu0 %v2058_v26  ;;  %v2155_v40 = vld [vmem:[#allocation3 + $0x1690] sm:$0xff]  ;;  %v2036_v26 = vld [vmem:[#allocation3 + $0x12d8] sm:$0xff] }
 0x522   :  { %2270 = vmatprep.subr.bf16.mxu1 %v2186_v43  ;;  %v2164_v43 = vld [vmem:[#allocation3 + $0x16d8] sm:$0xff] }
 0x524   :  { %2230 = vmatpush1.bf16.msra.mxu0 %v2057_v31  ;;  %v2035_v31 = vld [vmem:[#allocation3 + $0x12d0] sm:$0xff] }
 0x525   :  { %2271 = vmatpush1.bf16.msra.mxu1 %v2185_v27  ;;  %2231 = vmatprep.subr.bf16.mxu0 %v2066_v56  ;;  %v2163_v27 = vld [vmem:[#allocation3 + $0x16d0] sm:$0xff]  ;;  %v2044_v56 = vld [vmem:[#allocation3 + $0x1318] sm:$0xff] }
 0x526   :  { %2272 = vmatprep.subr.bf16.mxu1 %v2194_v57  ;;  %v2172_v57 = vld [vmem:[#allocation3 + $0x1718] sm:$0xff] }
 0x528   :  { %2232 = vmatpush1.bf16.msra.mxu0 %v2065_v58  ;;  %v2043_v58 = vld [vmem:[#allocation3 + $0x1310] sm:$0xff] }
 0x529   :  { %2273 = vmatpush1.bf16.msra.mxu1 %v2193_v63  ;;  %2283 = vmatprep.subr.bf16.mxu0 %v1948_v4  ;;  %v2171_v63 = vld [vmem:[#allocation3 + $0x1710] sm:$0xff]  ;;  %v2052_v4 = vld [vmem:[#allocation3 + $0x1358] sm:$0xff] }
 0x52a   :  { %2324 = vmatprep.subr.bf16.mxu1 %v2076_v33  ;;  %v2180_v33 = vld [vmem:[#allocation3 + $0x1758] sm:$0xff] }
 0x52b   :  { %2234 = vmatmul.mubr.bf16.vlgmr.msra.gmra.mrb[48].mxu0 %v5172_v18 }
 0x52c   :  { %2275 = vmatmul.mubr.bf16.vlgmr.msra.gmra.mrb[48].mxu1 %v5173_v20  ;;  %2284 = vmatpush1.bf16.msra.mxu0 %v1947_v34  ;;  %v2051_v34 = vld [vmem:[#allocation3 + $0x1350] sm:$0xff] }
 0x52d   :  { %2325 = vmatpush1.bf16.msra.mxu1 %v2075_v12  ;;  %2285 = vmatprep.subr.bf16.mxu0 %v1956_v15  ;;  %v2179_v12 = vld [vmem:[#allocation3 + $0x1750] sm:$0xff]  ;;  %v2060_v15 = vld [vmem:[#allocation3 + $0x1398] sm:$0xff] }
 0x52e   :  { %2326 = vmatprep.subr.bf16.mxu1 %v2084_v2  ;;  %2315 = vmatprep.mubr.bf16.mxu0 %v5170_v10  ;;  %v2188_v2 = vld [vmem:[#allocation3 + $0x1798] sm:$0xff] }
 0x52f   :  { %2356 = vmatprep.mubr.bf16.mxu1 %v5171_v36 }
 0x530   :  { %2286 = vmatpush1.bf16.msra.mxu0 %v1955_v21  ;;  %v2059_v21 = vld [vmem:[#allocation3 + $0x1390] sm:$0xff] }
 0x531   :  { %2327 = vmatpush1.bf16.msra.mxu1 %v2083_v22  ;;  %2287 = vmatprep.subr.bf16.mxu0 %v1964_v41  ;;  %v2187_v22 = vld [vmem:[#allocation3 + $0x1790] sm:$0xff]  ;;  %v2068_v41 = vld [vmem:[#allocation3 + $0x13d8] sm:$0xff] }
 0x532   :  { %2328 = vmatprep.subr.bf16.mxu1 %v2092_v42  ;;  %v2196_v42 = vld [vmem:[#allocation3 + $0x17d8] sm:$0xff] }
 0x534   :  { %2288 = vmatpush1.bf16.msra.mxu0 %v1963_v46  ;;  %v2067_v46 = vld [vmem:[#allocation3 + $0x13d0] sm:$0xff] }
 0x535   :  { %2329 = vmatpush1.bf16.msra.mxu1 %v2091_v47  ;;  %2289 = vmatprep.subr.bf16.mxu0 %v1972_v49  ;;  %v2195_v47 = vld [vmem:[#allocation3 + $0x17d0] sm:$0xff]  ;;  %v1950_v49 = vld [vmem:[#allocation3 + $0x1028] sm:$0xff] }
 0x536   :  { %2330 = vmatprep.subr.bf16.mxu1 %v2100_v23  ;;  %v2078_v23 = vld [vmem:[#allocation3 + $0x1428] sm:$0xff] }
 0x538   :  { %2290 = vmatpush1.bf16.msra.mxu0 %v1971_v30  ;;  %v1949_v30 = vld [vmem:[#allocation3 + $0x1020] sm:$0xff] }
 0x539   :  { %2331 = vmatpush1.bf16.msra.mxu1 %v2099_v50  ;;  %2291 = vmatprep.subr.bf16.mxu0 %v1980_v51  ;;  %v2077_v50 = vld [vmem:[#allocation3 + $0x1420] sm:$0xff]  ;;  %v1958_v51 = vld [vmem:[#allocation3 + $0x1068] sm:$0xff] }
 0x53a   :  { %2332 = vmatprep.subr.bf16.mxu1 %v2108_v24  ;;  %v2086_v24 = vld [vmem:[#allocation3 + $0x1468] sm:$0xff] }
 0x53c   :  { %2292 = vmatpush1.bf16.msra.mxu0 %v1979_v52  ;;  %v1957_v52 = vld [vmem:[#allocation3 + $0x1060] sm:$0xff] }
 0x53d   :  { %2333 = vmatpush1.bf16.msra.mxu1 %v2107_v53  ;;  %2293 = vmatprep.subr.bf16.mxu0 %v1988_v13  ;;  %v2085_v53 = vld [vmem:[#allocation3 + $0x1460] sm:$0xff]  ;;  %v1966_v13 = vld [vmem:[#allocation3 + $0x10a8] sm:$0xff] }
 0x53e   :  { %2334 = vmatprep.subr.bf16.mxu1 %v2116_v62  ;;  %v2094_v62 = vld [vmem:[#allocation3 + $0x14a8] sm:$0xff] }
 0x540   :  { %2294 = vmatpush1.bf16.msra.mxu0 %v1987_v11  ;;  %v1965_v11 = vld [vmem:[#allocation3 + $0x10a0] sm:$0xff] }
 0x541   :  { %2335 = vmatpush1.bf16.msra.mxu1 %v2115_v3  ;;  %2295 = vmatprep.subr.bf16.mxu0 %v1996_v39  ;;  %v2093_v3 = vld [vmem:[#allocation3 + $0x14a0] sm:$0xff]  ;;  %v1974_v39 = vld [vmem:[#allocation3 + $0x10e8] sm:$0xff] }
 0x542   :  { %2336 = vmatprep.subr.bf16.mxu1 %v2124_v29  ;;  %v2102_v29 = vld [vmem:[#allocation3 + $0x14e8] sm:$0xff] }
 0x544   :  { %2296 = vmatpush1.bf16.msra.mxu0 %v1995_v45  ;;  %v1973_v45 = vld [vmem:[#allocation3 + $0x10e0] sm:$0xff] }
 0x545   :  { %2337 = vmatpush1.bf16.msra.mxu1 %v2123_v28  ;;  %2297 = vmatprep.subr.bf16.mxu0 %v2004_v9  ;;  %v2101_v28 = vld [vmem:[#allocation3 + $0x14e0] sm:$0xff]  ;;  %v1982_v9 = vld [vmem:[#allocation3 + $0x1128] sm:$0xff] }
 0x546   :  { %2338 = vmatprep.subr.bf16.mxu1 %v2132_v8  ;;  %v2110_v8 = vld [vmem:[#allocation3 + $0x1528] sm:$0xff] }
 0x548   :  { %2298 = vmatpush1.bf16.msra.mxu0 %v2003_v55  ;;  %v1981_v55 = vld [vmem:[#allocation3 + $0x1120] sm:$0xff] }
 0x549   :  { %2339 = vmatpush1.bf16.msra.mxu1 %v2131_v32  ;;  %2299 = vmatprep.subr.bf16.mxu0 %v2012_v61  ;;  %v2109_v32 = vld [vmem:[#allocation3 + $0x1520] sm:$0xff]  ;;  %v1990_v61 = vld [vmem:[#allocation3 + $0x1168] sm:$0xff] }
 0x54a   :  { %2340 = vmatprep.subr.bf16.mxu1 %v2140_v59  ;;  %v2118_v59 = vld [vmem:[#allocation3 + $0x1568] sm:$0xff] }
 0x54c   :  { %2300 = vmatpush1.bf16.msra.mxu0 %v2011_v60  ;;  %v1989_v60 = vld [vmem:[#allocation3 + $0x1160] sm:$0xff] }
 0x54d   :  { %2341 = vmatpush1.bf16.msra.mxu1 %v2139_v0  ;;  %2301 = vmatprep.subr.bf16.mxu0 %v2020_v1  ;;  %v2117_v0 = vld [vmem:[#allocation3 + $0x1560] sm:$0xff]  ;;  %v1998_v1 = vld [vmem:[#allocation3 + $0x11a8] sm:$0xff] }
 0x54e   :  { %2342 = vmatprep.subr.bf16.mxu1 %v2148_v37  ;;  %v2126_v37 = vld [vmem:[#allocation3 + $0x15a8] sm:$0xff] }
 0x550   :  { %2302 = vmatpush1.bf16.msra.mxu0 %v2019_v35  ;;  %v1997_v35 = vld [vmem:[#allocation3 + $0x11a0] sm:$0xff] }
 0x551   :  { %2343 = vmatpush1.bf16.msra.mxu1 %v2147_v14  ;;  %2303 = vmatprep.subr.bf16.mxu0 %v2028_v25  ;;  %v2125_v14 = vld [vmem:[#allocation3 + $0x15a0] sm:$0xff]  ;;  %v2006_v25 = vld [vmem:[#allocation3 + $0x11e8] sm:$0xff] }
 0x552   :  { %2344 = vmatprep.subr.bf16.mxu1 %v2156_v19  ;;  %v2134_v19 = vld [vmem:[#allocation3 + $0x15e8] sm:$0xff] }
 0x554   :  { %2304 = vmatpush1.bf16.msra.mxu0 %v2027_v38  ;;  %v2005_v38 = vld [vmem:[#allocation3 + $0x11e0] sm:$0xff] }
 0x555   :  { %2345 = vmatpush1.bf16.msra.mxu1 %v2155_v40  ;;  %2305 = vmatprep.subr.bf16.mxu0 %v2036_v26  ;;  %v2133_v40 = vld [vmem:[#allocation3 + $0x15e0] sm:$0xff]  ;;  %v2014_v26 = vld [vmem:[#allocation3 + $0x1228] sm:$0xff] }
 0x556   :  { %2346 = vmatprep.subr.bf16.mxu1 %v2164_v43  ;;  %v2142_v43 = vld [vmem:[#allocation3 + $0x1628] sm:$0xff] }
 0x558   :  { %2306 = vmatpush1.bf16.msra.mxu0 %v2035_v31  ;;  %v2013_v31 = vld [vmem:[#allocation3 + $0x1220] sm:$0xff] }
 0x559   :  { %2347 = vmatpush1.bf16.msra.mxu1 %v2163_v27  ;;  %2307 = vmatprep.subr.bf16.mxu0 %v2044_v56  ;;  %v2141_v27 = vld [vmem:[#allocation3 + $0x1620] sm:$0xff]  ;;  %v2022_v56 = vld [vmem:[#allocation3 + $0x1268] sm:$0xff] }
 0x55a   :  { %2348 = vmatprep.subr.bf16.mxu1 %v2172_v57  ;;  %v2150_v57 = vld [vmem:[#allocation3 + $0x1668] sm:$0xff] }
 0x55c   :  { %2308 = vmatpush1.bf16.msra.mxu0 %v2043_v58  ;;  %v2021_v58 = vld [vmem:[#allocation3 + $0x1260] sm:$0xff] }
 0x55d   :  { %2349 = vmatpush1.bf16.msra.mxu1 %v2171_v63  ;;  %2309 = vmatprep.subr.bf16.mxu0 %v2052_v4  ;;  %v2149_v63 = vld [vmem:[#allocation3 + $0x1660] sm:$0xff]  ;;  %v2030_v4 = vld [vmem:[#allocation3 + $0x12a8] sm:$0xff] }
 0x55e   :  { %2350 = vmatprep.subr.bf16.mxu1 %v2180_v33  ;;  %v2158_v33 = vld [vmem:[#allocation3 + $0x16a8] sm:$0xff] }
 0x560   :  { %2310 = vmatpush1.bf16.msra.mxu0 %v2051_v34  ;;  %v2029_v34 = vld [vmem:[#allocation3 + $0x12a0] sm:$0xff] }
 0x561   :  { %2351 = vmatpush1.bf16.msra.mxu1 %v2179_v12  ;;  %2311 = vmatprep.subr.bf16.mxu0 %v2060_v15  ;;  %v2157_v12 = vld [vmem:[#allocation3 + $0x16a0] sm:$0xff]  ;;  %v2038_v15 = vld [vmem:[#allocation3 + $0x12e8] sm:$0xff] }
 0x562   :  { %2352 = vmatprep.subr.bf16.mxu1 %v2188_v2  ;;  %v2166_v2 = vld [vmem:[#allocation3 + $0x16e8] sm:$0xff] }
 0x564   :  { %2312 = vmatpush1.bf16.msra.mxu0 %v2059_v21  ;;  %v2037_v21 = vld [vmem:[#allocation3 + $0x12e0] sm:$0xff] }
 0x565   :  { %2353 = vmatpush1.bf16.msra.mxu1 %v2187_v22  ;;  %2313 = vmatprep.subr.bf16.mxu0 %v2068_v41  ;;  %v2165_v22 = vld [vmem:[#allocation3 + $0x16e0] sm:$0xff]  ;;  %v2046_v41 = vld [vmem:[#allocation3 + $0x1328] sm:$0xff] }
 0x566   :  { %2354 = vmatprep.subr.bf16.mxu1 %v2196_v42  ;;  %v2174_v42 = vld [vmem:[#allocation3 + $0x1728] sm:$0xff] }
 0x568   :  { %2314 = vmatpush1.bf16.msra.mxu0 %v2067_v46  ;;  %v2045_v46 = vld [vmem:[#allocation3 + $0x1320] sm:$0xff] }
 0x569   :  { %2355 = vmatpush1.bf16.msra.mxu1 %v2195_v47  ;;  %2365 = vmatprep.subr.bf16.mxu0 %v1950_v49  ;;  %v2173_v47 = vld [vmem:[#allocation3 + $0x1720] sm:$0xff]  ;;  %v2054_v49 = vld [vmem:[#allocation3 + $0x1368] sm:$0xff] }
 0x56a   :  { %2406 = vmatprep.subr.bf16.mxu1 %v2078_v23  ;;  %v2182_v23 = vld [vmem:[#allocation3 + $0x1768] sm:$0xff] }
 0x56b   :  { %2316 = vmatmul.mubr.bf16.vlgmr.msra.gmra.mrb[52].mxu0 %v5172_v18 }
 0x56c   :  { %2357 = vmatmul.mubr.bf16.vlgmr.msra.gmra.mrb[52].mxu1 %v5173_v20  ;;  %2366 = vmatpush1.bf16.msra.mxu0 %v1949_v30  ;;  %v2053_v30 = vld [vmem:[#allocation3 + $0x1360] sm:$0xff] }
 0x56d   :  { %2407 = vmatpush1.bf16.msra.mxu1 %v2077_v50  ;;  %2367 = vmatprep.subr.bf16.mxu0 %v1958_v51  ;;  %v2181_v50 = vld [vmem:[#allocation3 + $0x1760] sm:$0xff]  ;;  %v2062_v51 = vld [vmem:[#allocation3 + $0x13a8] sm:$0xff] }
 0x56e   :  { %2408 = vmatprep.subr.bf16.mxu1 %v2086_v24  ;;  %2397 = vmatprep.mubr.bf16.mxu0 %v5170_v10  ;;  %v2190_v24 = vld [vmem:[#allocation3 + $0x17a8] sm:$0xff] }
 0x56f   :  { %2438 = vmatprep.mubr.bf16.mxu1 %v5171_v36 }
 0x570   :  { %2368 = vmatpush1.bf16.msra.mxu0 %v1957_v52  ;;  %v2061_v52 = vld [vmem:[#allocation3 + $0x13a0] sm:$0xff] }
 0x571   :  { %2409 = vmatpush1.bf16.msra.mxu1 %v2085_v53  ;;  %2369 = vmatprep.subr.bf16.mxu0 %v1966_v13  ;;  %v2189_v53 = vld [vmem:[#allocation3 + $0x17a0] sm:$0xff]  ;;  %v2070_v13 = vld [vmem:[#allocation3 + $0x13e8] sm:$0xff] }
 0x572   :  { %2410 = vmatprep.subr.bf16.mxu1 %v2094_v62  ;;  %v2198_v62 = vld [vmem:[#allocation3 + $0x17e8] sm:$0xff] }
 0x574   :  { %2370 = vmatpush1.bf16.msra.mxu0 %v1965_v11  ;;  %v2069_v11 = vld [vmem:[#allocation3 + $0x13e0] sm:$0xff] }
 0x575   :  { %2411 = vmatpush1.bf16.msra.mxu1 %v2093_v3  ;;  %2371 = vmatprep.subr.bf16.mxu0 %v1974_v39  ;;  %v2197_v3 = vld [vmem:[#allocation3 + $0x17e0] sm:$0xff]  ;;  %v1952_v39 = vld [vmem:[#allocation3 + $0x1038] sm:$0xff] }
 0x576   :  { %2412 = vmatprep.subr.bf16.mxu1 %v2102_v29  ;;  %v2080_v29 = vld [vmem:[#allocation3 + $0x1438] sm:$0xff] }
 0x578   :  { %2372 = vmatpush1.bf16.msra.mxu0 %v1973_v45  ;;  %v1951_v45 = vld [vmem:[#allocation3 + $0x1030] sm:$0xff] }
 0x579   :  { %2413 = vmatpush1.bf16.msra.mxu1 %v2101_v28  ;;  %2373 = vmatprep.subr.bf16.mxu0 %v1982_v9  ;;  %v2079_v28 = vld [vmem:[#allocation3 + $0x1430] sm:$0xff]  ;;  %v1960_v9 = vld [vmem:[#allocation3 + $0x1078] sm:$0xff] }
 0x57a   :  { %2414 = vmatprep.subr.bf16.mxu1 %v2110_v8  ;;  %v2088_v8 = vld [vmem:[#allocation3 + $0x1478] sm:$0xff] }
 0x57c   :  { %2374 = vmatpush1.bf16.msra.mxu0 %v1981_v55  ;;  %v1959_v55 = vld [vmem:[#allocation3 + $0x1070] sm:$0xff] }
 0x57d   :  { %2415 = vmatpush1.bf16.msra.mxu1 %v2109_v32  ;;  %2375 = vmatprep.subr.bf16.mxu0 %v1990_v61  ;;  %v2087_v32 = vld [vmem:[#allocation3 + $0x1470] sm:$0xff]  ;;  %v1968_v61 = vld [vmem:[#allocation3 + $0x10b8] sm:$0xff] }
 0x57e   :  { %2416 = vmatprep.subr.bf16.mxu1 %v2118_v59  ;;  %v2096_v59 = vld [vmem:[#allocation3 + $0x14b8] sm:$0xff] }
 0x580   :  { %2376 = vmatpush1.bf16.msra.mxu0 %v1989_v60  ;;  %v1967_v60 = vld [vmem:[#allocation3 + $0x10b0] sm:$0xff] }
 0x581   :  { %2417 = vmatpush1.bf16.msra.mxu1 %v2117_v0  ;;  %2377 = vmatprep.subr.bf16.mxu0 %v1998_v1  ;;  %v2095_v0 = vld [vmem:[#allocation3 + $0x14b0] sm:$0xff]  ;;  %v1976_v1 = vld [vmem:[#allocation3 + $0x10f8] sm:$0xff] }
 0x582   :  { %2418 = vmatprep.subr.bf16.mxu1 %v2126_v37  ;;  %v2104_v37 = vld [vmem:[#allocation3 + $0x14f8] sm:$0xff] }
 0x584   :  { %2378 = vmatpush1.bf16.msra.mxu0 %v1997_v35  ;;  %v1975_v35 = vld [vmem:[#allocation3 + $0x10f0] sm:$0xff] }
 0x585   :  { %2419 = vmatpush1.bf16.msra.mxu1 %v2125_v14  ;;  %2379 = vmatprep.subr.bf16.mxu0 %v2006_v25  ;;  %v2103_v14 = vld [vmem:[#allocation3 + $0x14f0] sm:$0xff]  ;;  %v1984_v25 = vld [vmem:[#allocation3 + $0x1138] sm:$0xff] }
 0x586   :  { %2420 = vmatprep.subr.bf16.mxu1 %v2134_v19  ;;  %v2112_v19 = vld [vmem:[#allocation3 + $0x1538] sm:$0xff] }
 0x588   :  { %2380 = vmatpush1.bf16.msra.mxu0 %v2005_v38  ;;  %v1992_v38 = vld [vmem:[#allocation3 + $0x1178] sm:$0xff] }
 0x589   :  { %2421 = vmatpush1.bf16.msra.mxu1 %v2133_v40  ;;  %2381 = vmatprep.subr.bf16.mxu0 %v2014_v26  ;;  %v2120_v40 = vld [vmem:[#allocation3 + $0x1578] sm:$0xff]  ;;  %v1991_v26 = vld [vmem:[#allocation3 + $0x1170] sm:$0xff] }
 0x58a   :  { %2422 = vmatprep.subr.bf16.mxu1 %v2142_v43  ;;  %v2119_v43 = vld [vmem:[#allocation3 + $0x1570] sm:$0xff] }
 0x58c   :  { %2382 = vmatpush1.bf16.msra.mxu0 %v2013_v31  ;;  %v2000_v31 = vld [vmem:[#allocation3 + $0x11b8] sm:$0xff] }
 0x58d   :  { %2423 = vmatpush1.bf16.msra.mxu1 %v2141_v27  ;;  %2383 = vmatprep.subr.bf16.mxu0 %v2022_v56  ;;  %v2128_v27 = vld [vmem:[#allocation3 + $0x15b8] sm:$0xff]  ;;  %v1999_v56 = vld [vmem:[#allocation3 + $0x11b0] sm:$0xff] }
 0x58e   :  { %2424 = vmatprep.subr.bf16.mxu1 %v2150_v57  ;;  %v2127_v57 = vld [vmem:[#allocation3 + $0x15b0] sm:$0xff] }
 0x590   :  { %2384 = vmatpush1.bf16.msra.mxu0 %v2021_v58  ;;  %v2008_v58 = vld [vmem:[#allocation3 + $0x11f8] sm:$0xff] }
 0x591   :  { %2425 = vmatpush1.bf16.msra.mxu1 %v2149_v63  ;;  %2385 = vmatprep.subr.bf16.mxu0 %v2030_v4  ;;  %v2136_v63 = vld [vmem:[#allocation3 + $0x15f8] sm:$0xff]  ;;  %v2007_v4 = vld [vmem:[#allocation3 + $0x11f0] sm:$0xff] }
 0x592   :  { %2426 = vmatprep.subr.bf16.mxu1 %v2158_v33  ;;  %v2135_v33 = vld [vmem:[#allocation3 + $0x15f0] sm:$0xff] }
 0x594   :  { %2386 = vmatpush1.bf16.msra.mxu0 %v2029_v34  ;;  %v2016_v34 = vld [vmem:[#allocation3 + $0x1238] sm:$0xff] }
 0x595   :  { %2427 = vmatpush1.bf16.msra.mxu1 %v2157_v12  ;;  %2387 = vmatprep.subr.bf16.mxu0 %v2038_v15  ;;  %v2144_v12 = vld [vmem:[#allocation3 + $0x1638] sm:$0xff]  ;;  %v2015_v15 = vld [vmem:[#allocation3 + $0x1230] sm:$0xff] }
 0x596   :  { %2428 = vmatprep.subr.bf16.mxu1 %v2166_v2  ;;  %v2143_v2 = vld [vmem:[#allocation3 + $0x1630] sm:$0xff] }
 0x598   :  { %2388 = vmatpush1.bf16.msra.mxu0 %v2037_v21  ;;  %v2024_v21 = vld [vmem:[#allocation3 + $0x1278] sm:$0xff] }
 0x599   :  { %2429 = vmatpush1.bf16.msra.mxu1 %v2165_v22  ;;  %2389 = vmatprep.subr.bf16.mxu0 %v2046_v41  ;;  %v2152_v22 = vld [vmem:[#allocation3 + $0x1678] sm:$0xff]  ;;  %v2023_v41 = vld [vmem:[#allocation3 + $0x1270] sm:$0xff] }
 0x59a   :  { %2430 = vmatprep.subr.bf16.mxu1 %v2174_v42  ;;  %v2151_v42 = vld [vmem:[#allocation3 + $0x1670] sm:$0xff] }
 0x59c   :  { %2390 = vmatpush1.bf16.msra.mxu0 %v2045_v46  ;;  %v2032_v46 = vld [vmem:[#allocation3 + $0x12b8] sm:$0xff] }
 0x59d   :  { %2431 = vmatpush1.bf16.msra.mxu1 %v2173_v47  ;;  %2391 = vmatprep.subr.bf16.mxu0 %v2054_v49  ;;  %v2160_v47 = vld [vmem:[#allocation3 + $0x16b8] sm:$0xff]  ;;  %v2031_v49 = vld [vmem:[#allocation3 + $0x12b0] sm:$0xff] }
 0x59e   :  { %2432 = vmatprep.subr.bf16.mxu1 %v2182_v23  ;;  %v2159_v23 = vld [vmem:[#allocation3 + $0x16b0] sm:$0xff] }
 0x5a0   :  { %2392 = vmatpush1.bf16.msra.mxu0 %v2053_v30  ;;  %v2040_v30 = vld [vmem:[#allocation3 + $0x12f8] sm:$0xff] }
 0x5a1   :  { %2433 = vmatpush1.bf16.msra.mxu1 %v2181_v50  ;;  %2393 = vmatprep.subr.bf16.mxu0 %v2062_v51  ;;  %v2168_v50 = vld [vmem:[#allocation3 + $0x16f8] sm:$0xff]  ;;  %v2039_v51 = vld [vmem:[#allocation3 + $0x12f0] sm:$0xff] }
 0x5a2   :  { %2434 = vmatprep.subr.bf16.mxu1 %v2190_v24  ;;  %v2167_v24 = vld [vmem:[#allocation3 + $0x16f0] sm:$0xff] }
 0x5a4   :  { %2394 = vmatpush1.bf16.msra.mxu0 %v2061_v52  ;;  %v2048_v52 = vld [vmem:[#allocation3 + $0x1338] sm:$0xff] }
 0x5a5   :  { %2435 = vmatpush1.bf16.msra.mxu1 %v2189_v53  ;;  %2395 = vmatprep.subr.bf16.mxu0 %v2070_v13  ;;  %v2176_v53 = vld [vmem:[#allocation3 + $0x1738] sm:$0xff]  ;;  %v2047_v13 = vld [vmem:[#allocation3 + $0x1330] sm:$0xff] }
 0x5a6   :  { %2436 = vmatprep.subr.bf16.mxu1 %v2198_v62  ;;  %v2175_v62 = vld [vmem:[#allocation3 + $0x1730] sm:$0xff] }
 0x5a8   :  { %2396 = vmatpush1.bf16.msra.mxu0 %v2069_v11  ;;  %v2056_v11 = vld [vmem:[#allocation3 + $0x1378] sm:$0xff] }
 0x5a9   :  { %2437 = vmatpush1.bf16.msra.mxu1 %v2197_v3  ;;  %2447 = vmatprep.subr.bf16.mxu0 %v1952_v39  ;;  %v2184_v3 = vld [vmem:[#allocation3 + $0x1778] sm:$0xff]  ;;  %v2055_v39 = vld [vmem:[#allocation3 + $0x1370] sm:$0xff] }
 0x5aa   :  { %2488 = vmatprep.subr.bf16.mxu1 %v2080_v29  ;;  %v2183_v29 = vld [vmem:[#allocation3 + $0x1770] sm:$0xff] }
 0x5ab   :  { %2398 = vmatmul.mubr.bf16.vlgmr.msra.gmra.mrb[56].mxu0 %v5172_v18 }
 0x5ac   :  { %2439 = vmatmul.mubr.bf16.vlgmr.msra.gmra.mrb[56].mxu1 %v5173_v20  ;;  %2448 = vmatpush1.bf16.msra.mxu0 %v1951_v45  ;;  %v2064_v45 = vld [vmem:[#allocation3 + $0x13b8] sm:$0xff] }
 0x5ad   :  { %2489 = vmatpush1.bf16.msra.mxu1 %v2079_v28  ;;  %2449 = vmatprep.subr.bf16.mxu0 %v1960_v9  ;;  %v2192_v28 = vld [vmem:[#allocation3 + $0x17b8] sm:$0xff]  ;;  %v2063_v9 = vld [vmem:[#allocation3 + $0x13b0] sm:$0xff] }
 0x5ae   :  { %2490 = vmatprep.subr.bf16.mxu1 %v2088_v8  ;;  %2479 = vmatprep.mubr.bf16.mxu0 %v5170_v10  ;;  %v1983_v10 = vld [vmem:[#allocation3 + $0x1130] sm:$0xff] }
 0x5af   :  { %2520 = vmatprep.mubr.bf16.mxu1 %v5171_v36  ;;  %v2111_v36 = vld [vmem:[#allocation3 + $0x1530] sm:$0xff] }
 0x5b0   :  { %2450 = vmatpush1.bf16.msra.mxu0 %v1959_v55  ;;  %v2191_v8 = vld [vmem:[#allocation3 + $0x17b0] sm:$0xff]  ;;  %v2072_v55 = vld [vmem:[#allocation3 + $0x13f8] sm:$0xff] }
 0x5b1   :  { %2491 = vmatpush1.bf16.msra.mxu1 %v2087_v32  ;;  %2451 = vmatprep.subr.bf16.mxu0 %v1968_v61  ;;  %v2200_v32 = vld [vmem:[#allocation3 + $0x17f8] sm:$0xff]  ;;  %v2071_v61 = vld [vmem:[#allocation3 + $0x13f0] sm:$0xff] }
 0x5b2   :  { %2492 = vmatprep.subr.bf16.mxu1 %v2096_v59  ;;  %v2199_v59 = vld [vmem:[#allocation3 + $0x17f0] sm:$0xff] }
 0x5b4   :  { %2452 = vmatpush1.bf16.msra.mxu0 %v1967_v60 }
 0x5b5   :  { %2493 = vmatpush1.bf16.msra.mxu1 %v2095_v0  ;;  %2453 = vmatprep.subr.bf16.mxu0 %v1976_v1 }
 0x5b6   :  { %2494 = vmatprep.subr.bf16.mxu1 %v2104_v37 }
 0x5b8   :  { %2454 = vmatpush1.bf16.msra.mxu0 %v1975_v35 }
 0x5b9   :  { %2495 = vmatpush1.bf16.msra.mxu1 %v2103_v14  ;;  %2455 = vmatprep.subr.bf16.mxu0 %v1984_v25 }
 0x5ba   :  { %2496 = vmatprep.subr.bf16.mxu1 %v2112_v19 }
 0x5bc   :  { %2456 = vmatpush1.bf16.msra.mxu0 %v1983_v10 }
 0x5bd   :  { %2497 = vmatpush1.bf16.msra.mxu1 %v2111_v36  ;;  %2457 = vmatprep.subr.bf16.mxu0 %v1992_v38 }
 0x5be   :  { %2498 = vmatprep.subr.bf16.mxu1 %v2120_v40 }
 0x5c0   :  { %2458 = vmatpush1.bf16.msra.mxu0 %v1991_v26 }
 0x5c1   :  { %2499 = vmatpush1.bf16.msra.mxu1 %v2119_v43  ;;  %2459 = vmatprep.subr.bf16.mxu0 %v2000_v31 }
 0x5c2   :  { %2500 = vmatprep.subr.bf16.mxu1 %v2128_v27 }
 0x5c4   :  { %2460 = vmatpush1.bf16.msra.mxu0 %v1999_v56 }
 0x5c5   :  { %2501 = vmatpush1.bf16.msra.mxu1 %v2127_v57  ;;  %2461 = vmatprep.subr.bf16.mxu0 %v2008_v58 }
 0x5c6   :  { %2502 = vmatprep.subr.bf16.mxu1 %v2136_v63 }
 0x5c8   :  { %2462 = vmatpush1.bf16.msra.mxu0 %v2007_v4 }
 0x5c9   :  { %2503 = vmatpush1.bf16.msra.mxu1 %v2135_v33  ;;  %2463 = vmatprep.subr.bf16.mxu0 %v2016_v34 }
 0x5ca   :  { %2504 = vmatprep.subr.bf16.mxu1 %v2144_v12 }
 0x5cc   :  { %2464 = vmatpush1.bf16.msra.mxu0 %v2015_v15 }
 0x5cd   :  { %2505 = vmatpush1.bf16.msra.mxu1 %v2143_v2  ;;  %2465 = vmatprep.subr.bf16.mxu0 %v2024_v21 }
 0x5ce   :  { %2506 = vmatprep.subr.bf16.mxu1 %v2152_v22 }
 0x5d0   :  { %2466 = vmatpush1.bf16.msra.mxu0 %v2023_v41 }
 0x5d1   :  { %2507 = vmatpush1.bf16.msra.mxu1 %v2151_v42  ;;  %2467 = vmatprep.subr.bf16.mxu0 %v2032_v46 }
 0x5d2   :  { %2508 = vmatprep.subr.bf16.mxu1 %v2160_v47 }
 0x5d4   :  { %2468 = vmatpush1.bf16.msra.mxu0 %v2031_v49 }
 0x5d5   :  { %2509 = vmatpush1.bf16.msra.mxu1 %v2159_v23  ;;  %2469 = vmatprep.subr.bf16.mxu0 %v2040_v30 }
 0x5d6   :  { %2510 = vmatprep.subr.bf16.mxu1 %v2168_v50 }
 0x5d8   :  { %2470 = vmatpush1.bf16.msra.mxu0 %v2039_v51 }
 0x5d9   :  { %2511 = vmatpush1.bf16.msra.mxu1 %v2167_v24  ;;  %2471 = vmatprep.subr.bf16.mxu0 %v2048_v52 }
 0x5da   :  { %2512 = vmatprep.subr.bf16.mxu1 %v2176_v53 }
 0x5dc   :  { %2472 = vmatpush1.bf16.msra.mxu0 %v2047_v13 }
 0x5dd   :  { %2513 = vmatpush1.bf16.msra.mxu1 %v2175_v62  ;;  %2473 = vmatprep.subr.bf16.mxu0 %v2056_v11 }
 0x5de   :  { %2514 = vmatprep.subr.bf16.mxu1 %v2184_v3 }
 0x5e0   :  { %2474 = vmatpush1.bf16.msra.mxu0 %v2055_v39 }
 0x5e1   :  { %2515 = vmatpush1.bf16.msra.mxu1 %v2183_v29  ;;  %2475 = vmatprep.subr.bf16.mxu0 %v2064_v45 }
 0x5e2   :  { %2516 = vmatprep.subr.bf16.mxu1 %v2192_v28 }
 0x5e4   :  { %2476 = vmatpush1.bf16.msra.mxu0 %v2063_v9 }
 0x5e5   :  { %2517 = vmatpush1.bf16.msra.mxu1 %v2191_v8  ;;  %2477 = vmatprep.subr.bf16.mxu0 %v2072_v55 }
 0x5e6   :  { %2518 = vmatprep.subr.bf16.mxu1 %v2200_v32 }
 0x5e8   :  { %2478 = vmatpush1.bf16.msra.mxu0 %v2071_v61 }
 0x5e9   :  { %2519 = vmatpush1.bf16.msra.mxu1 %v2199_v59 }
 0x5eb   :  { %2480 = vmatmul.mubr.bf16.vlgmr.msra.gmra.mrb[60].mxu0 %v5172_v18 }
 0x5ec   :  { %2521 = vmatmul.mubr.bf16.vlgmr.msra.gmra.mrb[60].mxu1 %v5173_v20 }
 0x5fe   :  { %v2235_v60 = vpop.f32.mrb[48].mxu0 }
 0x5ff   :  { %v2276_v0 = vpop.f32.mrb[48].mxu1  ;;  %v2237_v37 = vpop.f32.mrb[49].mxu0 }
 0x600   :  { %v2277_v1 = vadd.f32 %v2276_v0, %v2235_v60  ;;  %v2278_v35 = vpop.f32.mrb[49].mxu1  ;;  %v2239_v25 = vpop.f32.mrb[50].mxu0 }
 0x601   :  { %v2279_v14 = vadd.f32 %v2278_v35, %v2237_v37  ;;  %v2280_v19 = vpop.f32.mrb[50].mxu1  ;;  %v2240_v36 = vpop.f32.mrb[51].mxu0 }
 0x602   :  { %v4608_v10 = vadd.f32 %v2277_v1, %v4569_v44  ;;  %v2281_v38 = vpop.f32.mrb[51].mxu1 }
 0x603   :  { %v4611_v40 = vadd.f32 %v2279_v14, %v4571_v48 }
 0x63e   :  { %v2317_v26 = vpop.f32.mrb[52].mxu0 }
 0x63f   :  { %v2358_v18 = vpop.f32.mrb[52].mxu1  ;;  %v2319_v20 = vpop.f32.mrb[53].mxu0 }
 0x640   :  { %v2359_v43 = vadd.f32 %v2358_v18, %v2317_v26  ;;  %v2360_v31 = vpop.f32.mrb[53].mxu1  ;;  %v2321_v56 = vpop.f32.mrb[54].mxu0 }
 0x641   :  { %v2361_v27 = vadd.f32 %v2360_v31, %v2319_v20  ;;  %v2362_v57 = vpop.f32.mrb[54].mxu1  ;;  %v2322_v63 = vpop.f32.mrb[55].mxu0 }
 0x642   :  { %v4614_v58 = vadd.f32 %v2359_v43, %v4575_v54  ;;  %v2363_v4 = vpop.f32.mrb[55].mxu1 }
 0x643   :  { %v4617_v44 = vadd.f32 %v2361_v27, %v4577_v17 }
 0x67e   :  { %v2399_v33 = vpop.f32.mrb[56].mxu0 }
 0x67f   :  { %v2440_v34 = vpop.f32.mrb[56].mxu1  ;;  %v2401_v12 = vpop.f32.mrb[57].mxu0 }
 0x680   :  { %v2441_v48 = vadd.f32 %v2440_v34, %v2399_v33  ;;  %v2442_v15 = vpop.f32.mrb[57].mxu1  ;;  %v2403_v21 = vpop.f32.mrb[58].mxu0 }
 0x681   :  { %v2443_v2 = vadd.f32 %v2442_v15, %v2401_v12  ;;  %v2444_v22 = vpop.f32.mrb[58].mxu1  ;;  %v2404_v42 = vpop.f32.mrb[59].mxu0 }
 0x682   :  { %v4620_v41 = vadd.f32 %v2441_v48, %v4581_v5  ;;  %v2445_v46 = vpop.f32.mrb[59].mxu1 }
 0x683   :  { %v4623_v54 = vadd.f32 %v2443_v2, %v4583_v6 }
 0x6be   :  { %v2481_v47 = vpop.f32.mrb[60].mxu0 }
 0x6bf   :  { %v2522_v49 = vpop.f32.mrb[60].mxu1  ;;  %v2483_v23 = vpop.f32.mrb[61].mxu0 }
 0x6c0   :  { %v2523_v17 = vadd.f32 %v2522_v49, %v2481_v47  ;;  %v2524_v30 = vpop.f32.mrb[61].mxu1  ;;  %v2485_v51 = vpop.f32.mrb[62].mxu0 }
 0x6c1   :  { %v2525_v50 = vadd.f32 %v2524_v30, %v2483_v23  ;;  %v2526_v24 = vpop.f32.mrb[62].mxu1  ;;  %v2486_v53 = vpop.f32.mrb[63].mxu0 }
 0x6c2   :  { %v4626_v52 = vadd.f32 %v2523_v17, %v4587_v16  ;;  %v2527_v13 = vpop.f32.mrb[63].mxu1 }
 0x6c3   :  { %v4629_v5 = vadd.f32 %v2525_v50, %v4589_v7 }
 0x6c4   :  { %3473 = dma.done.wait [#allocation5 + $0x4], 32768 }
 0x6c5   :  { %3474 = vsyncadd [#allocation5 + $0x4], 4294934528  ;;  %v5174_v6 = vld [vmem:[#allocation50_spill] sm:$0xff]  ;;  %v5175_v62 = vld [vmem:[#allocation51_spill] sm:$0xff] }
 0x6c6   :  { %2827 = vmatprep.mubr.bf16.mxu0 %v5174_v6  ;;  %2868 = vmatprep.mubr.bf16.mxu1 %v5175_v62  ;;  %v2540_v11 = vld [vmem:[#allocation3 + $0x1808] sm:$0xff]  ;;  %v2539_v39 = vld [vmem:[#allocation3 + $0x1800] sm:$0xff] }
 0x6c7   :  { %v2668_v3 = vld [vmem:[#allocation3 + $0x1c08] sm:$0xff]  ;;  %2795 = vmatprep.subr.bf16.mxu0 %v2540_v11  ;;  %v2667_v29 = vld [vmem:[#allocation3 + $0x1c00] sm:$0xff] }
 0x6c8   :  { %2836 = vmatprep.subr.bf16.mxu1 %v2668_v3  ;;  %v2548_v45 = vld [vmem:[#allocation3 + $0x1848] sm:$0xff]  ;;  %2796 = vmatpush1.bf16.msra.mxu0 %v2539_v39  ;;  %v2547_v7 = vld [vmem:[#allocation3 + $0x1840] sm:$0xff] }
 0x6c9   :  { %v2676_v16 = vld [vmem:[#allocation3 + $0x1c48] sm:$0xff]  ;;  %2837 = vmatpush1.bf16.msra.mxu1 %v2667_v29  ;;  %2797 = vmatprep.subr.bf16.mxu0 %v2548_v45  ;;  %v2675_v28 = vld [vmem:[#allocation3 + $0x1c40] sm:$0xff] }
 0x6ca   :  { %2838 = vmatprep.subr.bf16.mxu1 %v2676_v16  ;;  %v2556_v9 = vld [vmem:[#allocation3 + $0x1888] sm:$0xff]  ;;  %v2555_v55 = vld [vmem:[#allocation3 + $0x1880] sm:$0xff] }
 0x6cb   :  { %v2684_v8 = vld [vmem:[#allocation3 + $0x1c88] sm:$0xff]  ;;  %v2683_v32 = vld [vmem:[#allocation3 + $0x1c80] sm:$0xff] }
 0x6cc   :  { %2798 = vmatpush1.bf16.msra.mxu0 %v2547_v7  ;;  %v2564_v61 = vld [vmem:[#allocation3 + $0x18c8] sm:$0xff]  ;;  %v2563_v60 = vld [vmem:[#allocation3 + $0x18c0] sm:$0xff] }
 0x6cd   :  { %2839 = vmatpush1.bf16.msra.mxu1 %v2675_v28  ;;  %2799 = vmatprep.subr.bf16.mxu0 %v2556_v9  ;;  %v2692_v59 = vld [vmem:[#allocation3 + $0x1cc8] sm:$0xff]  ;;  %v2691_v0 = vld [vmem:[#allocation3 + $0x1cc0] sm:$0xff] }
 0x6ce   :  { %2840 = vmatprep.subr.bf16.mxu1 %v2684_v8  ;;  %v2572_v1 = vld [vmem:[#allocation3 + $0x1908] sm:$0xff]  ;;  %v2571_v35 = vld [vmem:[#allocation3 + $0x1900] sm:$0xff] }
 0x6cf   :  { %v2700_v37 = vld [vmem:[#allocation3 + $0x1d08] sm:$0xff]  ;;  %v2699_v14 = vld [vmem:[#allocation3 + $0x1d00] sm:$0xff] }
 0x6d0   :  { %2800 = vmatpush1.bf16.msra.mxu0 %v2555_v55  ;;  %v2580_v25 = vld [vmem:[#allocation3 + $0x1948] sm:$0xff]  ;;  %v2579_v36 = vld [vmem:[#allocation3 + $0x1940] sm:$0xff]  ;;  %v2542_v55 = vld [vmem:[#allocation3 + $0x1818] sm:$0xff] }
 0x6d1   :  { %2841 = vmatpush1.bf16.msra.mxu1 %v2683_v32  ;;  %2801 = vmatprep.subr.bf16.mxu0 %v2564_v61  ;;  %v2708_v19 = vld [vmem:[#allocation3 + $0x1d48] sm:$0xff]  ;;  %v2707_v38 = vld [vmem:[#allocation3 + $0x1d40] sm:$0xff]  ;;  %v2670_v32 = vld [vmem:[#allocation3 + $0x1c18] sm:$0xff] }
 0x6d2   :  { %2842 = vmatprep.subr.bf16.mxu1 %v2692_v59  ;;  %v2588_v26 = vld [vmem:[#allocation3 + $0x1988] sm:$0xff]  ;;  %v2587_v43 = vld [vmem:[#allocation3 + $0x1980] sm:$0xff]  ;;  %v2541_v61 = vld [vmem:[#allocation3 + $0x1810] sm:$0xff] }
 0x6d3   :  { %v2716_v18 = vld [vmem:[#allocation3 + $0x1d88] sm:$0xff]  ;;  %v2715_v20 = vld [vmem:[#allocation3 + $0x1d80] sm:$0xff]  ;;  %v2669_v59 = vld [vmem:[#allocation3 + $0x1c10] sm:$0xff] }
 0x6d4   :  { %2802 = vmatpush1.bf16.msra.mxu0 %v2563_v60  ;;  %v2596_v31 = vld [vmem:[#allocation3 + $0x19c8] sm:$0xff]  ;;  %v2595_v56 = vld [vmem:[#allocation3 + $0x19c0] sm:$0xff]  ;;  %v2550_v60 = vld [vmem:[#allocation3 + $0x1858] sm:$0xff] }
 0x6d5   :  { %2843 = vmatpush1.bf16.msra.mxu1 %v2691_v0  ;;  %2803 = vmatprep.subr.bf16.mxu0 %v2572_v1  ;;  %v2724_v27 = vld [vmem:[#allocation3 + $0x1dc8] sm:$0xff]  ;;  %v2723_v57 = vld [vmem:[#allocation3 + $0x1dc0] sm:$0xff]  ;;  %v2678_v0 = vld [vmem:[#allocation3 + $0x1c58] sm:$0xff] }
 0x6d6   :  { %2844 = vmatprep.subr.bf16.mxu1 %v2700_v37  ;;  %v2604_v63 = vld [vmem:[#allocation3 + $0x1a08] sm:$0xff]  ;;  %v2603_v33 = vld [vmem:[#allocation3 + $0x1a00] sm:$0xff] }
 0x6d7   :  { %v2732_v4 = vld [vmem:[#allocation3 + $0x1e08] sm:$0xff]  ;;  %v2731_v34 = vld [vmem:[#allocation3 + $0x1e00] sm:$0xff] }
 0x6d8   :  { %2804 = vmatpush1.bf16.msra.mxu0 %v2571_v35  ;;  %v2612_v48 = vld [vmem:[#allocation3 + $0x1a48] sm:$0xff]  ;;  %v2611_v15 = vld [vmem:[#allocation3 + $0x1a40] sm:$0xff]  ;;  %v2549_v35 = vld [vmem:[#allocation3 + $0x1850] sm:$0xff] }
 0x6d9   :  { %2845 = vmatpush1.bf16.msra.mxu1 %v2699_v14  ;;  %2805 = vmatprep.subr.bf16.mxu0 %v2580_v25  ;;  %v2740_v12 = vld [vmem:[#allocation3 + $0x1e48] sm:$0xff]  ;;  %v2739_v2 = vld [vmem:[#allocation3 + $0x1e40] sm:$0xff]  ;;  %v2677_v14 = vld [vmem:[#allocation3 + $0x1c50] sm:$0xff] }
 0x6da   :  { %2846 = vmatprep.subr.bf16.mxu1 %v2708_v19  ;;  %v2620_v21 = vld [vmem:[#allocation3 + $0x1a88] sm:$0xff]  ;;  %v2619_v42 = vld [vmem:[#allocation3 + $0x1a80] sm:$0xff]  ;;  %v2558_v25 = vld [vmem:[#allocation3 + $0x1898] sm:$0xff] }
 0x6db   :  { %v2748_v22 = vld [vmem:[#allocation3 + $0x1e88] sm:$0xff]  ;;  %v2747_v46 = vld [vmem:[#allocation3 + $0x1e80] sm:$0xff]  ;;  %v2686_v19 = vld [vmem:[#allocation3 + $0x1c98] sm:$0xff] }
 0x6dc   :  { %2806 = vmatpush1.bf16.msra.mxu0 %v2579_v36  ;;  %v2628_v47 = vld [vmem:[#allocation3 + $0x1ac8] sm:$0xff]  ;;  %v2627_v17 = vld [vmem:[#allocation3 + $0x1ac0] sm:$0xff]  ;;  %v2557_v36 = vld [vmem:[#allocation3 + $0x1890] sm:$0xff] }
 0x6dd   :  { %2847 = vmatpush1.bf16.msra.mxu1 %v2707_v38  ;;  %2807 = vmatprep.subr.bf16.mxu0 %v2588_v26  ;;  %v2756_v49 = vld [vmem:[#allocation3 + $0x1ec8] sm:$0xff]  ;;  %v2755_v23 = vld [vmem:[#allocation3 + $0x1ec0] sm:$0xff]  ;;  %v2685_v38 = vld [vmem:[#allocation3 + $0x1c90] sm:$0xff] }
 0x6de   :  { %2848 = vmatprep.subr.bf16.mxu1 %v2716_v18  ;;  %v2636_v30 = vld [vmem:[#allocation3 + $0x1b08] sm:$0xff]  ;;  %v2635_v51 = vld [vmem:[#allocation3 + $0x1b00] sm:$0xff]  ;;  %v2566_v26 = vld [vmem:[#allocation3 + $0x18d8] sm:$0xff] }
 0x6df   :  { %v2764_v50 = vld [vmem:[#allocation3 + $0x1f08] sm:$0xff]  ;;  %v2763_v24 = vld [vmem:[#allocation3 + $0x1f00] sm:$0xff]  ;;  %v2694_v18 = vld [vmem:[#allocation3 + $0x1cd8] sm:$0xff] }
 0x6e0   :  { %2808 = vmatpush1.bf16.msra.mxu0 %v2587_v43  ;;  %v2644_v53 = vld [vmem:[#allocation3 + $0x1b48] sm:$0xff]  ;;  %v2643_v11 = vld [vmem:[#allocation3 + $0x1b40] sm:$0xff]  ;;  %v2565_v43 = vld [vmem:[#allocation3 + $0x18d0] sm:$0xff] }
 0x6e1   :  { %2849 = vmatpush1.bf16.msra.mxu1 %v2715_v20  ;;  %2809 = vmatprep.subr.bf16.mxu0 %v2596_v31  ;;  %v2772_v13 = vld [vmem:[#allocation3 + $0x1f48] sm:$0xff]  ;;  %v2771_v3 = vld [vmem:[#allocation3 + $0x1f40] sm:$0xff]  ;;  %v2693_v20 = vld [vmem:[#allocation3 + $0x1cd0] sm:$0xff] }
 0x6e2   :  { %2850 = vmatprep.subr.bf16.mxu1 %v2724_v27  ;;  %v2652_v39 = vld [vmem:[#allocation3 + $0x1b88] sm:$0xff]  ;;  %v2651_v45 = vld [vmem:[#allocation3 + $0x1b80] sm:$0xff]  ;;  %v2574_v31 = vld [vmem:[#allocation3 + $0x1918] sm:$0xff] }
 0x6e3   :  { %v2780_v29 = vld [vmem:[#allocation3 + $0x1f88] sm:$0xff]  ;;  %v2779_v16 = vld [vmem:[#allocation3 + $0x1f80] sm:$0xff]  ;;  %v2702_v27 = vld [vmem:[#allocation3 + $0x1d18] sm:$0xff] }
 0x6e4   :  { %2810 = vmatpush1.bf16.msra.mxu0 %v2595_v56  ;;  %v2660_v7 = vld [vmem:[#allocation3 + $0x1bc8] sm:$0xff]  ;;  %v2659_v9 = vld [vmem:[#allocation3 + $0x1bc0] sm:$0xff]  ;;  %v2573_v56 = vld [vmem:[#allocation3 + $0x1910] sm:$0xff] }
 0x6e5   :  { %2851 = vmatpush1.bf16.msra.mxu1 %v2723_v57  ;;  %2811 = vmatprep.subr.bf16.mxu0 %v2604_v63  ;;  %v2788_v28 = vld [vmem:[#allocation3 + $0x1fc8] sm:$0xff]  ;;  %v2787_v8 = vld [vmem:[#allocation3 + $0x1fc0] sm:$0xff]  ;;  %v2701_v57 = vld [vmem:[#allocation3 + $0x1d10] sm:$0xff] }
 0x6e6   :  { %2852 = vmatprep.subr.bf16.mxu1 %v2732_v4  ;;  %v5176_v1 = vld [vmem:[#allocation48_spill] sm:$0xff]  ;;  %v5177_v37 = vld [vmem:[#allocation49_spill] sm:$0xff] }
 0x6e7   :  { %v2582_v63 = vld [vmem:[#allocation3 + $0x1958] sm:$0xff] }
 0x6e8   :  { %2812 = vmatpush1.bf16.msra.mxu0 %v2603_v33  ;;  %v2710_v4 = vld [vmem:[#allocation3 + $0x1d58] sm:$0xff]  ;;  %v2581_v33 = vld [vmem:[#allocation3 + $0x1950] sm:$0xff] }
 0x6e9   :  { %2853 = vmatpush1.bf16.msra.mxu1 %v2731_v34  ;;  %2813 = vmatprep.subr.bf16.mxu0 %v2612_v48  ;;  %v2709_v34 = vld [vmem:[#allocation3 + $0x1d50] sm:$0xff]  ;;  %v2590_v48 = vld [vmem:[#allocation3 + $0x1998] sm:$0xff] }
 0x6ea   :  { %2854 = vmatprep.subr.bf16.mxu1 %v2740_v12  ;;  %v2718_v12 = vld [vmem:[#allocation3 + $0x1d98] sm:$0xff] }
 0x6ec   :  { %2814 = vmatpush1.bf16.msra.mxu0 %v2611_v15  ;;  %v2589_v15 = vld [vmem:[#allocation3 + $0x1990] sm:$0xff] }
 0x6ed   :  { %2855 = vmatpush1.bf16.msra.mxu1 %v2739_v2  ;;  %2815 = vmatprep.subr.bf16.mxu0 %v2620_v21  ;;  %v2717_v2 = vld [vmem:[#allocation3 + $0x1d90] sm:$0xff]  ;;  %v2598_v21 = vld [vmem:[#allocation3 + $0x19d8] sm:$0xff] }
 0x6ee   :  { %2856 = vmatprep.subr.bf16.mxu1 %v2748_v22  ;;  %v2726_v22 = vld [vmem:[#allocation3 + $0x1dd8] sm:$0xff] }
 0x6f0   :  { %2816 = vmatpush1.bf16.msra.mxu0 %v2619_v42  ;;  %v2597_v42 = vld [vmem:[#allocation3 + $0x19d0] sm:$0xff] }
 0x6f1   :  { %2857 = vmatpush1.bf16.msra.mxu1 %v2747_v46  ;;  %2817 = vmatprep.subr.bf16.mxu0 %v2628_v47  ;;  %v2725_v46 = vld [vmem:[#allocation3 + $0x1dd0] sm:$0xff]  ;;  %v2606_v47 = vld [vmem:[#allocation3 + $0x1a18] sm:$0xff] }
 0x6f2   :  { %2858 = vmatprep.subr.bf16.mxu1 %v2756_v49  ;;  %v2734_v49 = vld [vmem:[#allocation3 + $0x1e18] sm:$0xff] }
 0x6f4   :  { %2818 = vmatpush1.bf16.msra.mxu0 %v2627_v17  ;;  %v2605_v17 = vld [vmem:[#allocation3 + $0x1a10] sm:$0xff] }
 0x6f5   :  { %2859 = vmatpush1.bf16.msra.mxu1 %v2755_v23  ;;  %2819 = vmatprep.subr.bf16.mxu0 %v2636_v30  ;;  %v2733_v23 = vld [vmem:[#allocation3 + $0x1e10] sm:$0xff]  ;;  %v2614_v30 = vld [vmem:[#allocation3 + $0x1a58] sm:$0xff] }
 0x6f6   :  { %2860 = vmatprep.subr.bf16.mxu1 %v2764_v50  ;;  %v2742_v50 = vld [vmem:[#allocation3 + $0x1e58] sm:$0xff] }
 0x6f8   :  { %2820 = vmatpush1.bf16.msra.mxu0 %v2635_v51  ;;  %v2613_v51 = vld [vmem:[#allocation3 + $0x1a50] sm:$0xff] }
 0x6f9   :  { %2861 = vmatpush1.bf16.msra.mxu1 %v2763_v24  ;;  %2821 = vmatprep.subr.bf16.mxu0 %v2644_v53  ;;  %v2741_v24 = vld [vmem:[#allocation3 + $0x1e50] sm:$0xff]  ;;  %v2622_v53 = vld [vmem:[#allocation3 + $0x1a98] sm:$0xff] }
 0x6fa   :  { %2862 = vmatprep.subr.bf16.mxu1 %v2772_v13  ;;  %v2750_v13 = vld [vmem:[#allocation3 + $0x1e98] sm:$0xff] }
 0x6fc   :  { %2822 = vmatpush1.bf16.msra.mxu0 %v2643_v11  ;;  %v2621_v11 = vld [vmem:[#allocation3 + $0x1a90] sm:$0xff] }
 0x6fd   :  { %2863 = vmatpush1.bf16.msra.mxu1 %v2771_v3  ;;  %2823 = vmatprep.subr.bf16.mxu0 %v2652_v39  ;;  %v2749_v3 = vld [vmem:[#allocation3 + $0x1e90] sm:$0xff]  ;;  %v2630_v39 = vld [vmem:[#allocation3 + $0x1ad8] sm:$0xff] }
 0x6fe   :  { %2864 = vmatprep.subr.bf16.mxu1 %v2780_v29  ;;  %v2758_v29 = vld [vmem:[#allocation3 + $0x1ed8] sm:$0xff] }
 0x700   :  { %2824 = vmatpush1.bf16.msra.mxu0 %v2651_v45  ;;  %v2629_v45 = vld [vmem:[#allocation3 + $0x1ad0] sm:$0xff] }
 0x701   :  { %2865 = vmatpush1.bf16.msra.mxu1 %v2779_v16  ;;  %2825 = vmatprep.subr.bf16.mxu0 %v2660_v7  ;;  %v2757_v16 = vld [vmem:[#allocation3 + $0x1ed0] sm:$0xff]  ;;  %v2638_v7 = vld [vmem:[#allocation3 + $0x1b18] sm:$0xff] }
 0x702   :  { %2866 = vmatprep.subr.bf16.mxu1 %v2788_v28  ;;  %v2766_v28 = vld [vmem:[#allocation3 + $0x1f18] sm:$0xff] }
 0x704   :  { %2826 = vmatpush1.bf16.msra.mxu0 %v2659_v9  ;;  %v2637_v9 = vld [vmem:[#allocation3 + $0x1b10] sm:$0xff] }
 0x705   :  { %2867 = vmatpush1.bf16.msra.mxu1 %v2787_v8  ;;  %2877 = vmatprep.subr.bf16.mxu0 %v2542_v55  ;;  %v2765_v8 = vld [vmem:[#allocation3 + $0x1f10] sm:$0xff]  ;;  %v2646_v55 = vld [vmem:[#allocation3 + $0x1b58] sm:$0xff] }
 0x706   :  { %2918 = vmatprep.subr.bf16.mxu1 %v2670_v32  ;;  %v2774_v32 = vld [vmem:[#allocation3 + $0x1f58] sm:$0xff] }
 0x707   :  { %2828 = vmatmul.mubr.bf16.vlgmr.msra.gmra.mrb[64].mxu0 %v5176_v1 }
 0x708   :  { %2869 = vmatmul.mubr.bf16.vlgmr.msra.gmra.mrb[64].mxu1 %v5177_v37  ;;  %2878 = vmatpush1.bf16.msra.mxu0 %v2541_v61  ;;  %v2645_v61 = vld [vmem:[#allocation3 + $0x1b50] sm:$0xff] }
 0x709   :  { %2919 = vmatpush1.bf16.msra.mxu1 %v2669_v59  ;;  %2879 = vmatprep.subr.bf16.mxu0 %v2550_v60  ;;  %v2773_v59 = vld [vmem:[#allocation3 + $0x1f50] sm:$0xff]  ;;  %v2654_v60 = vld [vmem:[#allocation3 + $0x1b98] sm:$0xff] }
 0x70a   :  { %2920 = vmatprep.subr.bf16.mxu1 %v2678_v0  ;;  %2909 = vmatprep.mubr.bf16.mxu0 %v5174_v6  ;;  %v2782_v0 = vld [vmem:[#allocation3 + $0x1f98] sm:$0xff] }
 0x70b   :  { %2950 = vmatprep.mubr.bf16.mxu1 %v5175_v62 }
 0x70c   :  { %2880 = vmatpush1.bf16.msra.mxu0 %v2549_v35  ;;  %v2653_v35 = vld [vmem:[#allocation3 + $0x1b90] sm:$0xff] }
 0x70d   :  { %2921 = vmatpush1.bf16.msra.mxu1 %v2677_v14  ;;  %2881 = vmatprep.subr.bf16.mxu0 %v2558_v25  ;;  %v2781_v14 = vld [vmem:[#allocation3 + $0x1f90] sm:$0xff]  ;;  %v2662_v25 = vld [vmem:[#allocation3 + $0x1bd8] sm:$0xff] }
 0x70e   :  { %2922 = vmatprep.subr.bf16.mxu1 %v2686_v19  ;;  %v2790_v19 = vld [vmem:[#allocation3 + $0x1fd8] sm:$0xff] }
 0x710   :  { %2882 = vmatpush1.bf16.msra.mxu0 %v2557_v36  ;;  %v2661_v36 = vld [vmem:[#allocation3 + $0x1bd0] sm:$0xff] }
 0x711   :  { %2923 = vmatpush1.bf16.msra.mxu1 %v2685_v38  ;;  %2883 = vmatprep.subr.bf16.mxu0 %v2566_v26  ;;  %v2789_v38 = vld [vmem:[#allocation3 + $0x1fd0] sm:$0xff]  ;;  %v2544_v26 = vld [vmem:[#allocation3 + $0x1828] sm:$0xff] }
 0x712   :  { %2924 = vmatprep.subr.bf16.mxu1 %v2694_v18  ;;  %v2672_v18 = vld [vmem:[#allocation3 + $0x1c28] sm:$0xff] }
 0x714   :  { %2884 = vmatpush1.bf16.msra.mxu0 %v2565_v43  ;;  %v2543_v43 = vld [vmem:[#allocation3 + $0x1820] sm:$0xff] }
 0x715   :  { %2925 = vmatpush1.bf16.msra.mxu1 %v2693_v20  ;;  %2885 = vmatprep.subr.bf16.mxu0 %v2574_v31  ;;  %v2671_v20 = vld [vmem:[#allocation3 + $0x1c20] sm:$0xff]  ;;  %v2552_v31 = vld [vmem:[#allocation3 + $0x1868] sm:$0xff] }
 0x716   :  { %2926 = vmatprep.subr.bf16.mxu1 %v2702_v27  ;;  %v2680_v27 = vld [vmem:[#allocation3 + $0x1c68] sm:$0xff] }
 0x718   :  { %2886 = vmatpush1.bf16.msra.mxu0 %v2573_v56  ;;  %v2551_v56 = vld [vmem:[#allocation3 + $0x1860] sm:$0xff] }
 0x719   :  { %2927 = vmatpush1.bf16.msra.mxu1 %v2701_v57  ;;  %2887 = vmatprep.subr.bf16.mxu0 %v2582_v63  ;;  %v2679_v57 = vld [vmem:[#allocation3 + $0x1c60] sm:$0xff]  ;;  %v2560_v63 = vld [vmem:[#allocation3 + $0x18a8] sm:$0xff] }
 0x71a   :  { %2928 = vmatprep.subr.bf16.mxu1 %v2710_v4  ;;  %v2688_v4 = vld [vmem:[#allocation3 + $0x1ca8] sm:$0xff] }
 0x71c   :  { %2888 = vmatpush1.bf16.msra.mxu0 %v2581_v33  ;;  %v2559_v33 = vld [vmem:[#allocation3 + $0x18a0] sm:$0xff] }
 0x71d   :  { %2929 = vmatpush1.bf16.msra.mxu1 %v2709_v34  ;;  %2889 = vmatprep.subr.bf16.mxu0 %v2590_v48  ;;  %v2687_v34 = vld [vmem:[#allocation3 + $0x1ca0] sm:$0xff]  ;;  %v2568_v48 = vld [vmem:[#allocation3 + $0x18e8] sm:$0xff] }
 0x71e   :  { %2930 = vmatprep.subr.bf16.mxu1 %v2718_v12  ;;  %v2696_v12 = vld [vmem:[#allocation3 + $0x1ce8] sm:$0xff] }
 0x720   :  { %2890 = vmatpush1.bf16.msra.mxu0 %v2589_v15  ;;  %v2567_v15 = vld [vmem:[#allocation3 + $0x18e0] sm:$0xff] }
 0x721   :  { %2931 = vmatpush1.bf16.msra.mxu1 %v2717_v2  ;;  %2891 = vmatprep.subr.bf16.mxu0 %v2598_v21  ;;  %v2695_v2 = vld [vmem:[#allocation3 + $0x1ce0] sm:$0xff]  ;;  %v2576_v21 = vld [vmem:[#allocation3 + $0x1928] sm:$0xff] }
 0x722   :  { %2932 = vmatprep.subr.bf16.mxu1 %v2726_v22  ;;  %v2704_v22 = vld [vmem:[#allocation3 + $0x1d28] sm:$0xff] }
 0x724   :  { %2892 = vmatpush1.bf16.msra.mxu0 %v2597_v42  ;;  %v2575_v42 = vld [vmem:[#allocation3 + $0x1920] sm:$0xff] }
 0x725   :  { %2933 = vmatpush1.bf16.msra.mxu1 %v2725_v46  ;;  %2893 = vmatprep.subr.bf16.mxu0 %v2606_v47  ;;  %v2703_v46 = vld [vmem:[#allocation3 + $0x1d20] sm:$0xff]  ;;  %v2584_v47 = vld [vmem:[#allocation3 + $0x1968] sm:$0xff] }
 0x726   :  { %2934 = vmatprep.subr.bf16.mxu1 %v2734_v49  ;;  %v2712_v49 = vld [vmem:[#allocation3 + $0x1d68] sm:$0xff] }
 0x728   :  { %2894 = vmatpush1.bf16.msra.mxu0 %v2605_v17  ;;  %v2583_v17 = vld [vmem:[#allocation3 + $0x1960] sm:$0xff] }
 0x729   :  { %2935 = vmatpush1.bf16.msra.mxu1 %v2733_v23  ;;  %2895 = vmatprep.subr.bf16.mxu0 %v2614_v30  ;;  %v2711_v23 = vld [vmem:[#allocation3 + $0x1d60] sm:$0xff]  ;;  %v2592_v30 = vld [vmem:[#allocation3 + $0x19a8] sm:$0xff] }
 0x72a   :  { %2936 = vmatprep.subr.bf16.mxu1 %v2742_v50  ;;  %v2720_v50 = vld [vmem:[#allocation3 + $0x1da8] sm:$0xff] }
 0x72c   :  { %2896 = vmatpush1.bf16.msra.mxu0 %v2613_v51  ;;  %v2591_v51 = vld [vmem:[#allocation3 + $0x19a0] sm:$0xff] }
 0x72d   :  { %2937 = vmatpush1.bf16.msra.mxu1 %v2741_v24  ;;  %2897 = vmatprep.subr.bf16.mxu0 %v2622_v53  ;;  %v2719_v24 = vld [vmem:[#allocation3 + $0x1da0] sm:$0xff]  ;;  %v2600_v53 = vld [vmem:[#allocation3 + $0x19e8] sm:$0xff] }
 0x72e   :  { %2938 = vmatprep.subr.bf16.mxu1 %v2750_v13  ;;  %v2728_v13 = vld [vmem:[#allocation3 + $0x1de8] sm:$0xff] }
 0x730   :  { %2898 = vmatpush1.bf16.msra.mxu0 %v2621_v11  ;;  %v2599_v11 = vld [vmem:[#allocation3 + $0x19e0] sm:$0xff] }
 0x731   :  { %2939 = vmatpush1.bf16.msra.mxu1 %v2749_v3  ;;  %2899 = vmatprep.subr.bf16.mxu0 %v2630_v39  ;;  %v2727_v3 = vld [vmem:[#allocation3 + $0x1de0] sm:$0xff]  ;;  %v2608_v39 = vld [vmem:[#allocation3 + $0x1a28] sm:$0xff] }
 0x732   :  { %2940 = vmatprep.subr.bf16.mxu1 %v2758_v29  ;;  %v2736_v29 = vld [vmem:[#allocation3 + $0x1e28] sm:$0xff] }
 0x734   :  { %2900 = vmatpush1.bf16.msra.mxu0 %v2629_v45  ;;  %v2607_v45 = vld [vmem:[#allocation3 + $0x1a20] sm:$0xff] }
 0x735   :  { %2941 = vmatpush1.bf16.msra.mxu1 %v2757_v16  ;;  %2901 = vmatprep.subr.bf16.mxu0 %v2638_v7  ;;  %v2735_v16 = vld [vmem:[#allocation3 + $0x1e20] sm:$0xff]  ;;  %v2616_v7 = vld [vmem:[#allocation3 + $0x1a68] sm:$0xff] }
 0x736   :  { %2942 = vmatprep.subr.bf16.mxu1 %v2766_v28  ;;  %v2744_v28 = vld [vmem:[#allocation3 + $0x1e68] sm:$0xff] }
 0x738   :  { %2902 = vmatpush1.bf16.msra.mxu0 %v2637_v9  ;;  %v2615_v9 = vld [vmem:[#allocation3 + $0x1a60] sm:$0xff] }
 0x739   :  { %2943 = vmatpush1.bf16.msra.mxu1 %v2765_v8  ;;  %2903 = vmatprep.subr.bf16.mxu0 %v2646_v55  ;;  %v2743_v8 = vld [vmem:[#allocation3 + $0x1e60] sm:$0xff]  ;;  %v2624_v55 = vld [vmem:[#allocation3 + $0x1aa8] sm:$0xff] }
 0x73a   :  { %2944 = vmatprep.subr.bf16.mxu1 %v2774_v32  ;;  %v2752_v32 = vld [vmem:[#allocation3 + $0x1ea8] sm:$0xff] }
 0x73c   :  { %2904 = vmatpush1.bf16.msra.mxu0 %v2645_v61  ;;  %v2623_v61 = vld [vmem:[#allocation3 + $0x1aa0] sm:$0xff] }
 0x73d   :  { %2945 = vmatpush1.bf16.msra.mxu1 %v2773_v59  ;;  %2905 = vmatprep.subr.bf16.mxu0 %v2654_v60  ;;  %v2751_v59 = vld [vmem:[#allocation3 + $0x1ea0] sm:$0xff]  ;;  %v2632_v60 = vld [vmem:[#allocation3 + $0x1ae8] sm:$0xff] }
 0x73e   :  { %2946 = vmatprep.subr.bf16.mxu1 %v2782_v0  ;;  %v2760_v0 = vld [vmem:[#allocation3 + $0x1ee8] sm:$0xff] }
 0x740   :  { %2906 = vmatpush1.bf16.msra.mxu0 %v2653_v35  ;;  %v2631_v35 = vld [vmem:[#allocation3 + $0x1ae0] sm:$0xff] }
 0x741   :  { %2947 = vmatpush1.bf16.msra.mxu1 %v2781_v14  ;;  %2907 = vmatprep.subr.bf16.mxu0 %v2662_v25  ;;  %v2759_v14 = vld [vmem:[#allocation3 + $0x1ee0] sm:$0xff]  ;;  %v2640_v25 = vld [vmem:[#allocation3 + $0x1b28] sm:$0xff] }
 0x742   :  { %2948 = vmatprep.subr.bf16.mxu1 %v2790_v19  ;;  %v2768_v19 = vld [vmem:[#allocation3 + $0x1f28] sm:$0xff] }
 0x744   :  { %2908 = vmatpush1.bf16.msra.mxu0 %v2661_v36  ;;  %v2639_v36 = vld [vmem:[#allocation3 + $0x1b20] sm:$0xff] }
 0x745   :  { %2949 = vmatpush1.bf16.msra.mxu1 %v2789_v38  ;;  %2959 = vmatprep.subr.bf16.mxu0 %v2544_v26  ;;  %v2767_v38 = vld [vmem:[#allocation3 + $0x1f20] sm:$0xff]  ;;  %v2648_v26 = vld [vmem:[#allocation3 + $0x1b68] sm:$0xff] }
 0x746   :  { %3000 = vmatprep.subr.bf16.mxu1 %v2672_v18  ;;  %v2776_v18 = vld [vmem:[#allocation3 + $0x1f68] sm:$0xff] }
 0x747   :  { %2910 = vmatmul.mubr.bf16.vlgmr.msra.gmra.mrb[68].mxu0 %v5176_v1 }
 0x748   :  { %2951 = vmatmul.mubr.bf16.vlgmr.msra.gmra.mrb[68].mxu1 %v5177_v37  ;;  %2960 = vmatpush1.bf16.msra.mxu0 %v2543_v43  ;;  %v2647_v43 = vld [vmem:[#allocation3 + $0x1b60] sm:$0xff] }
 0x749   :  { %3001 = vmatpush1.bf16.msra.mxu1 %v2671_v20  ;;  %2961 = vmatprep.subr.bf16.mxu0 %v2552_v31  ;;  %v2775_v20 = vld [vmem:[#allocation3 + $0x1f60] sm:$0xff]  ;;  %v2656_v31 = vld [vmem:[#allocation3 + $0x1ba8] sm:$0xff] }
 0x74a   :  { %3002 = vmatprep.subr.bf16.mxu1 %v2680_v27  ;;  %2991 = vmatprep.mubr.bf16.mxu0 %v5174_v6  ;;  %v2784_v27 = vld [vmem:[#allocation3 + $0x1fa8] sm:$0xff] }
 0x74b   :  { %3032 = vmatprep.mubr.bf16.mxu1 %v5175_v62 }
 0x74c   :  { %2962 = vmatpush1.bf16.msra.mxu0 %v2551_v56  ;;  %v2655_v56 = vld [vmem:[#allocation3 + $0x1ba0] sm:$0xff] }
 0x74d   :  { %3003 = vmatpush1.bf16.msra.mxu1 %v2679_v57  ;;  %2963 = vmatprep.subr.bf16.mxu0 %v2560_v63  ;;  %v2783_v57 = vld [vmem:[#allocation3 + $0x1fa0] sm:$0xff]  ;;  %v2664_v63 = vld [vmem:[#allocation3 + $0x1be8] sm:$0xff] }
 0x74e   :  { %3004 = vmatprep.subr.bf16.mxu1 %v2688_v4  ;;  %v2792_v4 = vld [vmem:[#allocation3 + $0x1fe8] sm:$0xff] }
 0x750   :  { %2964 = vmatpush1.bf16.msra.mxu0 %v2559_v33  ;;  %v2663_v33 = vld [vmem:[#allocation3 + $0x1be0] sm:$0xff] }
 0x751   :  { %3005 = vmatpush1.bf16.msra.mxu1 %v2687_v34  ;;  %2965 = vmatprep.subr.bf16.mxu0 %v2568_v48  ;;  %v2791_v34 = vld [vmem:[#allocation3 + $0x1fe0] sm:$0xff]  ;;  %v2546_v48 = vld [vmem:[#allocation3 + $0x1838] sm:$0xff] }
 0x752   :  { %3006 = vmatprep.subr.bf16.mxu1 %v2696_v12  ;;  %v2674_v12 = vld [vmem:[#allocation3 + $0x1c38] sm:$0xff] }
 0x754   :  { %2966 = vmatpush1.bf16.msra.mxu0 %v2567_v15  ;;  %v2545_v15 = vld [vmem:[#allocation3 + $0x1830] sm:$0xff] }
 0x755   :  { %3007 = vmatpush1.bf16.msra.mxu1 %v2695_v2  ;;  %2967 = vmatprep.subr.bf16.mxu0 %v2576_v21  ;;  %v2673_v2 = vld [vmem:[#allocation3 + $0x1c30] sm:$0xff]  ;;  %v2554_v21 = vld [vmem:[#allocation3 + $0x1878] sm:$0xff] }
 0x756   :  { %3008 = vmatprep.subr.bf16.mxu1 %v2704_v22  ;;  %v2682_v22 = vld [vmem:[#allocation3 + $0x1c78] sm:$0xff] }
 0x758   :  { %2968 = vmatpush1.bf16.msra.mxu0 %v2575_v42  ;;  %v2553_v42 = vld [vmem:[#allocation3 + $0x1870] sm:$0xff] }
 0x759   :  { %3009 = vmatpush1.bf16.msra.mxu1 %v2703_v46  ;;  %2969 = vmatprep.subr.bf16.mxu0 %v2584_v47  ;;  %v2681_v46 = vld [vmem:[#allocation3 + $0x1c70] sm:$0xff]  ;;  %v2562_v47 = vld [vmem:[#allocation3 + $0x18b8] sm:$0xff] }
 0x75a   :  { %3010 = vmatprep.subr.bf16.mxu1 %v2712_v49  ;;  %v2690_v49 = vld [vmem:[#allocation3 + $0x1cb8] sm:$0xff] }
 0x75c   :  { %2970 = vmatpush1.bf16.msra.mxu0 %v2583_v17  ;;  %v2561_v17 = vld [vmem:[#allocation3 + $0x18b0] sm:$0xff] }
 0x75d   :  { %3011 = vmatpush1.bf16.msra.mxu1 %v2711_v23  ;;  %2971 = vmatprep.subr.bf16.mxu0 %v2592_v30  ;;  %v2689_v23 = vld [vmem:[#allocation3 + $0x1cb0] sm:$0xff]  ;;  %v2570_v30 = vld [vmem:[#allocation3 + $0x18f8] sm:$0xff] }
 0x75e   :  { %3012 = vmatprep.subr.bf16.mxu1 %v2720_v50  ;;  %v2698_v50 = vld [vmem:[#allocation3 + $0x1cf8] sm:$0xff] }
 0x760   :  { %2972 = vmatpush1.bf16.msra.mxu0 %v2591_v51  ;;  %v2569_v51 = vld [vmem:[#allocation3 + $0x18f0] sm:$0xff] }
 0x761   :  { %3013 = vmatpush1.bf16.msra.mxu1 %v2719_v24  ;;  %2973 = vmatprep.subr.bf16.mxu0 %v2600_v53  ;;  %v2697_v24 = vld [vmem:[#allocation3 + $0x1cf0] sm:$0xff]  ;;  %v2578_v53 = vld [vmem:[#allocation3 + $0x1938] sm:$0xff] }
 0x762   :  { %3014 = vmatprep.subr.bf16.mxu1 %v2728_v13  ;;  %v2706_v13 = vld [vmem:[#allocation3 + $0x1d38] sm:$0xff] }
 0x764   :  { %2974 = vmatpush1.bf16.msra.mxu0 %v2599_v11  ;;  %v2586_v11 = vld [vmem:[#allocation3 + $0x1978] sm:$0xff] }
 0x765   :  { %3015 = vmatpush1.bf16.msra.mxu1 %v2727_v3  ;;  %2975 = vmatprep.subr.bf16.mxu0 %v2608_v39  ;;  %v2714_v3 = vld [vmem:[#allocation3 + $0x1d78] sm:$0xff]  ;;  %v2585_v39 = vld [vmem:[#allocation3 + $0x1970] sm:$0xff] }
 0x766   :  { %3016 = vmatprep.subr.bf16.mxu1 %v2736_v29  ;;  %v2713_v29 = vld [vmem:[#allocation3 + $0x1d70] sm:$0xff] }
 0x768   :  { %2976 = vmatpush1.bf16.msra.mxu0 %v2607_v45  ;;  %v2594_v45 = vld [vmem:[#allocation3 + $0x19b8] sm:$0xff] }
 0x769   :  { %3017 = vmatpush1.bf16.msra.mxu1 %v2735_v16  ;;  %2977 = vmatprep.subr.bf16.mxu0 %v2616_v7  ;;  %v2722_v16 = vld [vmem:[#allocation3 + $0x1db8] sm:$0xff]  ;;  %v2593_v7 = vld [vmem:[#allocation3 + $0x19b0] sm:$0xff] }
 0x76a   :  { %3018 = vmatprep.subr.bf16.mxu1 %v2744_v28  ;;  %v2721_v28 = vld [vmem:[#allocation3 + $0x1db0] sm:$0xff] }
 0x76c   :  { %2978 = vmatpush1.bf16.msra.mxu0 %v2615_v9  ;;  %v2602_v9 = vld [vmem:[#allocation3 + $0x19f8] sm:$0xff] }
 0x76d   :  { %3019 = vmatpush1.bf16.msra.mxu1 %v2743_v8  ;;  %2979 = vmatprep.subr.bf16.mxu0 %v2624_v55  ;;  %v2730_v8 = vld [vmem:[#allocation3 + $0x1df8] sm:$0xff]  ;;  %v2601_v55 = vld [vmem:[#allocation3 + $0x19f0] sm:$0xff] }
 0x76e   :  { %3020 = vmatprep.subr.bf16.mxu1 %v2752_v32  ;;  %v2729_v32 = vld [vmem:[#allocation3 + $0x1df0] sm:$0xff] }
 0x770   :  { %2980 = vmatpush1.bf16.msra.mxu0 %v2623_v61  ;;  %v2610_v61 = vld [vmem:[#allocation3 + $0x1a38] sm:$0xff] }
 0x771   :  { %3021 = vmatpush1.bf16.msra.mxu1 %v2751_v59  ;;  %2981 = vmatprep.subr.bf16.mxu0 %v2632_v60  ;;  %v2738_v59 = vld [vmem:[#allocation3 + $0x1e38] sm:$0xff]  ;;  %v2609_v60 = vld [vmem:[#allocation3 + $0x1a30] sm:$0xff] }
 0x772   :  { %3022 = vmatprep.subr.bf16.mxu1 %v2760_v0  ;;  %v2737_v0 = vld [vmem:[#allocation3 + $0x1e30] sm:$0xff] }
 0x774   :  { %2982 = vmatpush1.bf16.msra.mxu0 %v2631_v35  ;;  %v2618_v35 = vld [vmem:[#allocation3 + $0x1a78] sm:$0xff] }
 0x775   :  { %3023 = vmatpush1.bf16.msra.mxu1 %v2759_v14  ;;  %2983 = vmatprep.subr.bf16.mxu0 %v2640_v25  ;;  %v2746_v14 = vld [vmem:[#allocation3 + $0x1e78] sm:$0xff]  ;;  %v2617_v25 = vld [vmem:[#allocation3 + $0x1a70] sm:$0xff] }
 0x776   :  { %3024 = vmatprep.subr.bf16.mxu1 %v2768_v19  ;;  %v2745_v19 = vld [vmem:[#allocation3 + $0x1e70] sm:$0xff] }
 0x778   :  { %2984 = vmatpush1.bf16.msra.mxu0 %v2639_v36  ;;  %v2626_v36 = vld [vmem:[#allocation3 + $0x1ab8] sm:$0xff] }
 0x779   :  { %3025 = vmatpush1.bf16.msra.mxu1 %v2767_v38  ;;  %2985 = vmatprep.subr.bf16.mxu0 %v2648_v26  ;;  %v2754_v38 = vld [vmem:[#allocation3 + $0x1eb8] sm:$0xff]  ;;  %v2625_v26 = vld [vmem:[#allocation3 + $0x1ab0] sm:$0xff] }
 0x77a   :  { %3026 = vmatprep.subr.bf16.mxu1 %v2776_v18  ;;  %v2753_v18 = vld [vmem:[#allocation3 + $0x1eb0] sm:$0xff] }
 0x77c   :  { %2986 = vmatpush1.bf16.msra.mxu0 %v2647_v43  ;;  %v2634_v43 = vld [vmem:[#allocation3 + $0x1af8] sm:$0xff] }
 0x77d   :  { %3027 = vmatpush1.bf16.msra.mxu1 %v2775_v20  ;;  %2987 = vmatprep.subr.bf16.mxu0 %v2656_v31  ;;  %v2762_v20 = vld [vmem:[#allocation3 + $0x1ef8] sm:$0xff]  ;;  %v2633_v31 = vld [vmem:[#allocation3 + $0x1af0] sm:$0xff] }
 0x77e   :  { %3028 = vmatprep.subr.bf16.mxu1 %v2784_v27  ;;  %v2761_v27 = vld [vmem:[#allocation3 + $0x1ef0] sm:$0xff] }
 0x780   :  { %2988 = vmatpush1.bf16.msra.mxu0 %v2655_v56  ;;  %v2642_v56 = vld [vmem:[#allocation3 + $0x1b38] sm:$0xff] }
 0x781   :  { %3029 = vmatpush1.bf16.msra.mxu1 %v2783_v57  ;;  %2989 = vmatprep.subr.bf16.mxu0 %v2664_v63  ;;  %v2770_v57 = vld [vmem:[#allocation3 + $0x1f38] sm:$0xff]  ;;  %v2641_v63 = vld [vmem:[#allocation3 + $0x1b30] sm:$0xff] }
 0x782   :  { %3030 = vmatprep.subr.bf16.mxu1 %v2792_v4  ;;  %v2769_v4 = vld [vmem:[#allocation3 + $0x1f30] sm:$0xff] }
 0x784   :  { %2990 = vmatpush1.bf16.msra.mxu0 %v2663_v33  ;;  %v2650_v33 = vld [vmem:[#allocation3 + $0x1b78] sm:$0xff] }
 0x785   :  { %3031 = vmatpush1.bf16.msra.mxu1 %v2791_v34  ;;  %3041 = vmatprep.subr.bf16.mxu0 %v2546_v48  ;;  %v2778_v34 = vld [vmem:[#allocation3 + $0x1f78] sm:$0xff]  ;;  %v2649_v48 = vld [vmem:[#allocation3 + $0x1b70] sm:$0xff] }
 0x786   :  { %3082 = vmatprep.subr.bf16.mxu1 %v2674_v12  ;;  %v2777_v12 = vld [vmem:[#allocation3 + $0x1f70] sm:$0xff] }
 0x787   :  { %2992 = vmatmul.mubr.bf16.vlgmr.msra.gmra.mrb[72].mxu0 %v5176_v1 }
 0x788   :  { %3033 = vmatmul.mubr.bf16.vlgmr.msra.gmra.mrb[72].mxu1 %v5177_v37  ;;  %3042 = vmatpush1.bf16.msra.mxu0 %v2545_v15  ;;  %v2658_v15 = vld [vmem:[#allocation3 + $0x1bb8] sm:$0xff] }
 0x789   :  { %3083 = vmatpush1.bf16.msra.mxu1 %v2673_v2  ;;  %3043 = vmatprep.subr.bf16.mxu0 %v2554_v21  ;;  %v2786_v2 = vld [vmem:[#allocation3 + $0x1fb8] sm:$0xff]  ;;  %v2657_v21 = vld [vmem:[#allocation3 + $0x1bb0] sm:$0xff] }
 0x78a   :  { %3084 = vmatprep.subr.bf16.mxu1 %v2682_v22  ;;  %3073 = vmatprep.mubr.bf16.mxu0 %v5174_v6  ;;  %v2577_v6 = vld [vmem:[#allocation3 + $0x1930] sm:$0xff] }
 0x78b   :  { %3114 = vmatprep.mubr.bf16.mxu1 %v5175_v62  ;;  %v2705_v62 = vld [vmem:[#allocation3 + $0x1d30] sm:$0xff] }
 0x78c   :  { %3044 = vmatpush1.bf16.msra.mxu0 %v2553_v42  ;;  %v2785_v22 = vld [vmem:[#allocation3 + $0x1fb0] sm:$0xff]  ;;  %v2666_v42 = vld [vmem:[#allocation3 + $0x1bf8] sm:$0xff] }
 0x78d   :  { %3085 = vmatpush1.bf16.msra.mxu1 %v2681_v46  ;;  %3045 = vmatprep.subr.bf16.mxu0 %v2562_v47  ;;  %v2794_v46 = vld [vmem:[#allocation3 + $0x1ff8] sm:$0xff]  ;;  %v2665_v47 = vld [vmem:[#allocation3 + $0x1bf0] sm:$0xff] }
 0x78e   :  { %3086 = vmatprep.subr.bf16.mxu1 %v2690_v49  ;;  %v2793_v49 = vld [vmem:[#allocation3 + $0x1ff0] sm:$0xff] }
 0x790   :  { %3046 = vmatpush1.bf16.msra.mxu0 %v2561_v17  ;;  %v4647_v17 = vld [vmem:[#allocation11] sm:$0xff] }
 0x791   :  { %3087 = vmatpush1.bf16.msra.mxu1 %v2689_v23  ;;  %3047 = vmatprep.subr.bf16.mxu0 %v2570_v30 }
 0x792   :  { %3088 = vmatprep.subr.bf16.mxu1 %v2698_v50 }
 0x794   :  { %3048 = vmatpush1.bf16.msra.mxu0 %v2569_v51  ;;  %v5178_v51 = vld [vmem:[#allocation34_spill] sm:$0xff] }
 0x795   :  { %3089 = vmatpush1.bf16.msra.mxu1 %v2697_v24  ;;  %3049 = vmatprep.subr.bf16.mxu0 %v2578_v53  ;;  %v3136_v24 = vrot.slane %v4647_v17, %v5178_v51 }
 0x796   :  { %3090 = vmatprep.subr.bf16.mxu1 %v2706_v13 }
 0x798   :  { %3050 = vmatpush1.bf16.msra.mxu0 %v2577_v6 }
 0x799   :  { %3091 = vmatpush1.bf16.msra.mxu1 %v2705_v62  ;;  %3051 = vmatprep.subr.bf16.mxu0 %v2586_v11  ;;  %v5179_v62 = vld [vmem:[#allocation36_spill] sm:$0xff] }
 0x79a   :  { %3092 = vmatprep.subr.bf16.mxu1 %v2714_v3  ;;  %v3140_v11 = vrot.slane %v4647_v17, %v5179_v62 }
 0x79c   :  { %3052 = vmatpush1.bf16.msra.mxu0 %v2585_v39 }
 0x79d   :  { %3093 = vmatpush1.bf16.msra.mxu1 %v2713_v29  ;;  %3053 = vmatprep.subr.bf16.mxu0 %v2594_v45 }
 0x79e   :  { %3094 = vmatprep.subr.bf16.mxu1 %v2722_v16 }
 0x7a0   :  { %3054 = vmatpush1.bf16.msra.mxu0 %v2593_v7 }
 0x7a1   :  { %3095 = vmatpush1.bf16.msra.mxu1 %v2721_v28  ;;  %3055 = vmatprep.subr.bf16.mxu0 %v2602_v9 }
 0x7a2   :  { %3096 = vmatprep.subr.bf16.mxu1 %v2730_v8 }
 0x7a4   :  { %3056 = vmatpush1.bf16.msra.mxu0 %v2601_v55 }
 0x7a5   :  { %3097 = vmatpush1.bf16.msra.mxu1 %v2729_v32  ;;  %3057 = vmatprep.subr.bf16.mxu0 %v2610_v61  ;;  %v5180_v61 = vld [vmem:[#allocation35_spill] sm:$0xff] }
 0x7a6   :  { %3098 = vmatprep.subr.bf16.mxu1 %v2738_v59  ;;  %v3144_v59 = vrot.slane %v4647_v17, %v5180_v61 }
 0x7a8   :  { %3058 = vmatpush1.bf16.msra.mxu0 %v2609_v60 }
 0x7a9   :  { %3099 = vmatpush1.bf16.msra.mxu1 %v2737_v0  ;;  %3059 = vmatprep.subr.bf16.mxu0 %v2618_v35  ;;  %v5181_v35 = vld [vmem:[#allocation37_spill] sm:$0xff] }
 0x7aa   :  { %3100 = vmatprep.subr.bf16.mxu1 %v2746_v14 }
 0x7ac   :  { %3060 = vmatpush1.bf16.msra.mxu0 %v2617_v25 }
 0x7ad   :  { %3101 = vmatpush1.bf16.msra.mxu1 %v2745_v19  ;;  %3061 = vmatprep.subr.bf16.mxu0 %v2626_v36 }
 0x7ae   :  { %3102 = vmatprep.subr.bf16.mxu1 %v2754_v38 }
 0x7b0   :  { %3062 = vmatpush1.bf16.msra.mxu0 %v2625_v26 }
 0x7b1   :  { %3103 = vmatpush1.bf16.msra.mxu1 %v2753_v18  ;;  %3063 = vmatprep.subr.bf16.mxu0 %v2634_v43 }
 0x7b2   :  { %3104 = vmatprep.subr.bf16.mxu1 %v2762_v20 }
 0x7b4   :  { %3064 = vmatpush1.bf16.msra.mxu0 %v2633_v31 }
 0x7b5   :  { %3105 = vmatpush1.bf16.msra.mxu1 %v2761_v27  ;;  %3065 = vmatprep.subr.bf16.mxu0 %v2642_v56 }
 0x7b6   :  { %3106 = vmatprep.subr.bf16.mxu1 %v2770_v57 }
 0x7b8   :  { %3066 = vmatpush1.bf16.msra.mxu0 %v2641_v63  ;;  %v5182_v63 = vld [vmem:[#allocation40_spill] sm:$0xff] }
 0x7b9   :  { %3107 = vmatpush1.bf16.msra.mxu1 %v2769_v4  ;;  %3067 = vmatprep.subr.bf16.mxu0 %v2650_v33  ;;  %v3152_v4 = vrot.slane %v4647_v17, %v5182_v63 }
 0x7ba   :  { %3108 = vmatprep.subr.bf16.mxu1 %v2778_v34 }
 0x7bc   :  { %3068 = vmatpush1.bf16.msra.mxu0 %v2649_v48 }
 0x7bd   :  { %3109 = vmatpush1.bf16.msra.mxu1 %v2777_v12  ;;  %3069 = vmatprep.subr.bf16.mxu0 %v2658_v15  ;;  %v5183_v12 = vld [vmem:[#allocation42_spill] sm:$0xff] }
 0x7be   :  { %3110 = vmatprep.subr.bf16.mxu1 %v2786_v2 }
 0x7c0   :  { %3070 = vmatpush1.bf16.msra.mxu0 %v2657_v21 }
 0x7c1   :  { %3111 = vmatpush1.bf16.msra.mxu1 %v2785_v22  ;;  %3071 = vmatprep.subr.bf16.mxu0 %v2666_v42 }
 0x7c2   :  { %3112 = vmatprep.subr.bf16.mxu1 %v2794_v46 }
 0x7c4   :  { %3072 = vmatpush1.bf16.msra.mxu0 %v2665_v47 }
 0x7c5   :  { %3113 = vmatpush1.bf16.msra.mxu1 %v2793_v49 }
 0x7c7   :  { %3074 = vmatmul.mubr.bf16.vlgmr.msra.gmra.mrb[76].mxu0 %v5176_v1 }
 0x7c8   :  { %3115 = vmatmul.mubr.bf16.vlgmr.msra.gmra.mrb[76].mxu1 %v5177_v37 }
 0x7da   :  { %v2829_v23 = vpop.f32.mrb[64].mxu0 }
 0x7db   :  { %v2870_v30 = vpop.f32.mrb[64].mxu1  ;;  %v2831_v53 = vpop.f32.mrb[65].mxu0 }
 0x7dc   :  { %v2871_v50 = vadd.f32 %v2870_v30, %v2829_v23  ;;  %v2872_v13 = vpop.f32.mrb[65].mxu1  ;;  %v2833_v3 = vpop.f32.mrb[66].mxu0 }
 0x7dd   :  { %v2873_v6 = vadd.f32 %v2872_v13, %v2831_v53  ;;  %v2874_v39 = vpop.f32.mrb[66].mxu1  ;;  %v2834_v29 = vpop.f32.mrb[67].mxu0  ;;  %v5184_v53 = vld [vmem:[#allocation41_spill] sm:$0xff] }
 0x7de   :  { %v3123_v1 = vadd.f32 %v2871_v50, %v4608_v10  ;;  %v2875_v37 = vpop.f32.mrb[67].mxu1  ;;  %v3160_v13 = vrot.slane %v4647_v17, %v5184_v53  ;;  %v5185_v39 = vld [vmem:[#allocation43_spill] sm:$0xff] }
 0x7df   :  { %v3124_v45 = vadd.f32 %v2873_v6, %v4611_v40  ;;  %v3148_v40 = vrot.slane %v4647_v17, %v5181_v35 }
 0x7e0   :  { %v4655_v16 = vadd.f32 %v3136_v24, %v3123_v1 }
 0x7e1   :  { %v4657_v7 = vadd.f32 %v3140_v11, %v3124_v45 }
 0x7e2   :  { %v3181_v28 = vmax.f32 %v4655_v16, 0.0 }
 0x7e3   :  { %v3182_v9 = vmax.f32 %v4657_v7, 0.0 }
 0x81a   :  { %v2911_v8 = vpop.f32.mrb[68].mxu0 }
 0x81b   :  { %v2952_v55 = vpop.f32.mrb[68].mxu1  ;;  %v2913_v60 = vpop.f32.mrb[69].mxu0 }
 0x81c   :  { %v2953_v32 = vadd.f32 %v2952_v55, %v2911_v8  ;;  %v2954_v10 = vpop.f32.mrb[69].mxu1  ;;  %v2915_v14 = vpop.f32.mrb[70].mxu0 }
 0x81d   :  { %v2955_v0 = vadd.f32 %v2954_v10, %v2913_v60  ;;  %v2956_v25 = vpop.f32.mrb[70].mxu1  ;;  %v2916_v36 = vpop.f32.mrb[71].mxu0 }
 0x81e   :  { %v3125_v19 = vadd.f32 %v2953_v32, %v4614_v58  ;;  %v2957_v38 = vpop.f32.mrb[71].mxu1  ;;  %v3156_v58 = vrot.slane %v4647_v17, %v5183_v12 }
 0x81f   :  { %v3126_v26 = vadd.f32 %v2955_v0, %v4617_v44 }
 0x820   :  { %v3175_v18 = vadd.f32 %v3144_v59, %v3125_v19 }
 0x821   :  { %v3176_v43 = vadd.f32 %v3148_v40, %v3126_v26 }
 0x822   :  { %v3183_v20 = vmax.f32 %v3175_v18, 0.0 }
 0x823   :  { %v3184_v31 = vmax.f32 %v3176_v43, 0.0 }
 0x85a   :  { %v2993_v27 = vpop.f32.mrb[72].mxu0 }
 0x85b   :  { %v3034_v56 = vpop.f32.mrb[72].mxu1  ;;  %v2995_v33 = vpop.f32.mrb[73].mxu0 }
 0x85c   :  { %v3035_v57 = vadd.f32 %v3034_v56, %v2993_v27  ;;  %v3036_v34 = vpop.f32.mrb[73].mxu1  ;;  %v2997_v15 = vpop.f32.mrb[74].mxu0 }
 0x85d   :  { %v3037_v48 = vadd.f32 %v3036_v34, %v2995_v33  ;;  %v3038_v2 = vpop.f32.mrb[74].mxu1  ;;  %v2998_v21 = vpop.f32.mrb[75].mxu0 }
 0x85e   :  { %v3127_v44 = vadd.f32 %v3035_v57, %v4620_v41  ;;  %v3039_v22 = vpop.f32.mrb[75].mxu1  ;;  %v3164_v41 = vrot.slane %v4647_v17, %v5185_v39 }
 0x85f   :  { %v3128_v42 = vadd.f32 %v3037_v48, %v4623_v54 }
 0x860   :  { %v3177_v46 = vadd.f32 %v3152_v4, %v3127_v44 }
 0x861   :  { %v3178_v47 = vadd.f32 %v3156_v58, %v3128_v42 }
 0x862   :  { %v3185_v49 = vmax.f32 %v3177_v46, 0.0 }
 0x863   :  { %v3186_v23 = vmax.f32 %v3178_v47, 0.0 }
 0x89a   :  { %v3075_v30 = vpop.f32.mrb[76].mxu0 }
 0x89b   :  { %v3116_v50 = vpop.f32.mrb[76].mxu1  ;;  %v3077_v6 = vpop.f32.mrb[77].mxu0 }
 0x89c   :  { %v3117_v24 = vadd.f32 %v3116_v50, %v3075_v30  ;;  %v3118_v11 = vpop.f32.mrb[77].mxu1  ;;  %v3079_v1 = vpop.f32.mrb[78].mxu0 }
 0x89d   :  { %v3119_v3 = vadd.f32 %v3118_v11, %v3077_v6  ;;  %v3120_v29 = vpop.f32.mrb[78].mxu1  ;;  %v3080_v37 = vpop.f32.mrb[79].mxu0 }
 0x89e   :  { %v3129_v54 = vadd.f32 %v3117_v24, %v4626_v52  ;;  %v3121_v45 = vpop.f32.mrb[79].mxu1 }
 0x89f   :  { %v3130_v8 = vadd.f32 %v3119_v3, %v4629_v5 }
 0x8a0   :  { %v3179_v55 = vadd.f32 %v3160_v13, %v3129_v54 }
 0x8a1   :  { %v3180_v32 = vadd.f32 %v3164_v41, %v3130_v8 }
 0x8a2   :  { %v3187_v59 = vmax.f32 %v3179_v55, 0.0 }
 0x8a3   :  { %v3188_v60 = vmax.f32 %v3180_v32, 0.0 }
 0x8a4   :  { %3475 = dma.done.wait [#allocation5 + $0x5], 128 }
 0x8a5   :  { %3476 = vsyncadd [#allocation5 + $0x5], 4294967168  ;;  %v3192_v10 = vld [vmem:[#allocation4] sm:$0xff]  ;;  %vm3265_vm1 = vcmask 7168  }
 0x8a6   :  { %v3197_v0 = vrot.slane %v3192_v10, %v5178_v51  ;;  %v3201_v40 = vrot.slane %v3192_v10, %v5179_v62  ;;  %v3205_v17 = vrot.slane %v3192_v10, %v5180_v61  ;;  %v3209_v14 = vrot.slane %v3192_v10, %v5181_v35 }
 0x8a7   :  { %v3213_v52 = vrot.slane %v3192_v10, %v5182_v63  ;;  %v3217_v36 = vrot.slane %v3192_v10, %v5183_v12  ;;  %v3221_v51 = vrot.slane %v3192_v10, %v5184_v53  ;;  %v3225_v61 = vrot.slane %v3192_v10, %v5185_v39 }
 0x8a8   :  { %v3234_v5 = vmul.f32 %v3197_v0, %v3181_v28  ;;  %v3235_v25 = vmul.f32 %v3201_v40, %v3182_v9  ;;  %v3236_v19 = vmul.f32 %v3205_v17, %v3183_v20  ;;  %v3237_v38 = vmul.f32 %v3209_v14, %v3184_v31  ;;  %v3332_v9 = vld [vmem:[#allocation6] ss:$0 sm:$0xff] }
 0x8a9   :  { %v3238_v62 = vmul.f32 %v3213_v52, %v3185_v49  ;;  %v3239_v35 = vmul.f32 %v3217_v36, %v3186_v23  ;;  %v3240_v27 = vmul.f32 %v3221_v51, %v3187_v59  ;;  %v3241_v16 = vmul.f32 %v3225_v61, %v3188_v60 }
 0x8aa   :  { %v3242_v26 = vadd.f32 %v3235_v25, %v3234_v5 }
 0x8ac   :  { %v3243_v18 = vadd.f32 %v3242_v26, %v3236_v19 }
 0x8ae   :  { %v3244_v43 = vadd.f32 %v3243_v18, %v3237_v38 }
 0x8b0   :  { %v3245_v56 = vadd.f32 %v3244_v43, %v3238_v62 }
 0x8b2   :  { %v3246_v28 = vadd.f32 %v3245_v56, %v3239_v35 }
 0x8b4   :  { %v3247_v57 = vadd.f32 %v3246_v28, %v3240_v27 }
 0x8b6   :  { %v3248_v7 = vadd.f32 %v3247_v57, %v3241_v16 }
 0x8b8   :  { %3249 = vadd.xlane.f32.xlu0 %v3248_v7 }
 0x945   :  { %v3250_v20 = vpop.xlane.xlu0 %3249 }
 0x946   :  { %v3258_v63 = vadd.f32 %v3332_v9, %v3250_v20 }
 0x948   :  { %v3333_v31 = vmul.f32 -1.442695, %v3258_v63 }
 0x94a   :  { %3369 = vpow2.f32 %v3333_v31 }
 0x954   :  { %v3370_v4 = vpop.eup %3369 }
 0x955   :  { %v3262_v33 = vadd.f32 1.0, %v3370_v4 }
 0x957   :  { %3371 = vrcp.f32 %v3262_v33 }
 0x961   :  { %v3372_v34 = vpop.eup %3371 }
 0x962   :  { %3266 = vst.msk [vmem:[%s4701_s7] sm:$0xff] %vm3265_vm1, %v3372_v34 }
 0x963   :  { %3271 = vsyncpa [#allocation8], 1 }
 0x964   :  { %3272 = vsyncpa [#allocation10], 1 }
 0x965   :  { %3273 = vsyncmov [#allocation5] }
 0x968   :  { %s3274_s6 = vpop.sfrf %3273 }
 0x969   :  { %p3334_p4 = scmp.ne.s32.totalorder %s3274_s6, 0 }
 0x96b   :  { %3278 = shalt.err (%p3334_p4)  }
 0x96c   :  { %3280 = vsyncmov [#allocation5 + $0x1] }
 0x96f   :  { %s3281_s14 = vpop.sfrf %3280 }
 0x970   :  { %p3335_p5 = scmp.ne.s32.totalorder %s3281_s14, 0 }
 0x972   :  { %3285 = shalt.err (%p3335_p5)  }
 0x973   :  { %3287 = vsyncmov [#allocation5 + $0x2] }
 0x976   :  { %s3288_s5 = vpop.sfrf %3287 }
 0x977   :  { %p3336_p6 = scmp.ne.s32.totalorder %s3288_s5, 0 }
 0x979   :  { %3292 = shalt.err (%p3336_p6)  }
 0x97a   :  { %3294 = vsyncmov [#allocation5 + $0x3] }
 0x97d   :  { %s3295_s21 = vpop.sfrf %3294 }
 0x97e   :  { %p3337_p7 = scmp.ne.s32.totalorder %s3295_s21, 0 }
 0x980   :  { %3299 = shalt.err (%p3337_p7)  }
 0x981   :  { %3301 = vsyncmov [#allocation5 + $0x4] }
 0x984   :  { %s3302_s7 = vpop.sfrf %3301 }
 0x985   :  { %p3338_p8 = scmp.ne.s32.totalorder %s3302_s7, 0 }
 0x987   :  { %3306 = shalt.err (%p3338_p8)  }
 0x988   :  { %3308 = vsyncmov [#allocation5 + $0x5] }
 0x98b   :  { %s3309_s22 = vpop.sfrf %3308 }
 0x98c   :  { %p3339_p9 = scmp.ne.s32.totalorder %s3309_s22, 0 }
 0x98e   :  { %3313 = shalt.err (%p3339_p9)  }

</bundles_post_ra>
